<compile_context>
chip_gen: v7x
topology: tpu7x:2x2x1
jax: 0.10.0
libtpu: 0.0.40
codegen_flags: <defaults>
</compile_context>

<pallas_src>
import jax
import jax.numpy as jnp
import numpy as np
from jax import lax
from jax.experimental import pallas as pl
from jax.experimental.pallas import tpu as pltpu


def _round_up(x: int, m: int) -> int:
    return ((x + m - 1) // m) * m


# Conservative budgets that hold on every generation (v7x: 64 MiB physical VMEM,
# v5e: 16 MiB default scoped limit -> raised explicitly below).
_VMEM_BUDGET_BYTES = 40 * 1024 * 1024
_VMEM_LIMIT_BYTES = 48 * 1024 * 1024


def critic_kernel(x_ref, w1_ref, b1_ref, w2_ref, b2_ref, w3_ref, b3_ref, o_ref):
    # x_ref:  (TB, D)    f32  unpadded state tile, streamed straight from HBM
    # w1_ref: (D, H1)    bf16          b1_ref: (1, H1) f32
    # w2_ref: (H1, H2)   bf16          b2_ref: (1, H2) f32
    # w3_ref: (1, H2)    f32           b3_ref: (1, 1)  f32
    # o_ref:  (1, 1, TB) f32  lane-dense output row for this tile
    #
    # f32 -> bf16 cast happens here (cheap VPU work, hidden under DMA/MXU),
    # instead of materializing a padded bf16 copy of the state in HBM.
    x = x_ref[...].astype(w1_ref.dtype)

    # Layer 1: MXU matmul (bf16 in, f32 accumulate); bias + ReLU in f32 on VPU.
    h1 = jnp.dot(x, w1_ref[...], preferred_element_type=jnp.float32)
    h1 = jnp.maximum(h1 + b1_ref[...], 0.0)

    # Layer 2.
    h2 = jnp.dot(h1.astype(w2_ref.dtype), w2_ref[...],
                 preferred_element_type=jnp.float32)
    h2 = jnp.maximum(h2 + b2_ref[...], 0.0)

    # Layer 3 (H2 -> 1): contract the lane dims of w3 (1,H2) and h2 (TB,H2),
    # giving a (1, TB) lane-dense row so the store is an unmasked full-lane vst.
    # NOTE(perf-review): this M=1 dot_general may lower with an XLU transpose of
    # h2; acceptable while the kernel stays HBM-bound on the f32 state stream.
    out_row = lax.dot_general(
        w3_ref[...], h2,
        dimension_numbers=(((1,), (1,)), ((), ())),
        preferred_element_type=jnp.float32,
    ) + b3_ref[...]                                    # (1, TB)

    o_ref[0] = out_row.astype(o_ref.dtype)


def prepare_critic_params(params, compute_dtype=jnp.bfloat16):
    """One-time dtype staging, hoisted out of the per-call path.

    W1/W2 -> bf16 for the MXU; biases and the tiny final-layer row stay f32 so
    all VPU epilogue work (bias add, ReLU) runs in f32 (v5e has no bf16 VPU).
    Call this once when the critic parameters change, not per forward call.
    """
    w1, b1, w2, b2, w3, b3 = params
    return (
        jnp.asarray(w1, compute_dtype),
        jnp.asarray(b1, jnp.float32).reshape(1, -1),
        jnp.asarray(w2, compute_dtype),
        jnp.asarray(b2, jnp.float32).reshape(1, -1),
        jnp.asarray(w3, jnp.float32).reshape(1, -1),
        jnp.asarray(b3, jnp.float32).reshape(1, 1),
    )


def critic_forward(state, prepared_params, *, tb=1024):
    """state: (B, state_dim) f32, prepared_params from prepare_critic_params()
    -> (B, 1) f32 value estimates (Linear->ReLU->Linear->ReLU->Linear)."""
    w1, b1, w2, b2, w3, b3 = prepared_params
    B, D = state.shape
    H1 = w1.shape[1]
    H2 = w2.shape[1]

    # --- batch tile: multiple of 128 (lane-dense (1,1,tb) output, clean tile
    # packing; never emit ragged tiles like 104), capped so the double-buffered
    # f32 state tile plus the resident weights fit the cross-generation VMEM
    # budget (v7x has only 64 MiB physical VMEM).
    weight_bytes = (w1.size * w1.dtype.itemsize + w2.size * w2.dtype.itemsize
                    + (b1.size + b2.size + w3.size + b3.size) * 4)
    state_row_bytes = D * state.dtype.itemsize
    avail = _VMEM_BUDGET_BYTES - 2 * weight_bytes        # weights double-buffered
    tb_cap = max(128, (avail // (2 * state_row_bytes)) // 128 * 128)
    tb_eff = max(128, min(_round_up(tb, 128), tb_cap, _round_up(B, 128)))
    Bp = _round_up(B, tb_eff)
    if Bp != B:
        # Only fires for ragged batches; choose B as a multiple of 128 in
        # steady-state training to avoid this extra f32 copy of the state.
        state = jnp.pad(state, ((0, Bp - B), (0, 0)))
    grid = (Bp // tb_eff,)

    flops = 2 * Bp * (D * H1 + H1 * H2 + H2)
    bytes_accessed = Bp * D * state.dtype.itemsize + weight_bytes + Bp * 4

    out3d = pl.pallas_call(
        critic_kernel,
        out_shape=jax.ShapeDtypeStruct((grid[0], 1, tb_eff), jnp.float32),
        grid_spec=pltpu.PrefetchScalarGridSpec(
            num_scalar_prefetch=0,
            grid=grid,
            in_specs=[
                # Unpadded f32 state tile: last block dim == full array dim (D);
                # Mosaic handles the lane padding of K internally.
                pl.BlockSpec((tb_eff, D), lambda i: (i, 0)),
                pl.BlockSpec((D, H1), lambda i: (0, 0)),     # W1 (resident)
                pl.BlockSpec((1, H1), lambda i: (0, 0)),     # b1
                pl.BlockSpec((H1, H2), lambda i: (0, 0)),    # W2 (resident)
                pl.BlockSpec((1, H2), lambda i: (0, 0)),     # b2
                pl.BlockSpec((1, H2), lambda i: (0, 0)),     # W3 row
                pl.BlockSpec((1, 1), lambda i: (0, 0)),      # b3
            ],
            out_specs=pl.BlockSpec((1, 1, tb_eff), lambda i: (i, 0, 0)),
        ),
        compiler_params=pltpu.CompilerParams(
            dimension_semantics=("parallel",),
            vmem_limit_bytes=_VMEM_LIMIT_BYTES,
        ),
        cost_estimate=pl.CostEstimate(
            flops=flops, transcendentals=0, bytes_accessed=bytes_accessed),
    )(state, w1, b1, w2, b2, w3, b3)

    # (G, 1, tb) -> (Bp, 1) -> drop batch padding.
    return out3d.reshape(Bp, 1)[:B]


def init_critic_params(key, state_dim, hidden_sizes):
    """Deterministic PyTorch-style init: U(-1/sqrt(fan_in), 1/sqrt(fan_in)).
    Weights stored as (in_features, out_features); final layer as a (1, H2) row."""
    H1, H2 = hidden_sizes
    ks = jax.random.split(key, 6)

    def uinit(k, shape, fan_in):
        bound = 1.0 / np.sqrt(fan_in)
        return jax.random.uniform(k, shape, jnp.float32, -bound, bound)

    w1 = uinit(ks[0], (state_dim, H1), state_dim)
    b1 = uinit(ks[1], (1, H1), state_dim)
    w2 = uinit(ks[2], (H1, H2), H1)
    b2 = uinit(ks[3], (1, H2), H1)
    w3 = uinit(ks[4], (1, H2), H2)
    b3 = uinit(ks[5], (1, 1), H2)
    return (w1, b1, w2, b2, w3, b3)


def critic_forward_ref(state, params, compute_dtype=jnp.bfloat16):
    """Pure-JAX reference mirroring the kernel's bf16-MXU / f32-accumulate math.
    (Differs from a pure-f32 PyTorch forward by ~2e-3; acceptable for a critic.)"""
    w1, b1, w2, b2, w3, b3 = params
    h1 = jnp.dot(state.astype(compute_dtype), w1.astype(compute_dtype),
                 preferred_element_type=jnp.float32) + b1
    h1 = jnp.maximum(h1, 0.0)
    h2 = jnp.dot(h1.astype(compute_dtype), w2.astype(compute_dtype),
                 preferred_element_type=jnp.float32) + b2
    h2 = jnp.maximum(h2, 0.0)
    return h2 @ w3.T + b3


if __name__ == "__main__":
    # The critic's state in the surrounding RL script is the flattened SimpleNN
    # gradient vector plus the loss scalar:
    #   fc1: 13*64+64, fc2: 64*32+32, fc3: 32*3+3, lr1..lr3: 3 -> 3078; +1 = 3079
    batch = 200                      # exercises the 128-multiple batch padding path
    state_dim = 3079                 # num_gradients + 1
    hidden_sizes = [128, 128]

    key = jax.random.PRNGKey(0)
    k_state, k_params = jax.random.split(key)

    state = jax.random.normal(k_state, (batch, state_dim), dtype=jnp.float32)
    params = init_critic_params(k_params, state_dim, hidden_sizes)
    prepared = prepare_critic_params(params)   # one-time dtype staging (hoisted)

    out = jax.block_until_ready(critic_forward(state, prepared))
    ref = jax.block_until_ready(critic_forward_ref(state, params))

    np.testing.assert_allclose(np.asarray(out), np.asarray(ref),
                               rtol=2e-3, atol=2e-3)
    assert out.shape == (batch, 1) and out.dtype == jnp.float32
    print("KERNEL_OK")
</pallas_src>

<mosaic_0001>
module attributes {stable_mosaic.version = 11 : i64} {
  func.func @critic_kernel(%arg0: i32, %arg1: memref<256x3079xf32, #tpu.memory_space<vmem>>, %arg2: memref<3079x128xbf16, #tpu.memory_space<vmem>>, %arg3: memref<1x128xf32, #tpu.memory_space<vmem>>, %arg4: memref<128x128xbf16, #tpu.memory_space<vmem>>, %arg5: memref<1x128xf32, #tpu.memory_space<vmem>>, %arg6: memref<1x128xf32, #tpu.memory_space<vmem>>, %arg7: memref<1x1xf32, #tpu.memory_space<vmem>>, %arg8: memref<1x1x256xf32, #tpu.memory_space<vmem>>) attributes {dimension_semantics = [#tpu.dimension_semantics<parallel>], iteration_bounds = array<i64: 1>, scalar_prefetch = 0 : i64, scratch_operands = 0 : i64, tpu.core_type = #tpu.core_type<tc>, window_params = [{transform_indices = @transform_0, window_bounds = array<i64: 256, 3079>}, {pipeline_mode = #tpu.pipeline_mode<synchronous>, transform_indices = @transform_1, window_bounds = array<i64: 3079, 128>}, {pipeline_mode = #tpu.pipeline_mode<synchronous>, transform_indices = @transform_2, window_bounds = array<i64: 1, 128>}, {pipeline_mode = #tpu.pipeline_mode<synchronous>, transform_indices = @transform_3, window_bounds = array<i64: 128, 128>}, {pipeline_mode = #tpu.pipeline_mode<synchronous>, transform_indices = @transform_4, window_bounds = array<i64: 1, 128>}, {pipeline_mode = #tpu.pipeline_mode<synchronous>, transform_indices = @transform_5, window_bounds = array<i64: 1, 128>}, {pipeline_mode = #tpu.pipeline_mode<synchronous>, transform_indices = @transform_6, window_bounds = array<i64: 1, 1>}, {transform_indices = @transform_7, window_bounds = array<i64: 1, 1, 256>}]} {
    %c0 = arith.constant 0 : index
    %c0_0 = arith.constant 0 : index
    %0 = vector.load %arg1[%c0, %c0_0] : memref<256x3079xf32, #tpu.memory_space<vmem>>, vector<256x3079xf32>
    %1 = arith.truncf %0 : vector<256x3079xf32> to vector<256x3079xbf16>
    %c0_1 = arith.constant 0 : index
    %c0_2 = arith.constant 0 : index
    %2 = vector.load %arg2[%c0_1, %c0_2] : memref<3079x128xbf16, #tpu.memory_space<vmem>>, vector<3079x128xbf16>
    %cst = arith.constant dense<0.000000e+00> : vector<256x128xf32>
    %3 = tpu.matmul %1, %2, %cst {dimension_numbers = #tpu.dot_dimension_numbers<[1], [0], [0], [1], [0, 0, 1, 1], [], []>} : vector<256x3079xbf16>, vector<3079x128xbf16>, vector<256x128xf32> -> vector<256x128xf32>
    %c0_3 = arith.constant 0 : index
    %c0_4 = arith.constant 0 : index
    %4 = vector.load %arg3[%c0_3, %c0_4] : memref<1x128xf32, #tpu.memory_space<vmem>>, vector<1x128xf32>
    %5 = vector.broadcast %4 : vector<1x128xf32> to vector<256x128xf32>
    %6 = arith.addf %3, %5 : vector<256x128xf32>
    %cst_5 = arith.constant 0.000000e+00 : f32
    %7 = vector.broadcast %cst_5 : f32 to vector<256x128xf32>
    %8 = arith.maximumf %6, %7 : vector<256x128xf32>
    %9 = arith.truncf %8 : vector<256x128xf32> to vector<256x128xbf16>
    %c0_6 = arith.constant 0 : index
    %c0_7 = arith.constant 0 : index
    %10 = vector.load %arg4[%c0_6, %c0_7] : memref<128x128xbf16, #tpu.memory_space<vmem>>, vector<128x128xbf16>
    %cst_8 = arith.constant dense<0.000000e+00> : vector<256x128xf32>
    %11 = tpu.matmul %9, %10, %cst_8 {dimension_numbers = #tpu.dot_dimension_numbers<[1], [0], [0], [1], [0, 0, 1, 1], [], []>} : vector<256x128xbf16>, vector<128x128xbf16>, vector<256x128xf32> -> vector<256x128xf32>
    %c0_9 = arith.constant 0 : index
    %c0_10 = arith.constant 0 : index
    %12 = vector.load %arg5[%c0_9, %c0_10] : memref<1x128xf32, #tpu.memory_space<vmem>>, vector<1x128xf32>
    %13 = vector.broadcast %12 : vector<1x128xf32> to vector<256x128xf32>
    %14 = arith.addf %11, %13 : vector<256x128xf32>
    %cst_11 = arith.constant 0.000000e+00 : f32
    %15 = vector.broadcast %cst_11 : f32 to vector<256x128xf32>
    %16 = arith.maximumf %14, %15 : vector<256x128xf32>
    %c0_12 = arith.constant 0 : index
    %c0_13 = arith.constant 0 : index
    %17 = vector.load %arg6[%c0_12, %c0_13] : memref<1x128xf32, #tpu.memory_space<vmem>>, vector<1x128xf32>
    %cst_14 = arith.constant dense<0.000000e+00> : vector<1x256xf32>
    %18 = tpu.matmul %17, %16, %cst_14 {dimension_numbers = #tpu.dot_dimension_numbers<[1], [1], [0], [0], [0, 0, 1, 0], [], []>} : vector<1x128xf32>, vector<256x128xf32>, vector<1x256xf32> -> vector<1x256xf32>
    %c0_15 = arith.constant 0 : index
    %c0_16 = arith.constant 0 : index
    %19 = vector.load %arg7[%c0_15, %c0_16] : memref<1x1xf32, #tpu.memory_space<vmem>>, vector<1x1xf32>
    %20 = vector.broadcast %19 : vector<1x1xf32> to vector<1x256xf32>
    %21 = arith.addf %18, %20 : vector<1x256xf32>
    %c0_17 = arith.constant 0 : index
    %c0_18 = arith.constant 0 : index
    %c0_19 = arith.constant 0 : index
    %22 = vector.load %arg8[%c0_17, %c0_18, %c0_19] : memref<1x1x256xf32, #tpu.memory_space<vmem>>, vector<1x1x256xf32>
    %23 = vector.shape_cast %22 : vector<1x1x256xf32> to vector<1x256xf32>
    %24 = vector.shape_cast %21 : vector<1x256xf32> to vector<1x1x256xf32>
    tpu.vector_store %arg8[%c0_17, %c0_18, %c0_19], %24 {strides = array<i32>} : memref<1x1x256xf32, #tpu.memory_space<vmem>>, vector<1x1x256xf32>,
    return
  }
  func.func @transform_0(%arg0: i32) -> (i32, i32) {
    %c0_i32 = arith.constant 0 : i32
    %c0_i32_0 = arith.constant 0 : i32
    return %arg0, %c0_i32 : i32, i32
  }
  func.func @transform_1(%arg0: i32) -> (i32, i32) {
    %c0_i32 = arith.constant 0 : i32
    %c0_i32_0 = arith.constant 0 : i32
    %c0_i32_1 = arith.constant 0 : i32
    return %c0_i32, %c0_i32_0 : i32, i32
  }
  func.func @transform_2(%arg0: i32) -> (i32, i32) {
    %c0_i32 = arith.constant 0 : i32
    %c0_i32_0 = arith.constant 0 : i32
    %c0_i32_1 = arith.constant 0 : i32
    return %c0_i32, %c0_i32_0 : i32, i32
  }
  func.func @transform_3(%arg0: i32) -> (i32, i32) {
    %c0_i32 = arith.constant 0 : i32
    %c0_i32_0 = arith.constant 0 : i32
    %c0_i32_1 = arith.constant 0 : i32
    return %c0_i32, %c0_i32_0 : i32, i32
  }
  func.func @transform_4(%arg0: i32) -> (i32, i32) {
    %c0_i32 = arith.constant 0 : i32
    %c0_i32_0 = arith.constant 0 : i32
    %c0_i32_1 = arith.constant 0 : i32
    return %c0_i32, %c0_i32_0 : i32, i32
  }
  func.func @transform_5(%arg0: i32) -> (i32, i32) {
    %c0_i32 = arith.constant 0 : i32
    %c0_i32_0 = arith.constant 0 : i32
    %c0_i32_1 = arith.constant 0 : i32
    return %c0_i32, %c0_i32_0 : i32, i32
  }
  func.func @transform_6(%arg0: i32) -> (i32, i32) {
    %c0_i32 = arith.constant 0 : i32
    %c0_i32_0 = arith.constant 0 : i32
    %c0_i32_1 = arith.constant 0 : i32
    return %c0_i32, %c0_i32_0 : i32, i32
  }
  func.func @transform_7(%arg0: i32) -> (i32, i32, i32) {
    %c0_i32 = arith.constant 0 : i32
    %c0_i32_0 = arith.constant 0 : i32
    %c0_i32_1 = arith.constant 0 : i32
    return %arg0, %c0_i32, %c0_i32_0 : i32, i32, i32
  }
}

</mosaic_0001>

<bundles_post_ra>
// kernel: tpu_custom_call.1
= control target key start
LH: loop header
LB: loop body
LE: loop exit
PB: predicated region body
PF: predicated region fallthrough
CT: control target
= control target key end

     0   :  { %s11110_s0 = inlined_call_operand.vmem [shape: f32[256,3079], index: 0, kind: input, shape index: {}]   ;;  %s11111_s1 = inlined_call_operand.vmem [shape: bf16[3079,128], index: 1, kind: input, shape index: {}]   ;;  %s11112_s2 = inlined_call_operand.vmem [shape: f32[1,128], index: 2, kind: input, shape index: {}]   ;;  %s11113_s3 = inlined_call_operand.vmem [shape: bf16[128,128], index: 3, kind: input, shape index: {}]   ;;  %s11114_s4 = inlined_call_operand.vmem [shape: f32[1,128], index: 4, kind: input, shape index: {}]   ;;  %s11115_s5 = inlined_call_operand.vmem [shape: f32[1,128], index: 5, kind: input, shape index: {}]   ;;  %s11116_s6 = inlined_call_operand.<no memory space> [shape: f32[1,1], index: 6, kind: input, shape index: {}]   ;;  %s11117_s7 = inlined_call_operand.hbm [shape: f32[1,1,256], index: 7, kind: output, shape index: {}]  }
   0x1   :  { %v12_v0 = vstv %s11116_s6 }
   0x2   :  { %13 = vst [vmem:[#allocation2] sm:$0x1] %v12_v0 }
   0x3   :  { %v7114_v1 = vld [vmem:[%s11111_s1 + $0x40] sm:$0xff]   ;;  %v7118_v5 = vld [vmem:[%s11111_s1 + $0x48] sm:$0xff]   ;;  %v7122_v9 = vld [vmem:[%s11111_s1 + $0x50] sm:$0xff]  }
   0x4   :  { %v7115_v2 = vld [vmem:[%s11111_s1] sm:$0xff]   ;;  %5576 = vmatprep.subr.bf16.mxu0 %v7114_v1  ;;  %v7119_v6 = vld [vmem:[%s11111_s1 + $0x8] sm:$0xff]   ;;  %v7123_v10 = vld [vmem:[%s11111_s1 + $0x10] sm:$0xff]  }
   0x5   :  { %v7116_v3 = vld [vmem:[%s11111_s1 + $0xc0] sm:$0xff]   ;;  %5577 = vmatpush3.bf16.msra.mxu0 %v7115_v2  ;;  %v7120_v7 = vld [vmem:[%s11111_s1 + $0xc8] sm:$0xff]   ;;  %v7124_v11 = vld [vmem:[%s11111_s1 + $0xd0] sm:$0xff]  }
   0x6   :  { %v7117_v4 = vld [vmem:[%s11111_s1 + $0x80] sm:$0xff]   ;;  %5688 = vmatprep.subr.bf16.mxu1 %v7116_v3  ;;  %5578 = vmatprep.subr.bf16.mxu0 %v7118_v5  ;;  %v7121_v8 = vld [vmem:[%s11111_s1 + $0x88] sm:$0xff]   ;;  %v7125_v12 = vld [vmem:[%s11111_s1 + $0x90] sm:$0xff]  }
   0x7   :  { %5689 = vmatpush3.bf16.msra.mxu1 %v7117_v4  ;;  %v7126_v13 = vld [vmem:[%s11111_s1 + $0x58] sm:$0xff]   ;;  %v7130_v17 = vld [vmem:[%s11111_s1 + $0x60] sm:$0xff]   ;;  %v7134_v21 = vld [vmem:[%s11111_s1 + $0x68] sm:$0xff]  }
   0x8   :  { %5690 = vmatprep.subr.bf16.mxu1 %v7120_v7  ;;  %v7127_v14 = vld [vmem:[%s11111_s1 + $0x18] sm:$0xff]   ;;  %v7131_v18 = vld [vmem:[%s11111_s1 + $0x20] sm:$0xff]   ;;  %v7135_v22 = vld [vmem:[%s11111_s1 + $0x28] sm:$0xff]  }
   0x9   :  { %5579 = vmatpush3.bf16.msra.mxu0 %v7119_v6  ;;  %v7128_v15 = vld [vmem:[%s11111_s1 + $0xd8] sm:$0xff]   ;;  %v7132_v19 = vld [vmem:[%s11111_s1 + $0xe0] sm:$0xff]   ;;  %v7136_v23 = vld [vmem:[%s11111_s1 + $0xe8] sm:$0xff]  }
   0xa   :  { %5580 = vmatprep.subr.bf16.mxu0 %v7122_v9  ;;  %v7129_v16 = vld [vmem:[%s11111_s1 + $0x98] sm:$0xff]   ;;  %v7133_v20 = vld [vmem:[%s11111_s1 + $0xa0] sm:$0xff]   ;;  %v7137_v24 = vld [vmem:[%s11111_s1 + $0xa8] sm:$0xff]  }
   0xb   :  { %5691 = vmatpush3.bf16.msra.mxu1 %v7121_v8  ;;  %v7138_v25 = vld [vmem:[%s11111_s1 + $0x70] sm:$0xff]   ;;  %v7142_v29 = vld [vmem:[%s11111_s1 + $0x78] sm:$0xff]   ;;  %v31_v32 = vld [vmem:[%s11110_s0 + $0x8] sm:$0xff] }
   0xc   :  { %5692 = vmatprep.subr.bf16.mxu1 %v7124_v11  ;;  %v7139_v26 = vld [vmem:[%s11111_s1 + $0x30] sm:$0xff]   ;;  %v7143_v30 = vld [vmem:[%s11111_s1 + $0x38] sm:$0xff]   ;;  %v30_v36 = vld [vmem:[%s11110_s0] sm:$0xff] }
   0xd   :  { %5581 = vmatpush3.bf16.msra.mxu0 %v7123_v10  ;;  %v7140_v27 = vld [vmem:[%s11111_s1 + $0xf0] sm:$0xff]   ;;  %v7144_v31 = vld [vmem:[%s11111_s1 + $0xf8] sm:$0xff]   ;;  %v55_v37 = vld [vmem:[%s11110_s0 + $0xc8] sm:$0xff] }
   0xe   :  { %5582 = vmatprep.subr.bf16.mxu0 %v7126_v13  ;;  %v7141_v28 = vld [vmem:[%s11111_s1 + $0xb0] sm:$0xff]   ;;  %v7145_v35 = vld [vmem:[%s11111_s1 + $0xb8] sm:$0xff]   ;;  %v830_v38 = vpack.c.bf16 %v55_v37, %v30_v36  ;;  %v7146_v39 = vld [vmem:[%s11111_s1 + $0x140] sm:$0xff]  }
   0xf   :  { %5693 = vmatpush3.bf16.msra.mxu1 %v7125_v12  ;;  %v56_v33 = vld [vmem:[%s11110_s0 + $0xd0] sm:$0xff]  ;;  %v33_v40 = vld [vmem:[%s11110_s0 + $0x18] sm:$0xff]  ;;  %v58_v41 = vld [vmem:[%s11110_s0 + $0xe0] sm:$0xff] }
  0x10   :  { %5694 = vmatprep.subr.bf16.mxu1 %v7128_v15  ;;  %v831_v34 = vpack.c.bf16 %v56_v33, %v31_v32  ;;  %v833_v42 = vpack.c.bf16 %v58_v41, %v33_v40  ;;  %v7147_v43 = vld [vmem:[%s11111_s1 + $0x100] sm:$0xff]   ;;  %v32_v44 = vld [vmem:[%s11110_s0 + $0x10] sm:$0xff]  ;;  %v57_v45 = vld [vmem:[%s11110_s0 + $0xd8] sm:$0xff] }
  0x11   :  { %5583 = vmatpush3.bf16.msra.mxu0 %v7127_v14  ;;  %v81_v46 = vld [vmem:[%s11110_s0 + $0x198] sm:$0xff]  ;;  %v832_v47 = vpack.c.bf16 %v57_v45, %v32_v44  ;;  %v106_v48 = vld [vmem:[%s11110_s0 + $0x260] sm:$0xff]  ;;  %v80_v49 = vld [vmem:[%s11110_s0 + $0x190] sm:$0xff] }
  0x12   :  { %5584 = vmatprep.subr.bf16.mxu0 %v7130_v17  ;;  %2865 = vmatprep.mubr.bf16.mxu0 %v831_v34  ;;  %v105_v50 = vld [vmem:[%s11110_s0 + $0x258] sm:$0xff]  ;;  %v856_v51 = vpack.c.bf16 %v106_v48, %v81_v46  ;;  %v83_v52 = vld [vmem:[%s11110_s0 + $0x1a8] sm:$0xff]  ;;  %v108_v53 = vld [vmem:[%s11110_s0 + $0x270] sm:$0xff] }
  0x13   :  { %5695 = vmatpush3.bf16.msra.mxu1 %v7129_v16  ;;  %3026 = vmatprep.mubr.bf16.mxu1 %v833_v42  ;;  %v858_v54 = vpack.c.bf16 %v108_v53, %v83_v52  ;;  %v131_v55 = vld [vmem:[%s11110_s0 + $0x328] sm:$0xff]  ;;  %v156_v56 = vld [vmem:[%s11110_s0 + $0x3f0] sm:$0xff]  ;;  %v855_v57 = vpack.c.bf16 %v105_v50, %v80_v49  ;;  %v82_v58 = vld [vmem:[%s11110_s0 + $0x1a0] sm:$0xff] }
  0x14   :  { %5696 = vmatprep.subr.bf16.mxu1 %v7132_v19  ;;  %v107_v59 = vld [vmem:[%s11110_s0 + $0x268] sm:$0xff]  ;;  %v881_v60 = vpack.c.bf16 %v156_v56, %v131_v55  ;;  %v133_v62 = vld [vmem:[%s11110_s0 + $0x338] sm:$0xff]  ;;  %v158_v63 = vld [vmem:[%s11110_s0 + $0x400] sm:$0xff] }
  0x15   :  { %5585 = vmatpush3.bf16.msra.mxu0 %v7131_v18  ;;  %v7148_v61 = vld [vmem:[%s11111_s1 + $0x148] sm:$0xff]   ;;  %v857_v0 = vpack.c.bf16 %v107_v59, %v82_v58  ;;  %v883_v2 = vpack.c.bf16 %v158_v63, %v133_v62  ;;  %v130_v3 = vld [vmem:[%s11110_s0 + $0x320] sm:$0xff]  ;;  %v181_v5 = vld [vmem:[%s11110_s0 + $0x4b8] sm:$0xff] }
  0x16   :  { %5586 = vmatprep.subr.bf16.mxu0 %v7134_v21  ;;  %v7149_v1 = vld [vmem:[%s11111_s1 + $0x108] sm:$0xff]   ;;  %v206_v6 = vld [vmem:[%s11110_s0 + $0x580] sm:$0xff]  ;;  %v132_v7 = vld [vmem:[%s11110_s0 + $0x330] sm:$0xff] }
  0x17   :  { %5697 = vmatpush3.bf16.msra.mxu1 %v7133_v20  ;;  %v155_v4 = vld [vmem:[%s11110_s0 + $0x3e8] sm:$0xff]  ;;  %v157_v8 = vld [vmem:[%s11110_s0 + $0x3f8] sm:$0xff]  ;;  %v7150_v10 = vld [vmem:[%s11111_s1 + $0x150] sm:$0xff]   ;;  %v906_v11 = vpack.c.bf16 %v206_v6, %v181_v5 }
  0x18   :  { %5698 = vmatprep.subr.bf16.mxu1 %v7136_v23  ;;  %v880_v9 = vpack.c.bf16 %v155_v4, %v130_v3  ;;  %v183_v12 = vld [vmem:[%s11110_s0 + $0x4c8] sm:$0xff]  ;;  %v208_v13 = vld [vmem:[%s11110_s0 + $0x590] sm:$0xff]  ;;  %v882_v15 = vpack.c.bf16 %v157_v8, %v132_v7  ;;  %v205_v18 = vld [vmem:[%s11110_s0 + $0x578] sm:$0xff] }
  0x19   :  { %5587 = vmatpush3.bf16.msra.mxu0 %v7135_v22  ;;  %v7151_v14 = vld [vmem:[%s11111_s1 + $0x110] sm:$0xff]   ;;  %v908_v16 = vpack.c.bf16 %v208_v13, %v183_v12  ;;  %v182_v19 = vld [vmem:[%s11110_s0 + $0x4c0] sm:$0xff]  ;;  %v231_v20 = vld [vmem:[%s11110_s0 + $0x648] sm:$0xff] }
  0x1a   :  { %5588 = vmatprep.subr.bf16.mxu0 %v7138_v25  ;;  %v180_v17 = vld [vmem:[%s11110_s0 + $0x4b0] sm:$0xff]  ;;  %v207_v22 = vld [vmem:[%s11110_s0 + $0x588] sm:$0xff]  ;;  %v258_v25 = vld [vmem:[%s11110_s0 + $0x720] sm:$0xff] }
  0x1b   :  { %5699 = vmatpush3.bf16.msra.mxu1 %v7137_v24  ;;  %v256_v21 = vld [vmem:[%s11110_s0 + $0x710] sm:$0xff]  ;;  %v905_v23 = vpack.c.bf16 %v205_v18, %v180_v17  ;;  %v233_v24 = vld [vmem:[%s11110_s0 + $0x658] sm:$0xff]  ;;  %v255_v32 = vld [vmem:[%s11110_s0 + $0x708] sm:$0xff] }
  0x1c   :  { %5700 = vmatprep.subr.bf16.mxu1 %v7140_v27  ;;  %v931_v27 = vpack.c.bf16 %v256_v21, %v231_v20  ;;  %v281_v33 = vld [vmem:[%s11110_s0 + $0x7d8] sm:$0xff]  ;;  %v306_v34 = vld [vmem:[%s11110_s0 + $0x8a0] sm:$0xff]  ;;  %v283_v40 = vld [vmem:[%s11110_s0 + $0x7e8] sm:$0xff] }
  0x1d   :  { %5589 = vmatpush3.bf16.msra.mxu0 %v7139_v26  ;;  %v7152_v26 = vld [vmem:[%s11111_s1 + $0x158] sm:$0xff]   ;;  %v7154_v36 = vld [vmem:[%s11111_s1 + $0x160] sm:$0xff]   ;;  %v308_v41 = vld [vmem:[%s11110_s0 + $0x8b0] sm:$0xff] }
  0x1e   :  { %5590 = vmatprep.subr.bf16.mxu0 %v7142_v29  ;;  %v907_v29 = vpack.c.bf16 %v207_v22, %v182_v19  ;;  %v7155_v42 = vld [vmem:[%s11111_s1 + $0x120] sm:$0xff]   ;;  %v280_v44 = vld [vmem:[%s11110_s0 + $0x7d0] sm:$0xff]  ;;  %v958_v45 = vpack.c.bf16 %v308_v41, %v283_v40  ;;  %v305_v46 = vld [vmem:[%s11110_s0 + $0x898] sm:$0xff] }
  0x1f   :  { %5701 = vmatpush3.bf16.msra.mxu1 %v7141_v28  ;;  %v7153_v28 = vld [vmem:[%s11111_s1 + $0x118] sm:$0xff]   ;;  %v356_v48 = vld [vmem:[%s11110_s0 + $0xa30] sm:$0xff]  ;;  %v7156_v49 = vld [vmem:[%s11111_s1 + $0x168] sm:$0xff]   ;;  %v955_v52 = vpack.c.bf16 %v305_v46, %v280_v44 }
  0x20   :  { %5702 = vmatprep.subr.bf16.mxu1 %v7144_v31  ;;  %v230_v31 = vld [vmem:[%s11110_s0 + $0x640] sm:$0xff]  ;;  %v333_v53 = vld [vmem:[%s11110_s0 + $0x978] sm:$0xff]  ;;  %v355_v62 = vld [vmem:[%s11110_s0 + $0xa28] sm:$0xff] }
  0x21   :  { %5591 = vmatpush3.bf16.msra.mxu0 %v7143_v30  ;;  %v933_v30 = vpack.c.bf16 %v258_v25, %v233_v24  ;;  %v930_v37 = vpack.c.bf16 %v255_v32, %v230_v31  ;;  %v282_v50 = vld [vmem:[%s11110_s0 + $0x7e0] sm:$0xff]  ;;  %v332_v63 = vld [vmem:[%s11110_s0 + $0x970] sm:$0xff]  ;;  %v383_v4 = vld [vmem:[%s11110_s0 + $0xb08] sm:$0xff] }
  0x22   :  { %5800 = vmatprep.subr.bf16.mxu0 %v7146_v39  ;;  %v956_v39 = vpack.c.bf16 %v306_v34, %v281_v33  ;;  %v358_v56 = vld [vmem:[%s11110_s0 + $0xa40] sm:$0xff]  ;;  %v408_v5 = vld [vmem:[%s11110_s0 + $0xbd0] sm:$0xff]  ;;  %v7163_v12 = vld [vmem:[%s11111_s1 + $0x188] sm:$0xff]  }
  0x23   :  { %5703 = vmatpush3.bf16.msra.mxu1 %v7145_v35  ;;  %v232_v35 = vld [vmem:[%s11110_s0 + $0x650] sm:$0xff]  ;;  %v7159_v59 = vld [vmem:[%s11111_s1 + $0x180] sm:$0xff]   ;;  %v431_v17 = vld [vmem:[%s11110_s0 + $0xc88] sm:$0xff] }
  0x24   :  { %2866 = vmatmul.mubr.bf16.vlgmr.msra.gmra.mrb[0].mxu0 %v830_v38  ;;  %v257_v38 = vld [vmem:[%s11110_s0 + $0x718] sm:$0xff]  ;;  %v7160_v6 = vld [vmem:[%s11111_s1 + $0x170] sm:$0xff]   ;;  %v458_v20 = vld [vmem:[%s11110_s0 + $0xd60] sm:$0xff] }
  0x25   :  { %5801 = vmatpush3.bf16.msra.mxu0 %v7147_v43  ;;  %2873 = vmatprep.mubr.bf16.mxu0 %v856_v51  ;;  %v932_v43 = vpack.c.bf16 %v257_v38, %v232_v35  ;;  %v307_v51 = vld [vmem:[%s11110_s0 + $0x8a8] sm:$0xff]  ;;  %v7161_v8 = vld [vmem:[%s11111_s1 + $0x130] sm:$0xff]   ;;  %v433_v19 = vld [vmem:[%s11110_s0 + $0xc98] sm:$0xff] }
  0x26   :  { %3027 = vmatmul.mubr.bf16.vlgmr.msra.gmra.mrb[0].mxu1 %v832_v47  ;;  %5802 = vmatprep.subr.bf16.mxu0 %v7148_v61  ;;  %v331_v47 = vld [vmem:[%s11110_s0 + $0x968] sm:$0xff]  ;;  %v957_v58 = vpack.c.bf16 %v307_v51, %v282_v50  ;;  %v330_v61 = vld [vmem:[%s11110_s0 + $0x960] sm:$0xff]  ;;  %v380_v13 = vld [vmem:[%s11110_s0 + $0xaf0] sm:$0xff] }
  0x27   :  { %3034 = vmatprep.mubr.bf16.mxu1 %v858_v54  ;;  %v7157_v54 = vld [vmem:[%s11111_s1 + $0x128] sm:$0xff]   ;;  %v981_v55 = vpack.c.bf16 %v356_v48, %v331_v47  ;;  %v980_v3 = vpack.c.bf16 %v355_v62, %v330_v61  ;;  %v456_v18 = vld [vmem:[%s11110_s0 + $0xd50] sm:$0xff]  ;;  %v7166_v25 = vld [vmem:[%s11111_s1 + $0x1d8] sm:$0xff]  }
  0x28   :  { %v7164_v22 = vld [vmem:[%s11111_s1 + $0x1d0] sm:$0xff]   ;;  %v481_v31 = vld [vmem:[%s11110_s0 + $0xe18] sm:$0xff]  ;;  %v506_v35 = vld [vmem:[%s11110_s0 + $0xee0] sm:$0xff] }
  0x29   :  { %5803 = vmatpush3.bf16.msra.mxu0 %v7149_v1  ;;  %v406_v1 = vld [vmem:[%s11110_s0 + $0xbc0] sm:$0xff]  ;;  %v7165_v24 = vld [vmem:[%s11111_s1 + $0x190] sm:$0xff]   ;;  %v7168_v32 = vld [vmem:[%s11111_s1 + $0x178] sm:$0xff]   ;;  %v1056_v41 = vpack.c.bf16 %v506_v35, %v481_v31 }
  0x2a   :  { %5804 = vmatprep.subr.bf16.mxu0 %v7150_v10  ;;  %v7162_v10 = vld [vmem:[%s11111_s1 + $0x1c8] sm:$0xff]   ;;  %v432_v33 = vld [vmem:[%s11110_s0 + $0xc90] sm:$0xff]  ;;  %v457_v34 = vld [vmem:[%s11110_s0 + $0xd58] sm:$0xff] }
  0x2b   :  { %v7169_v38 = vld [vmem:[%s11111_s1 + $0x138] sm:$0xff]   ;;  %v7170_v40 = vld [vmem:[%s11111_s1 + $0x1e0] sm:$0xff]   ;;  %v1032_v44 = vpack.c.bf16 %v457_v34, %v432_v33  ;;  %v7173_v46 = vld [vmem:[%s11111_s1 + $0x1a8] sm:$0xff]  }
  0x2c   :  { %2874 = vmatmul.mubr.bf16.gmra.mrb[4].mxu0 %v855_v57  ;;  %v7158_v57 = vld [vmem:[%s11111_s1 + $0x1c0] sm:$0xff]   ;;  %v480_v47 = vld [vmem:[%s11110_s0 + $0xe10] sm:$0xff]  ;;  %v505_v48 = vld [vmem:[%s11110_s0 + $0xed8] sm:$0xff] }
  0x2d   :  { %2881 = vmatprep.mubr.bf16.mxu0 %v881_v60  ;;  %5805 = vmatpush3.bf16.msra.mxu0 %v7151_v14  ;;  %v983_v60 = vpack.c.bf16 %v358_v56, %v333_v53  ;;  %v405_v14 = vld [vmem:[%s11110_s0 + $0xbb8] sm:$0xff]  ;;  %v507_v50 = vld [vmem:[%s11110_s0 + $0xee8] sm:$0xff]  ;;  %v7175_v56 = vld [vmem:[%s11111_s1 + $0x1b0] sm:$0xff]  }
  0x2e   :  { %3035 = vmatmul.mubr.bf16.gmra.mrb[4].mxu1 %v857_v0  ;;  %5806 = vmatprep.subr.bf16.mxu0 %v7152_v26  ;;  %v381_v0 = vld [vmem:[%s11110_s0 + $0xaf8] sm:$0xff]  ;;  %v1005_v21 = vpack.c.bf16 %v405_v14, %v380_v13  ;;  %v531_v51 = vld [vmem:[%s11110_s0 + $0xfa8] sm:$0xff]  ;;  %v708_v33 = vld [vmem:[%s11110_s0 + $0x1530] sm:$0xff] }
  0x2f   :  { %3042 = vmatprep.mubr.bf16.mxu1 %v883_v2  ;;  %5912 = vmatprep.subr.bf16.mxu1 %v7158_v57  ;;  %v357_v2 = vld [vmem:[%s11110_s0 + $0xa38] sm:$0xff]  ;;  %v1006_v7 = vpack.c.bf16 %v406_v1, %v381_v0  ;;  %v530_v0 = vld [vmem:[%s11110_s0 + $0xfa0] sm:$0xff]  ;;  %v555_v1 = vld [vmem:[%s11110_s0 + $0x1068] sm:$0xff] }
  0x30   :  { %5913 = vmatpush3.bf16.msra.mxu1 %v7159_v59  ;;  %v533_v53 = vld [vmem:[%s11110_s0 + $0xfb8] sm:$0xff]  ;;  %v631_v14 = vld [vmem:[%s11110_s0 + $0x12c8] sm:$0xff] }
  0x31   :  { %5807 = vmatpush3.bf16.msra.mxu0 %v7153_v28  ;;  %5914 = vmatprep.subr.bf16.mxu1 %v7162_v10  ;;  %v455_v28 = vld [vmem:[%s11110_s0 + $0xd48] sm:$0xff]  ;;  %v7176_v59 = vld [vmem:[%s11111_s1 + $0x1f8] sm:$0xff]  }
  0x32   :  { %5808 = vmatprep.subr.bf16.mxu0 %v7154_v36  ;;  %v483_v36 = vld [vmem:[%s11110_s0 + $0xe28] sm:$0xff]  ;;  %v7177_v61 = vld [vmem:[%s11111_s1 + $0x1b8] sm:$0xff]  }
  0x33   :  { %v605_v13 = vld [vmem:[%s11110_s0 + $0x11f8] sm:$0xff] }
  0x34   :  { %2882 = vmatmul.mubr.bf16.gmra.mrb[8].mxu0 %v880_v9  ;;  %v982_v9 = vpack.c.bf16 %v357_v2, %v332_v63  ;;  %5915 = vmatpush3.bf16.msra.mxu1 %v7163_v12  ;;  %v7178_v63 = vld [vmem:[%s11111_s1 + $0x240] sm:$0xff]   ;;  %v581_v2 = vld [vmem:[%s11110_s0 + $0x1138] sm:$0xff] }
  0x35   :  { %2889 = vmatprep.mubr.bf16.mxu0 %v906_v11  ;;  %5809 = vmatpush3.bf16.msra.mxu0 %v7155_v42  ;;  %v1008_v11 = vpack.c.bf16 %v408_v5, %v383_v4  ;;  %v7171_v42 = vld [vmem:[%s11111_s1 + $0x1a0] sm:$0xff]   ;;  %v1080_v4 = vpack.c.bf16 %v555_v1, %v530_v0  ;;  %v532_v5 = vld [vmem:[%s11110_s0 + $0xfb0] sm:$0xff] }
  0x36   :  { %3043 = vmatmul.mubr.bf16.gmra.mrb[8].mxu1 %v882_v15  ;;  %5810 = vmatprep.subr.bf16.mxu0 %v7156_v49  ;;  %v382_v15 = vld [vmem:[%s11110_s0 + $0xb00] sm:$0xff]  ;;  %v60_v0 = vld [vmem:[%s11110_s0 + $0xf0] sm:$0xff] }
  0x37   :  { %3050 = vmatprep.mubr.bf16.mxu1 %v908_v16  ;;  %v407_v16 = vld [vmem:[%s11110_s0 + $0xbc8] sm:$0xff]  ;;  %5916 = vmatprep.subr.bf16.mxu1 %v7164_v22  ;;  %v482_v49 = vld [vmem:[%s11110_s0 + $0xe20] sm:$0xff] }
  0x38   :  { %v1007_v26 = vpack.c.bf16 %v407_v16, %v382_v15  ;;  %5917 = vmatpush3.bf16.msra.mxu1 %v7165_v24  ;;  %v656_v15 = vld [vmem:[%s11110_s0 + $0x1390] sm:$0xff]  ;;  %v630_v24 = vld [vmem:[%s11110_s0 + $0x12c0] sm:$0xff] }
  0x39   :  { %5811 = vmatpush3.bf16.msra.mxu0 %v7157_v54  ;;  %5918 = vmatprep.subr.bf16.mxu1 %v7166_v25  ;;  %v7174_v54 = vld [vmem:[%s11111_s1 + $0x1f0] sm:$0xff]   ;;  %v655_v25 = vld [vmem:[%s11110_s0 + $0x1388] sm:$0xff] }
  0x3a   :  { %5812 = vmatprep.subr.bf16.mxu0 %v7160_v6  ;;  %v557_v6 = vld [vmem:[%s11110_s0 + $0x1078] sm:$0xff] }
  0x3b   :  { %v1082_v10 = vpack.c.bf16 %v557_v6, %v532_v5  ;;  %v37_v5 = vld [vmem:[%s11110_s0 + $0x38] sm:$0xff]  ;;  %v62_v6 = vld [vmem:[%s11110_s0 + $0x100] sm:$0xff] }
  0x3c   :  { %2890 = vmatmul.mubr.bf16.gmra.mrb[12].mxu0 %v905_v23  ;;  %v1031_v23 = vpack.c.bf16 %v456_v18, %v431_v17  ;;  %v582_v17 = vld [vmem:[%s11110_s0 + $0x1140] sm:$0xff]  ;;  %v607_v18 = vld [vmem:[%s11110_s0 + $0x1208] sm:$0xff] }
  0x3d   :  { %2897 = vmatprep.mubr.bf16.mxu0 %v931_v27  ;;  %5813 = vmatpush3.bf16.msra.mxu0 %v7161_v8  ;;  %v430_v27 = vld [vmem:[%s11110_s0 + $0xc80] sm:$0xff]  ;;  %v583_v8 = vld [vmem:[%s11110_s0 + $0x1148] sm:$0xff]  ;;  %v1107_v22 = vpack.c.bf16 %v607_v18, %v582_v17 }
  0x3e   :  { %3051 = vmatmul.mubr.bf16.gmra.mrb[12].mxu1 %v907_v29  ;;  %v1033_v29 = vpack.c.bf16 %v458_v20, %v433_v19  ;;  %5814 = vmatprep.subr.bf16.mxu0 %v7168_v32  ;;  %v1131_v19 = vpack.c.bf16 %v656_v15, %v631_v14  ;;  %v633_v20 = vld [vmem:[%s11110_s0 + $0x12d8] sm:$0xff]  ;;  %v683_v32 = vld [vmem:[%s11110_s0 + $0x1468] sm:$0xff]  ;;  %v36_v14 = vld [vmem:[%s11110_s0 + $0x30] sm:$0xff] }
  0x3f   :  { %3058 = vmatprep.mubr.bf16.mxu1 %v933_v30  ;;  %v7167_v30 = vld [vmem:[%s11111_s1 + $0x198] sm:$0xff]   ;;  %v1158_v35 = vpack.c.bf16 %v708_v33, %v683_v32  ;;  %v87_v18 = vld [vmem:[%s11110_s0 + $0x1c8] sm:$0xff] }
  0x40   :  { %5919 = vmatpush3.bf16.msra.mxu1 %v7167_v30  ;;  %v657_v30 = vld [vmem:[%s11110_s0 + $0x1398] sm:$0xff]  ;;  %v111_v32 = vld [vmem:[%s11110_s0 + $0x288] sm:$0xff] }
  0x41   :  { %5815 = vmatpush3.bf16.msra.mxu0 %v7169_v38  ;;  %5920 = vmatprep.subr.bf16.mxu1 %v7170_v40  ;;  %v731_v38 = vld [vmem:[%s11110_s0 + $0x15e8] sm:$0xff]  ;;  %v61_v15 = vld [vmem:[%s11110_s0 + $0xf8] sm:$0xff] }
  0x42   :  { %6024 = vmatprep.subr.bf16.mxu0 %v7178_v63  ;;  %v35_v63 = vld [vmem:[%s11110_s0 + $0x28] sm:$0xff]  ;;  %v137_v33 = vld [vmem:[%s11110_s0 + $0x358] sm:$0xff] }
  0x44   :  { %2898 = vmatmul.mubr.bf16.gmra.mrb[16].mxu0 %v930_v37  ;;  %v508_v37 = vld [vmem:[%s11110_s0 + $0xef0] sm:$0xff]  ;;  %5921 = vmatpush3.bf16.msra.mxu1 %v7171_v42  ;;  %v707_v42 = vld [vmem:[%s11110_s0 + $0x1528] sm:$0xff] }
  0x45   :  { %2905 = vmatprep.mubr.bf16.mxu0 %v956_v39  ;;  %v1030_v39 = vpack.c.bf16 %v455_v28, %v430_v27  ;;  %v706_v27 = vld [vmem:[%s11110_s0 + $0x1520] sm:$0xff]  ;;  %v1130_v28 = vpack.c.bf16 %v655_v25, %v630_v24  ;;  %v135_v25 = vld [vmem:[%s11110_s0 + $0x348] sm:$0xff] }
  0x46   :  { %3059 = vmatmul.mubr.bf16.gmra.mrb[16].mxu1 %v932_v43  ;;  %v7172_v43 = vld [vmem:[%s11111_s1 + $0x1e8] sm:$0xff]  }
  0x47   :  { %3066 = vmatprep.mubr.bf16.mxu1 %v958_v45  ;;  %v1058_v45 = vpack.c.bf16 %v508_v37, %v483_v36  ;;  %5922 = vmatprep.subr.bf16.mxu1 %v7172_v43  ;;  %v680_v36 = vld [vmem:[%s11110_s0 + $0x1450] sm:$0xff]  ;;  %v705_v37 = vld [vmem:[%s11110_s0 + $0x1518] sm:$0xff] }
  0x48   :  { %5923 = vmatpush3.bf16.msra.mxu1 %v7173_v46  ;;  %v1155_v40 = vpack.c.bf16 %v705_v37, %v680_v36  ;;  %v733_v43 = vld [vmem:[%s11110_s0 + $0x15f8] sm:$0xff]  ;;  %v7195_v36 = vld [vmem:[%s11111_s1 + $0x288] sm:$0xff]  }
  0x49   :  { %5924 = vmatprep.subr.bf16.mxu1 %v7174_v54  ;;  %v757_v54 = vld [vmem:[%s11110_s0 + $0x16b8] sm:$0xff] }
  0x4c   :  { %2906 = vmatmul.mubr.bf16.gmra.mrb[20].mxu0 %v955_v52  ;;  %v556_v52 = vld [vmem:[%s11110_s0 + $0x1070] sm:$0xff]  ;;  %5925 = vmatpush3.bf16.msra.mxu1 %v7175_v56  ;;  %v783_v56 = vld [vmem:[%s11110_s0 + $0x1788] sm:$0xff] }
  0x4d   :  { %2913 = vmatprep.mubr.bf16.mxu0 %v981_v55  ;;  %v1055_v55 = vpack.c.bf16 %v505_v48, %v480_v47  ;;  %v1081_v57 = vpack.c.bf16 %v556_v52, %v531_v51  ;;  %5926 = vmatprep.subr.bf16.mxu1 %v7176_v59  ;;  %v730_v48 = vld [vmem:[%s11110_s0 + $0x15e0] sm:$0xff]  ;;  %v780_v59 = vld [vmem:[%s11110_s0 + $0x1770] sm:$0xff] }
  0x4e   :  { %3067 = vmatmul.mubr.bf16.gmra.mrb[20].mxu1 %v957_v58  ;;  %v558_v58 = vld [vmem:[%s11110_s0 + $0x1080] sm:$0xff] }
  0x4f   :  { %3074 = vmatprep.mubr.bf16.mxu1 %v983_v60  ;;  %v1057_v60 = vpack.c.bf16 %v507_v50, %v482_v49  ;;  %v1083_v62 = vpack.c.bf16 %v558_v58, %v533_v53  ;;  %v755_v49 = vld [vmem:[%s11110_s0 + $0x16a8] sm:$0xff]  ;;  %v781_v50 = vld [vmem:[%s11110_s0 + $0x1778] sm:$0xff]  ;;  %v806_v51 = vld [vmem:[%s11110_s0 + $0x1840] sm:$0xff] }
  0x50   :  { %5927 = vmatpush3.bf16.msra.mxu1 %v7177_v61  ;;  %v1180_v52 = vpack.c.bf16 %v755_v49, %v730_v48  ;;  %v732_v53 = vld [vmem:[%s11110_s0 + $0x15f0] sm:$0xff]  ;;  %v7198_v48 = vld [vmem:[%s11111_s1 + $0x2d8] sm:$0xff]   ;;  %v210_v49 = vld [vmem:[%s11110_s0 + $0x5a0] sm:$0xff] }
  0x51   :  { %v1182_v58 = vpack.c.bf16 %v757_v54, %v732_v53  ;;  %v187_v54 = vld [vmem:[%s11110_s0 + $0x4e8] sm:$0xff] }
  0x54   :  { %2914 = vmatmul.mubr.bf16.gmra.mrb[24].mxu0 %v980_v3  ;;  %v606_v3 = vld [vmem:[%s11110_s0 + $0x1200] sm:$0xff] }
  0x55   :  { %2921 = vmatprep.mubr.bf16.mxu0 %v1006_v7  ;;  %v1106_v7 = vpack.c.bf16 %v606_v3, %v581_v2  ;;  %v782_v2 = vld [vmem:[%s11110_s0 + $0x1780] sm:$0xff]  ;;  %v807_v3 = vld [vmem:[%s11110_s0 + $0x1848] sm:$0xff] }
  0x56   :  { %3075 = vmatmul.mubr.bf16.gmra.mrb[24].mxu1 %v982_v9  ;;  %v608_v9 = vld [vmem:[%s11110_s0 + $0x1210] sm:$0xff] }
  0x57   :  { %3082 = vmatprep.mubr.bf16.mxu1 %v1008_v11  ;;  %v580_v11 = vld [vmem:[%s11110_s0 + $0x1130] sm:$0xff]  ;;  %v1108_v12 = vpack.c.bf16 %v608_v9, %v583_v8  ;;  %v34_v8 = vld [vmem:[%s11110_s0 + $0x20] sm:$0xff]  ;;  %v837_v9 = vpack.c.bf16 %v62_v6, %v37_v5  ;;  %v235_v5 = vld [vmem:[%s11110_s0 + $0x668] sm:$0xff] }
  0x58   :  { %v1105_v16 = vpack.c.bf16 %v605_v13, %v580_v11  ;;  %v85_v11 = vld [vmem:[%s11110_s0 + $0x1b8] sm:$0xff]  ;;  %v260_v6 = vld [vmem:[%s11110_s0 + $0x730] sm:$0xff] }
  0x5c   :  { %2922 = vmatmul.mubr.bf16.gmra.mrb[28].mxu0 %v1005_v21  ;;  %v658_v21 = vld [vmem:[%s11110_s0 + $0x13a0] sm:$0xff] }
  0x5d   :  { %2929 = vmatprep.mubr.bf16.mxu0 %v1031_v23  ;;  %v1133_v23 = vpack.c.bf16 %v658_v21, %v633_v20  ;;  %v7180_v20 = vld [vmem:[%s11111_s1 + $0x248] sm:$0xff]   ;;  %v836_v21 = vpack.c.bf16 %v61_v15, %v36_v14  ;;  %v7193_v14 = vld [vmem:[%s11111_s1 + $0x230] sm:$0xff]   ;;  %v7200_v15 = vld [vmem:[%s11111_s1 + $0x278] sm:$0xff]  }
  0x5e   :  { %3083 = vmatmul.mubr.bf16.gmra.mrb[28].mxu1 %v1007_v26  ;;  %v681_v26 = vld [vmem:[%s11110_s0 + $0x1458] sm:$0xff] }
  0x5f   :  { %3090 = vmatprep.mubr.bf16.mxu1 %v1033_v29  ;;  %v632_v29 = vld [vmem:[%s11110_s0 + $0x12d0] sm:$0xff]  ;;  %v1156_v31 = vpack.c.bf16 %v706_v27, %v681_v26  ;;  %v7191_v26 = vld [vmem:[%s11111_s1 + $0x280] sm:$0xff]  }
  0x60   :  { %v1132_v34 = vpack.c.bf16 %v657_v30, %v632_v29  ;;  %v160_v27 = vld [vmem:[%s11110_s0 + $0x410] sm:$0xff]  ;;  %v7194_v29 = vld [vmem:[%s11111_s1 + $0x2c8] sm:$0xff]   ;;  %v86_v30 = vld [vmem:[%s11110_s0 + $0x1c0] sm:$0xff] }
  0x61   :  { %v885_v37 = vpack.c.bf16 %v160_v27, %v135_v25  ;;  %v7208_v25 = vld [vmem:[%s11111_s1 + $0x2f8] sm:$0xff]   ;;  %v236_v27 = vld [vmem:[%s11110_s0 + $0x670] sm:$0xff] }
  0x64   :  { %2930 = vmatmul.mubr.bf16.gmra.mrb[32].mxu0 %v1030_v39  ;;  %v756_v39 = vld [vmem:[%s11110_s0 + $0x16b0] sm:$0xff] }
  0x65   :  { %2937 = vmatprep.mubr.bf16.mxu0 %v1056_v41  ;;  %v682_v41 = vld [vmem:[%s11110_s0 + $0x1460] sm:$0xff] }
  0x66   :  { %3091 = vmatmul.mubr.bf16.gmra.mrb[32].mxu1 %v1032_v44  ;;  %v1181_v44 = vpack.c.bf16 %v756_v39, %v731_v38  ;;  %v1157_v46 = vpack.c.bf16 %v707_v42, %v682_v41  ;;  %v7183_v38 = vld [vmem:[%s11111_s1 + $0x210] sm:$0xff]   ;;  %v7184_v39 = vld [vmem:[%s11111_s1 + $0x258] sm:$0xff]   ;;  %v861_v41 = vpack.c.bf16 %v111_v32, %v86_v30  ;;  %v134_v42 = vld [vmem:[%s11110_s0 + $0x340] sm:$0xff] }
  0x67   :  { %3098 = vmatprep.mubr.bf16.mxu1 %v1058_v45  ;;  %v758_v45 = vld [vmem:[%s11110_s0 + $0x16c0] sm:$0xff]  ;;  %v7209_v30 = vld [vmem:[%s11111_s1 + $0x2b8] sm:$0xff]   ;;  %v287_v32 = vld [vmem:[%s11110_s0 + $0x808] sm:$0xff] }
  0x68   :  { %v1183_v47 = vpack.c.bf16 %v758_v45, %v733_v43  ;;  %v159_v43 = vld [vmem:[%s11110_s0 + $0x408] sm:$0xff] }
  0x69   :  { %v884_v53 = vpack.c.bf16 %v159_v43, %v134_v42  ;;  %v311_v42 = vld [vmem:[%s11110_s0 + $0x8c8] sm:$0xff] }
  0x6c   :  { %2938 = vmatmul.mubr.bf16.gmra.mrb[36].mxu0 %v1055_v55  ;;  %v1206_v55 = vpack.c.bf16 %v806_v51, %v781_v50  ;;  %v7186_v50 = vld [vmem:[%s11111_s1 + $0x260] sm:$0xff]   ;;  %v136_v51 = vld [vmem:[%s11110_s0 + $0x350] sm:$0xff] }
  0x6d   :  { %2945 = vmatprep.mubr.bf16.mxu0 %v1081_v57  ;;  %v808_v57 = vld [vmem:[%s11110_s0 + $0x1850] sm:$0xff] }
  0x6e   :  { %3099 = vmatmul.mubr.bf16.gmra.mrb[36].mxu1 %v1057_v60  ;;  %v805_v60 = vld [vmem:[%s11110_s0 + $0x1838] sm:$0xff]  ;;  %v1208_v61 = vpack.c.bf16 %v808_v57, %v783_v56 }
  0x6f   :  { %3106 = vmatprep.mubr.bf16.mxu1 %v1083_v62  ;;  %v7190_v62 = vld [vmem:[%s11111_s1 + $0x2c0] sm:$0xff]   ;;  %v1205_v1 = vpack.c.bf16 %v805_v60, %v780_v59  ;;  %v7199_v56 = vld [vmem:[%s11111_s1 + $0x298] sm:$0xff]   ;;  %v7188_v59 = vld [vmem:[%s11111_s1 + $0x268] sm:$0xff]  }
  0x70   :  { %6136 = vmatprep.subr.bf16.mxu1 %v7190_v62  ;;  %v7202_v60 = vld [vmem:[%s11111_s1 + $0x2e0] sm:$0xff]   ;;  %v184_v62 = vld [vmem:[%s11110_s0 + $0x4d0] sm:$0xff] }
  0x74   :  { %2946 = vmatmul.mubr.bf16.gmra.mrb[40].mxu0 %v1080_v4  ;;  %v835_v4 = vpack.c.bf16 %v60_v0, %v35_v63  ;;  %v209_v63 = vld [vmem:[%s11110_s0 + $0x598] sm:$0xff] }
  0x75   :  { %2953 = vmatprep.mubr.bf16.mxu0 %v1106_v7  ;;  %v1207_v7 = vpack.c.bf16 %v807_v3, %v782_v2  ;;  %v7203_v2 = vld [vmem:[%s11111_s1 + $0x2a0] sm:$0xff]   ;;  %v7204_v3 = vld [vmem:[%s11111_s1 + $0x2e8] sm:$0xff]  }
  0x76   :  { %3107 = vmatmul.mubr.bf16.gmra.mrb[40].mxu1 %v1082_v10  ;;  %v59_v10 = vld [vmem:[%s11110_s0 + $0xe8] sm:$0xff] }
  0x77   :  { %3114 = vmatprep.mubr.bf16.mxu1 %v1108_v12  ;;  %v110_v12 = vld [vmem:[%s11110_s0 + $0x280] sm:$0xff]  ;;  %v834_v13 = vpack.c.bf16 %v59_v10, %v34_v8  ;;  %v211_v8 = vld [vmem:[%s11110_s0 + $0x5a8] sm:$0xff]  ;;  %v237_v10 = vld [vmem:[%s11110_s0 + $0x678] sm:$0xff] }
  0x78   :  { %v860_v17 = vpack.c.bf16 %v110_v12, %v85_v11  ;;  %v7205_v11 = vld [vmem:[%s11111_s1 + $0x2a8] sm:$0xff]   ;;  %v935_v12 = vpack.c.bf16 %v260_v6, %v235_v5  ;;  %v462_v5 = vld [vmem:[%s11110_s0 + $0xd80] sm:$0xff] }
  0x7c   :  { %2954 = vmatmul.mubr.bf16.gmra.mrb[44].mxu0 %v1105_v16  ;;  %v7179_v16 = vld [vmem:[%s11111_s1 + $0x200] sm:$0xff]  }
  0x7d   :  { %2961 = vmatprep.mubr.bf16.mxu0 %v1131_v19  ;;  %v112_v19 = vld [vmem:[%s11110_s0 + $0x290] sm:$0xff] }
  0x7e   :  { %3115 = vmatmul.mubr.bf16.gmra.mrb[44].mxu1 %v1107_v22  ;;  %v84_v22 = vld [vmem:[%s11110_s0 + $0x1b0] sm:$0xff]  ;;  %v862_v24 = vpack.c.bf16 %v112_v19, %v87_v18  ;;  %v234_v18 = vld [vmem:[%s11110_s0 + $0x660] sm:$0xff]  ;;  %v259_v19 = vld [vmem:[%s11110_s0 + $0x728] sm:$0xff] }
  0x7f   :  { %3122 = vmatprep.mubr.bf16.mxu1 %v1133_v23  ;;  %v109_v23 = vld [vmem:[%s11110_s0 + $0x278] sm:$0xff] }
  0x84   :  { %2962 = vmatmul.mubr.bf16.gmra.mrb[48].mxu0 %v1130_v28  ;;  %v7181_v28 = vld [vmem:[%s11111_s1 + $0x208] sm:$0xff]  }
  0x85   :  { %2969 = vmatprep.mubr.bf16.mxu0 %v1156_v31  ;;  %v7182_v31 = vld [vmem:[%s11111_s1 + $0x250] sm:$0xff]  }
  0x86   :  { %3123 = vmatmul.mubr.bf16.gmra.mrb[48].mxu1 %v1132_v34  ;;  %v859_v34 = vpack.c.bf16 %v109_v23, %v84_v22  ;;  %v7207_v22 = vld [vmem:[%s11111_s1 + $0x2b0] sm:$0xff]   ;;  %v310_v23 = vld [vmem:[%s11110_s0 + $0x8c0] sm:$0xff] }
  0x87   :  { %3130 = vmatprep.mubr.bf16.mxu1 %v1158_v35  ;;  %v162_v35 = vld [vmem:[%s11110_s0 + $0x420] sm:$0xff] }
  0x88   :  { %v887_v45 = vpack.c.bf16 %v162_v35, %v137_v33  ;;  %v312_v33 = vld [vmem:[%s11110_s0 + $0x8d0] sm:$0xff] }
  0x89   :  { %v962_v35 = vpack.c.bf16 %v312_v33, %v287_v32  ;;  %v559_v32 = vld [vmem:[%s11110_s0 + $0x1088] sm:$0xff] }
  0x8c   :  { %2970 = vmatmul.mubr.bf16.gmra.mrb[52].mxu0 %v1155_v40  ;;  %v7196_v40 = vld [vmem:[%s11111_s1 + $0x2d0] sm:$0xff]  }
  0x8d   :  { %2977 = vmatprep.mubr.bf16.mxu0 %v1181_v44  ;;  %v7185_v44 = vld [vmem:[%s11111_s1 + $0x218] sm:$0xff]  }
  0x8e   :  { %3131 = vmatmul.mubr.bf16.gmra.mrb[52].mxu1 %v1157_v46  ;;  %v185_v46 = vld [vmem:[%s11110_s0 + $0x4d8] sm:$0xff] }
  0x8f   :  { %3138 = vmatprep.mubr.bf16.mxu1 %v1183_v47  ;;  %v7197_v47 = vld [vmem:[%s11111_s1 + $0x290] sm:$0xff]   ;;  %v910_v57 = vpack.c.bf16 %v210_v49, %v185_v46 }
  0x94   :  { %2978 = vmatmul.mubr.bf16.gmra.mrb[56].mxu0 %v1180_v52  ;;  %v161_v52 = vld [vmem:[%s11110_s0 + $0x418] sm:$0xff] }
  0x95   :  { %2985 = vmatprep.mubr.bf16.mxu0 %v1206_v55  ;;  %v212_v55 = vld [vmem:[%s11110_s0 + $0x5b0] sm:$0xff] }
  0x96   :  { %3139 = vmatmul.mubr.bf16.gmra.mrb[56].mxu1 %v1182_v58  ;;  %v7187_v58 = vld [vmem:[%s11111_s1 + $0x220] sm:$0xff]   ;;  %v912_v0 = vpack.c.bf16 %v212_v55, %v187_v54 }
  0x97   :  { %3146 = vmatprep.mubr.bf16.mxu1 %v1208_v61  ;;  %v886_v61 = vpack.c.bf16 %v161_v52, %v136_v51  ;;  %v410_v51 = vld [vmem:[%s11110_s0 + $0xbe0] sm:$0xff]  ;;  %v336_v52 = vld [vmem:[%s11110_s0 + $0x990] sm:$0xff] }
  0x9c   :  { %2986 = vmatmul.mubr.bf16.gmra.mrb[60].mxu0 %v1205_v1  ;;  %v7189_v1 = vld [vmem:[%s11111_s1 + $0x228] sm:$0xff]  }
  0x9d   :  { %3187 = vmatprep.mubr.bf16.mxu0 %v835_v4  ;;  %v186_v4 = vld [vmem:[%s11110_s0 + $0x4e0] sm:$0xff] }
  0x9e   :  { %3147 = vmatmul.mubr.bf16.gmra.mrb[60].mxu1 %v1207_v7  ;;  %v7192_v7 = vld [vmem:[%s11111_s1 + $0x270] sm:$0xff]  }
  0x9f   :  { %3348 = vmatprep.mubr.bf16.mxu1 %v837_v9  ;;  %v909_v9 = vpack.c.bf16 %v209_v63, %v184_v62  ;;  %v435_v62 = vld [vmem:[%s11110_s0 + $0xca8] sm:$0xff]  ;;  %v460_v63 = vld [vmem:[%s11110_s0 + $0xd70] sm:$0xff] }
  0xa4   :  { %3188 = vmatmul.mubr.bf16.vlgmr.msra.gmra.mrb[64].mxu0 %v834_v13  ;;  %v262_v13 = vld [vmem:[%s11110_s0 + $0x740] sm:$0xff] }
  0xa5   :  { %6025 = vmatpush3.bf16.msra.mxu0 %v7179_v16  ;;  %3195 = vmatprep.mubr.bf16.mxu0 %v860_v17  ;;  %v7206_v16 = vld [vmem:[%s11111_s1 + $0x2f0] sm:$0xff]   ;;  %v911_v17 = vpack.c.bf16 %v211_v8, %v186_v4  ;;  %v437_v4 = vld [vmem:[%s11110_s0 + $0xcb8] sm:$0xff]  ;;  %v459_v8 = vld [vmem:[%s11110_s0 + $0xd68] sm:$0xff] }
  0xa6   :  { %6026 = vmatprep.subr.bf16.mxu0 %v7180_v20  ;;  %3349 = vmatmul.mubr.bf16.vlgmr.msra.gmra.mrb[64].mxu1 %v836_v21  ;;  %v937_v20 = vpack.c.bf16 %v262_v13, %v237_v10  ;;  %v285_v21 = vld [vmem:[%s11110_s0 + $0x7f8] sm:$0xff] }
  0xa7   :  { %3356 = vmatprep.mubr.bf16.mxu1 %v862_v24  ;;  %6137 = vmatpush3.bf16.msra.mxu1 %v7191_v26  ;;  %v7201_v24 = vld [vmem:[%s11111_s1 + $0x238] sm:$0xff]   ;;  %v7210_v26 = vld [vmem:[%s11111_s1 + $0x340] sm:$0xff]  }
  0xa8   :  { %6138 = vmatprep.subr.bf16.mxu1 %v7194_v29  ;;  %v934_v29 = vpack.c.bf16 %v259_v19, %v234_v18  ;;  %v485_v10 = vld [vmem:[%s11110_s0 + $0xe38] sm:$0xff]  ;;  %v484_v19 = vld [vmem:[%s11110_s0 + $0xe30] sm:$0xff] }
  0xa9   :  { %6027 = vmatpush3.bf16.msra.mxu0 %v7181_v28  ;;  %v261_v28 = vld [vmem:[%s11110_s0 + $0x738] sm:$0xff] }
  0xaa   :  { %6028 = vmatprep.subr.bf16.mxu0 %v7182_v31  ;;  %v960_v31 = vpack.c.bf16 %v310_v23, %v285_v21  ;;  %v461_v13 = vld [vmem:[%s11110_s0 + $0xd78] sm:$0xff]  ;;  %v560_v23 = vld [vmem:[%s11110_s0 + $0x1090] sm:$0xff] }
  0xab   :  { %6139 = vmatpush3.bf16.msra.mxu1 %v7195_v36  ;;  %v284_v36 = vld [vmem:[%s11110_s0 + $0x7f0] sm:$0xff] }
  0xac   :  { %3196 = vmatmul.mubr.bf16.gmra.mrb[68].mxu0 %v859_v34  ;;  %6140 = vmatprep.subr.bf16.mxu1 %v7196_v40  ;;  %v936_v34 = vpack.c.bf16 %v261_v28, %v236_v27  ;;  %v537_v28 = vld [vmem:[%s11110_s0 + $0xfd8] sm:$0xff] }
  0xad   :  { %3203 = vmatprep.mubr.bf16.mxu0 %v885_v37  ;;  %6029 = vmatpush3.bf16.msra.mxu0 %v7183_v38  ;;  %v309_v37 = vld [vmem:[%s11110_s0 + $0x8b8] sm:$0xff]  ;;  %v335_v38 = vld [vmem:[%s11110_s0 + $0x988] sm:$0xff] }
  0xae   :  { %6030 = vmatprep.subr.bf16.mxu0 %v7184_v39  ;;  %3357 = vmatmul.mubr.bf16.gmra.mrb[68].mxu1 %v861_v41  ;;  %v360_v39 = vld [vmem:[%s11110_s0 + $0xa50] sm:$0xff]  ;;  %v959_v40 = vpack.c.bf16 %v309_v37, %v284_v36  ;;  %v286_v41 = vld [vmem:[%s11110_s0 + $0x800] sm:$0xff]  ;;  %v561_v37 = vld [vmem:[%s11110_s0 + $0x1098] sm:$0xff] }
  0xaf   :  { %3364 = vmatprep.mubr.bf16.mxu1 %v887_v45  ;;  %6141 = vmatpush3.bf16.msra.mxu1 %v7197_v47  ;;  %v985_v43 = vpack.c.bf16 %v360_v39, %v335_v38  ;;  %v362_v45 = vld [vmem:[%s11110_s0 + $0xa60] sm:$0xff]  ;;  %v961_v46 = vpack.c.bf16 %v311_v42, %v286_v41  ;;  %v536_v36 = vld [vmem:[%s11110_s0 + $0xfd0] sm:$0xff] }
  0xb0   :  { %6142 = vmatprep.subr.bf16.mxu1 %v7198_v48  ;;  %v334_v47 = vld [vmem:[%s11110_s0 + $0x980] sm:$0xff]  ;;  %v359_v48 = vld [vmem:[%s11110_s0 + $0xa48] sm:$0xff]  ;;  %v612_v41 = vld [vmem:[%s11110_s0 + $0x1230] sm:$0xff]  ;;  %v1086_v42 = vpack.c.bf16 %v561_v37, %v536_v36 }
  0xb1   :  { %6031 = vmatpush3.bf16.msra.mxu0 %v7185_v44  ;;  %v337_v44 = vld [vmem:[%s11110_s0 + $0x998] sm:$0xff]  ;;  %v984_v54 = vpack.c.bf16 %v359_v48, %v334_v47  ;;  %v660_v47 = vld [vmem:[%s11110_s0 + $0x13b0] sm:$0xff]  ;;  %v8353_v48 = vld [vmem:[%s11112_s2] ss:$0 sm:$0xff] }
  0xb2   :  { %6032 = vmatprep.subr.bf16.mxu0 %v7186_v50  ;;  %v987_v49 = vpack.c.bf16 %v362_v45, %v337_v44  ;;  %v385_v50 = vld [vmem:[%s11110_s0 + $0xb18] sm:$0xff] }
  0xb3   :  { %6143 = vmatpush3.bf16.msra.mxu1 %v7199_v56  ;;  %v1010_v55 = vpack.c.bf16 %v410_v51, %v385_v50  ;;  %v387_v56 = vld [vmem:[%s11110_s0 + $0xb28] sm:$0xff]  ;;  %v609_v44 = vld [vmem:[%s11110_s0 + $0x1218] sm:$0xff] }
  0xb4   :  { %3204 = vmatmul.mubr.bf16.gmra.mrb[72].mxu0 %v884_v53  ;;  %6144 = vmatprep.subr.bf16.mxu1 %v7202_v60  ;;  %v361_v53 = vld [vmem:[%s11110_s0 + $0xa58] sm:$0xff] }
  0xb5   :  { %3211 = vmatprep.mubr.bf16.mxu0 %v910_v57  ;;  %6033 = vmatpush3.bf16.msra.mxu0 %v7187_v58  ;;  %v412_v57 = vld [vmem:[%s11110_s0 + $0xbf0] sm:$0xff]  ;;  %v986_v58 = vpack.c.bf16 %v361_v53, %v336_v52  ;;  %v409_v60 = vld [vmem:[%s11110_s0 + $0xbd8] sm:$0xff]  ;;  %v586_v52 = vld [vmem:[%s11110_s0 + $0x1160] sm:$0xff] }
  0xb6   :  { %6034 = vmatprep.subr.bf16.mxu0 %v7188_v59  ;;  %3365 = vmatmul.mubr.bf16.gmra.mrb[72].mxu1 %v886_v61  ;;  %v384_v59 = vld [vmem:[%s11110_s0 + $0xb10] sm:$0xff]  ;;  %v1012_v61 = vpack.c.bf16 %v412_v57, %v387_v56  ;;  %v611_v53 = vld [vmem:[%s11110_s0 + $0x1228] sm:$0xff]  ;;  %v637_v57 = vld [vmem:[%s11110_s0 + $0x12f8] sm:$0xff] }
  0xb7   :  { %3372 = vmatprep.mubr.bf16.mxu1 %v912_v0  ;;  %6145 = vmatpush3.bf16.msra.mxu1 %v7203_v2  ;;  %v1009_v0 = vpack.c.bf16 %v409_v60, %v384_v59  ;;  %v411_v2 = vld [vmem:[%s11110_s0 + $0xbe8] sm:$0xff] }
  0xb8   :  { %6146 = vmatprep.subr.bf16.mxu1 %v7204_v3  ;;  %v1035_v3 = vpack.c.bf16 %v460_v63, %v435_v62 }
  0xb9   :  { %6035 = vmatpush3.bf16.msra.mxu0 %v7189_v1  ;;  %v386_v1 = vld [vmem:[%s11110_s0 + $0xb20] sm:$0xff] }
  0xba   :  { %6036 = vmatprep.subr.bf16.mxu0 %v7192_v7  ;;  %v1011_v6 = vpack.c.bf16 %v411_v2, %v386_v1  ;;  %v434_v7 = vld [vmem:[%s11110_s0 + $0xca0] sm:$0xff] }
  0xbb   :  { %6147 = vmatpush3.bf16.msra.mxu1 %v7205_v11  ;;  %v510_v11 = vld [vmem:[%s11110_s0 + $0xf00] sm:$0xff] }
  0xbc   :  { %3212 = vmatmul.mubr.bf16.gmra.mrb[76].mxu0 %v909_v9  ;;  %6148 = vmatprep.subr.bf16.mxu1 %v7206_v16  ;;  %v1037_v9 = vpack.c.bf16 %v462_v5, %v437_v4  ;;  %v487_v16 = vld [vmem:[%s11110_s0 + $0xe48] sm:$0xff]  ;;  %v7222_v1 = vld [vmem:[%s11111_s1 + $0x3c0] sm:$0xff]  }
  0xbd   :  { %3219 = vmatprep.mubr.bf16.mxu0 %v935_v12  ;;  %6037 = vmatpush3.bf16.msra.mxu0 %v7193_v14  ;;  %v436_v12 = vld [vmem:[%s11110_s0 + $0xcb0] sm:$0xff]  ;;  %v1034_v14 = vpack.c.bf16 %v459_v8, %v434_v7  ;;  %v634_v4 = vld [vmem:[%s11110_s0 + $0x12e0] sm:$0xff]  ;;  %v659_v5 = vld [vmem:[%s11110_s0 + $0x13a8] sm:$0xff] }
  0xbe   :  { %6038 = vmatprep.subr.bf16.mxu0 %v7200_v15  ;;  %3373 = vmatmul.mubr.bf16.gmra.mrb[76].mxu1 %v911_v17  ;;  %v1060_v15 = vpack.c.bf16 %v510_v11, %v485_v10  ;;  %v512_v17 = vld [vmem:[%s11110_s0 + $0xf10] sm:$0xff]  ;;  %v1036_v18 = vpack.c.bf16 %v461_v13, %v436_v12  ;;  %v710_v12 = vld [vmem:[%s11110_s0 + $0x1540] sm:$0xff] }
  0xbf   :  { %3380 = vmatprep.mubr.bf16.mxu1 %v937_v20  ;;  %6149 = vmatpush3.bf16.msra.mxu1 %v7207_v22  ;;  %v509_v20 = vld [vmem:[%s11110_s0 + $0xef8] sm:$0xff]  ;;  %v1062_v21 = vpack.c.bf16 %v512_v17, %v487_v16  ;;  %v535_v22 = vld [vmem:[%s11110_s0 + $0xfc8] sm:$0xff]  ;;  %v1134_v17 = vpack.c.bf16 %v659_v5, %v634_v4  ;;  %v810_v5 = vld [vmem:[%s11110_s0 + $0x1860] sm:$0xff] }
  0xc0   :  { %6150 = vmatprep.subr.bf16.mxu1 %v7208_v25  ;;  %v486_v25 = vld [vmem:[%s11110_s0 + $0xe40] sm:$0xff]  ;;  %v1085_v27 = vpack.c.bf16 %v560_v23, %v535_v22  ;;  %v687_v22 = vld [vmem:[%s11110_s0 + $0x1488] sm:$0xff]  ;;  %v712_v23 = vld [vmem:[%s11110_s0 + $0x1550] sm:$0xff] }
  0xc1   :  { %6039 = vmatpush3.bf16.msra.mxu0 %v7201_v24  ;;  %v1059_v24 = vpack.c.bf16 %v509_v20, %v484_v19 }
  0xc2   :  { %6248 = vmatprep.subr.bf16.mxu0 %v7210_v26  ;;  %v511_v26 = vld [vmem:[%s11110_s0 + $0xf08] sm:$0xff] }
  0xc3   :  { %6151 = vmatpush3.bf16.msra.mxu1 %v7209_v30  ;;  %v1061_v30 = vpack.c.bf16 %v511_v26, %v486_v25 }
  0xc4   :  { %3220 = vmatmul.mubr.bf16.gmra.mrb[80].mxu0 %v934_v29  ;;  %v562_v29 = vld [vmem:[%s11110_s0 + $0x10a0] sm:$0xff]  ;;  %6360 = vmatprep.subr.bf16.mxu1 %v7222_v1 }
  0xc5   :  { %3227 = vmatprep.mubr.bf16.mxu0 %v960_v31  ;;  %v534_v31 = vld [vmem:[%s11110_s0 + $0xfc0] sm:$0xff]  ;;  %v1087_v33 = vpack.c.bf16 %v562_v29, %v537_v28 }
  0xc6   :  { %3381 = vmatmul.mubr.bf16.gmra.mrb[80].mxu1 %v936_v34  ;;  %v585_v34 = vld [vmem:[%s11110_s0 + $0x1158] sm:$0xff]  ;;  %v1084_v38 = vpack.c.bf16 %v559_v32, %v534_v31 }
  0xc7   :  { %3388 = vmatprep.mubr.bf16.mxu1 %v962_v35  ;;  %v610_v35 = vld [vmem:[%s11110_s0 + $0x1220] sm:$0xff] }
  0xc8   :  { %v1110_v39 = vpack.c.bf16 %v610_v35, %v585_v34  ;;  %v1162_v34 = vpack.c.bf16 %v712_v23, %v687_v22  ;;  %v735_v35 = vld [vmem:[%s11110_s0 + $0x1608] sm:$0xff] }
  0xcc   :  { %3228 = vmatmul.mubr.bf16.gmra.mrb[84].mxu0 %v959_v40  ;;  %v587_v40 = vld [vmem:[%s11110_s0 + $0x1168] sm:$0xff] }
  0xcd   :  { %3235 = vmatprep.mubr.bf16.mxu0 %v985_v43  ;;  %v584_v43 = vld [vmem:[%s11110_s0 + $0x1150] sm:$0xff]  ;;  %v1112_v45 = vpack.c.bf16 %v612_v41, %v587_v40 }
  0xce   :  { %3389 = vmatmul.mubr.bf16.gmra.mrb[84].mxu1 %v961_v46  ;;  %v635_v46 = vld [vmem:[%s11110_s0 + $0x12e8] sm:$0xff]  ;;  %v1109_v51 = vpack.c.bf16 %v609_v44, %v584_v43 }
  0xcf   :  { %3396 = vmatprep.mubr.bf16.mxu1 %v987_v49  ;;  %v1135_v56 = vpack.c.bf16 %v660_v47, %v635_v46  ;;  %v711_v46 = vld [vmem:[%s11110_s0 + $0x1548] sm:$0xff] }
  0xd4   :  { %3236 = vmatmul.mubr.bf16.gmra.mrb[88].mxu0 %v984_v54 }
  0xd5   :  { %3243 = vmatprep.mubr.bf16.mxu0 %v1010_v55 }
  0xd6   :  { %3397 = vmatmul.mubr.bf16.gmra.mrb[88].mxu1 %v986_v58  ;;  %v662_v58 = vld [vmem:[%s11110_s0 + $0x13c0] sm:$0xff] }
  0xd7   :  { %3404 = vmatprep.mubr.bf16.mxu1 %v1012_v61 }
  0xdc   :  { %3244 = vmatmul.mubr.bf16.gmra.mrb[92].mxu0 %v1009_v0  ;;  %v1111_v0 = vpack.c.bf16 %v611_v53, %v586_v52  ;;  %v762_v52 = vld [vmem:[%s11110_s0 + $0x16e0] sm:$0xff] }
  0xdd   :  { %3251 = vmatprep.mubr.bf16.mxu0 %v1035_v3 }
  0xde   :  { %3405 = vmatmul.mubr.bf16.gmra.mrb[92].mxu1 %v1011_v6  ;;  %v1137_v6 = vpack.c.bf16 %v662_v58, %v637_v57 }
  0xdf   :  { %3412 = vmatprep.mubr.bf16.mxu1 %v1037_v9  ;;  %v685_v9 = vld [vmem:[%s11110_s0 + $0x1478] sm:$0xff] }
  0xe4   :  { %3252 = vmatmul.mubr.bf16.gmra.mrb[96].mxu0 %v1034_v14  ;;  %v636_v14 = vld [vmem:[%s11110_s0 + $0x12f0] sm:$0xff] }
  0xe5   :  { %3259 = vmatprep.mubr.bf16.mxu0 %v1060_v15 }
  0xe6   :  { %3413 = vmatmul.mubr.bf16.gmra.mrb[96].mxu1 %v1036_v18  ;;  %v661_v18 = vld [vmem:[%s11110_s0 + $0x13b8] sm:$0xff] }
  0xe7   :  { %3420 = vmatprep.mubr.bf16.mxu1 %v1062_v21  ;;  %v1160_v21 = vpack.c.bf16 %v710_v12, %v685_v9  ;;  %v1136_v29 = vpack.c.bf16 %v661_v18, %v636_v14  ;;  %v761_v12 = vld [vmem:[%s11110_s0 + $0x16d8] sm:$0xff]  ;;  %v812_v18 = vld [vmem:[%s11110_s0 + $0x1870] sm:$0xff] }
  0xec   :  { %3260 = vmatmul.mubr.bf16.gmra.mrb[100].mxu0 %v1059_v24 }
  0xed   :  { %3267 = vmatprep.mubr.bf16.mxu0 %v1085_v27 }
  0xee   :  { %3421 = vmatmul.mubr.bf16.gmra.mrb[100].mxu1 %v1061_v30  ;;  %v684_v30 = vld [vmem:[%s11110_s0 + $0x1470] sm:$0xff] }
  0xef   :  { %3428 = vmatprep.mubr.bf16.mxu1 %v1087_v33  ;;  %v709_v33 = vld [vmem:[%s11110_s0 + $0x1538] sm:$0xff] }
  0xf0   :  { %v1159_v44 = vpack.c.bf16 %v709_v33, %v684_v30 }
  0xf4   :  { %3268 = vmatmul.mubr.bf16.gmra.mrb[104].mxu0 %v1084_v38  ;;  %v760_v38 = vld [vmem:[%s11110_s0 + $0x16d0] sm:$0xff] }
  0xf5   :  { %3275 = vmatprep.mubr.bf16.mxu0 %v1110_v39 }
  0xf6   :  { %3429 = vmatmul.mubr.bf16.gmra.mrb[104].mxu1 %v1086_v42 }
  0xf7   :  { %v5592_v49 = vpop.f32.mrb[0].mxu0  ;;  %3436 = vmatprep.mubr.bf16.mxu1 %v1112_v45  ;;  %v686_v45 = vld [vmem:[%s11110_s0 + $0x1480] sm:$0xff] }
  0xf8   :  { %v5593_v50 = vpop.f32.mrb[1].mxu0  ;;  %v1161_v58 = vpack.c.bf16 %v711_v46, %v686_v45 }
  0xf9   :  { %v5594_v54 = vadd.f32 %v5593_v50, %v5592_v49  ;;  %v5595_v55 = vpop.f32.mrb[2].mxu0  ;;  %v5704_v59 = vpop.f32.mrb[0].mxu1  ;;  %v1185_v50 = vpack.c.bf16 %v760_v38, %v735_v35  ;;  %v64_v35 = vld [vmem:[%s11110_s0 + $0x110] sm:$0xff] }
  0xfa   :  { %v5596_v60 = vpop.f32.mrb[3].mxu0  ;;  %v5705_v63 = vpop.f32.mrb[1].mxu1 }
  0xfb   :  { %v2868_v61 = vadd.f32 %v5594_v54, %v8353_v48  ;;  %v5597_v62 = vadd.f32 %v5596_v60, %v5595_v55  ;;  %v5706_v2 = vadd.f32 %v5705_v63, %v5704_v59  ;;  %v5707_v3 = vpop.f32.mrb[2].mxu1 }
  0xfc   :  { %3276 = vmatmul.mubr.bf16.gmra.mrb[108].mxu0 %v1109_v51  ;;  %v5708_v8 = vpop.f32.mrb[3].mxu1  ;;  %v737_v51 = vld [vmem:[%s11110_s0 + $0x1618] sm:$0xff] }
  0xfd   :  { %v2871_v7 = vadd.f32 %v5597_v62, %v8353_v48  ;;  %3283 = vmatprep.mubr.bf16.mxu0 %v1135_v56  ;;  %v8381_v10 = vadd.f32 %v5706_v2, %v2868_v61  ;;  %v5709_v11 = vadd.f32 %v5708_v8, %v5707_v3  ;;  %v734_v61 = vld [vmem:[%s11110_s0 + $0x1600] sm:$0xff]  ;;  %v759_v62 = vld [vmem:[%s11110_s0 + $0x16c8] sm:$0xff]  ;;  %v1187_v63 = vpack.c.bf16 %v762_v52, %v737_v51  ;;  %v785_v2 = vld [vmem:[%s11110_s0 + $0x1798] sm:$0xff] }
  0xfe   :  { %3437 = vmatmul.mubr.bf16.gmra.mrb[108].mxu1 %v1111_v0 }
  0xff   :  { %v5598_v13 = vpop.f32.mrb[4].mxu0  ;;  %v8389_v15 = vadd.f32 %v5709_v11, %v2871_v7  ;;  %3444 = vmatprep.mubr.bf16.mxu1 %v1137_v6  ;;  %v736_v7 = vld [vmem:[%s11110_s0 + $0x1610] sm:$0xff]  ;;  %v1184_v11 = vpack.c.bf16 %v759_v62, %v734_v61 }
 0x100   :  { %v5599_v16 = vpop.f32.mrb[5].mxu0 }
 0x101   :  { %v5600_v19 = vadd.f32 %v5599_v16, %v5598_v13  ;;  %v5601_v20 = vpop.f32.mrb[6].mxu0  ;;  %v5710_v24 = vpop.f32.mrb[4].mxu1  ;;  %v1210_v16 = vpack.c.bf16 %v810_v5, %v785_v2  ;;  %v114_v2 = vld [vmem:[%s11110_s0 + $0x2a0] sm:$0xff]  ;;  %v40_v5 = vld [vmem:[%s11110_s0 + $0x50] sm:$0xff] }
 0x102   :  { %v5602_v25 = vpop.f32.mrb[7].mxu0  ;;  %v5711_v28 = vpop.f32.mrb[5].mxu1 }
 0x103   :  { %v2876_v26 = vadd.f32 %v5600_v19, %v8353_v48  ;;  %v5603_v27 = vadd.f32 %v5602_v25, %v5601_v20  ;;  %v5712_v31 = vadd.f32 %v5711_v28, %v5710_v24  ;;  %v5713_v32 = vpop.f32.mrb[6].mxu1  ;;  %v1186_v24 = vpack.c.bf16 %v761_v12, %v736_v7  ;;  %v809_v28 = vld [vmem:[%s11110_s0 + $0x1858] sm:$0xff] }
 0x104   :  { %3284 = vmatmul.mubr.bf16.gmra.mrb[112].mxu0 %v1134_v17  ;;  %v5714_v37 = vpop.f32.mrb[7].mxu1  ;;  %v787_v17 = vld [vmem:[%s11110_s0 + $0x17a8] sm:$0xff] }
 0x105   :  { %v2879_v36 = vadd.f32 %v5603_v27, %v8353_v48  ;;  %3291 = vmatprep.mubr.bf16.mxu0 %v1160_v21  ;;  %v8414_v39 = vadd.f32 %v5712_v31, %v2876_v26  ;;  %v5715_v40 = vadd.f32 %v5714_v37, %v5713_v32  ;;  %v784_v27 = vld [vmem:[%s11110_s0 + $0x1790] sm:$0xff]  ;;  %v39_v32 = vld [vmem:[%s11110_s0 + $0x48] sm:$0xff] }
 0x106   :  { %3445 = vmatmul.mubr.bf16.gmra.mrb[112].mxu1 %v1136_v29  ;;  %v1212_v29 = vpack.c.bf16 %v812_v18, %v787_v17  ;;  %v839_v46 = vpack.c.bf16 %v64_v35, %v39_v32  ;;  %v91_v17 = vld [vmem:[%s11110_s0 + $0x1e8] sm:$0xff]  ;;  %v116_v18 = vld [vmem:[%s11110_s0 + $0x2b0] sm:$0xff] }
 0x107   :  { %v5604_v41 = vpop.f32.mrb[8].mxu0  ;;  %v8416_v42 = vadd.f32 %v5715_v40, %v2879_v36  ;;  %3452 = vmatprep.mubr.bf16.mxu1 %v1162_v34  ;;  %v1209_v40 = vpack.c.bf16 %v809_v28, %v784_v27  ;;  %v113_v27 = vld [vmem:[%s11110_s0 + $0x298] sm:$0xff]  ;;  %v7213_v28 = vld [vmem:[%s11111_s1 + $0x308] sm:$0xff]   ;;  %v7214_v35 = vld [vmem:[%s11111_s1 + $0x350] sm:$0xff]  }
 0x108   :  { %v5605_v43 = vpop.f32.mrb[9].mxu0  ;;  %v139_v32 = vld [vmem:[%s11110_s0 + $0x368] sm:$0xff] }
 0x109   :  { %v5606_v47 = vadd.f32 %v5605_v43, %v5604_v41  ;;  %v5607_v49 = vpop.f32.mrb[10].mxu0  ;;  %v5716_v53 = vpop.f32.mrb[8].mxu1  ;;  %v786_v41 = vld [vmem:[%s11110_s0 + $0x17a0] sm:$0xff]  ;;  %v811_v43 = vld [vmem:[%s11110_s0 + $0x1868] sm:$0xff] }
 0x10a   :  { %v5608_v54 = vpop.f32.mrb[11].mxu0  ;;  %v5717_v57 = vpop.f32.mrb[9].mxu1 }
 0x10b   :  { %v2884_v55 = vadd.f32 %v5606_v47, %v8353_v48  ;;  %v5609_v56 = vadd.f32 %v5608_v54, %v5607_v49  ;;  %v5718_v59 = vadd.f32 %v5717_v57, %v5716_v53  ;;  %v5719_v60 = vpop.f32.mrb[10].mxu1  ;;  %v41_v47 = vld [vmem:[%s11110_s0 + $0x58] sm:$0xff]  ;;  %v66_v49 = vld [vmem:[%s11110_s0 + $0x120] sm:$0xff] }
 0x10c   :  { %3292 = vmatmul.mubr.bf16.gmra.mrb[116].mxu0 %v1159_v44  ;;  %v5720_v1 = vpop.f32.mrb[11].mxu1 }
 0x10d   :  { %v2887_v0 = vadd.f32 %v5609_v56, %v8353_v48  ;;  %3299 = vmatprep.mubr.bf16.mxu0 %v1185_v50  ;;  %v8441_v3 = vadd.f32 %v5718_v59, %v2884_v55  ;;  %v5721_v4 = vadd.f32 %v5720_v1, %v5719_v60  ;;  %v1211_v55 = vpack.c.bf16 %v811_v43, %v786_v41  ;;  %v63_v59 = vld [vmem:[%s11110_s0 + $0x108] sm:$0xff] }
 0x10e   :  { %3453 = vmatmul.mubr.bf16.gmra.mrb[116].mxu1 %v1161_v58  ;;  %v38_v58 = vld [vmem:[%s11110_s0 + $0x40] sm:$0xff]  ;;  %v841_v60 = vpack.c.bf16 %v66_v49, %v41_v47  ;;  %v7226_v41 = vld [vmem:[%s11111_s1 + $0x3c8] sm:$0xff]  }
 0x10f   :  { %v5610_v6 = vpop.f32.mrb[12].mxu0  ;;  %v8449_v8 = vadd.f32 %v5721_v4, %v2887_v0  ;;  %3460 = vmatprep.mubr.bf16.mxu1 %v1187_v63  ;;  %v89_v63 = vld [vmem:[%s11110_s0 + $0x1d8] sm:$0xff]  ;;  %v115_v47 = vld [vmem:[%s11110_s0 + $0x2a8] sm:$0xff] }
 0x110   :  { %v5611_v9 = vpop.f32.mrb[13].mxu0 }
 0x111   :  { %v5612_v13 = vadd.f32 %v5611_v9, %v5610_v6  ;;  %v5613_v14 = vpop.f32.mrb[14].mxu0  ;;  %v5722_v19 = vpop.f32.mrb[12].mxu1  ;;  %v838_v9 = vpack.c.bf16 %v63_v59, %v38_v58  ;;  %v7215_v58 = vld [vmem:[%s11111_s1 + $0x310] sm:$0xff]  }
 0x112   :  { %v5614_v20 = vpop.f32.mrb[15].mxu0  ;;  %v5723_v23 = vpop.f32.mrb[13].mxu1 }
 0x113   :  { %v2892_v21 = vadd.f32 %v5612_v13, %v8353_v48  ;;  %v5615_v22 = vadd.f32 %v5614_v20, %v5613_v14  ;;  %v5724_v25 = vadd.f32 %v5723_v23, %v5722_v19  ;;  %v5725_v26 = vpop.f32.mrb[14].mxu1  ;;  %v7211_v14 = vld [vmem:[%s11111_s1 + $0x300] sm:$0xff]  }
 0x114   :  { %3300 = vmatmul.mubr.bf16.gmra.mrb[120].mxu0 %v1184_v11  ;;  %v5726_v31 = vpop.f32.mrb[15].mxu1  ;;  %v65_v11 = vld [vmem:[%s11110_s0 + $0x118] sm:$0xff] }
 0x115   :  { %v2895_v30 = vadd.f32 %v5615_v22, %v8353_v48  ;;  %3307 = vmatprep.mubr.bf16.mxu0 %v1210_v16  ;;  %v8471_v33 = vadd.f32 %v5724_v25, %v2892_v21  ;;  %v5727_v34 = vadd.f32 %v5726_v31, %v5725_v26  ;;  %v864_v16 = vpack.c.bf16 %v114_v2, %v89_v63  ;;  %v7212_v21 = vld [vmem:[%s11111_s1 + $0x348] sm:$0xff]   ;;  %v88_v26 = vld [vmem:[%s11110_s0 + $0x1d0] sm:$0xff] }
 0x116   :  { %3461 = vmatmul.mubr.bf16.gmra.mrb[120].mxu1 %v1186_v24  ;;  %v840_v25 = vpack.c.bf16 %v65_v11, %v40_v5  ;;  %v866_v31 = vpack.c.bf16 %v116_v18, %v91_v17  ;;  %v138_v5 = vld [vmem:[%s11110_s0 + $0x360] sm:$0xff]  ;;  %v7229_v18 = vld [vmem:[%s11111_s1 + $0x390] sm:$0xff]  }
 0x117   :  { %v5616_v36 = vpop.f32.mrb[16].mxu0  ;;  %v8476_v37 = vadd.f32 %v5727_v34, %v2895_v30  ;;  %3468 = vmatprep.mubr.bf16.mxu1 %v1212_v29  ;;  %v164_v34 = vld [vmem:[%s11110_s0 + $0x430] sm:$0xff]  ;;  %v7218_v17 = vld [vmem:[%s11111_s1 + $0x360] sm:$0xff]  }
 0x118   :  { %v5617_v38 = vpop.f32.mrb[17].mxu0 }
 0x119   :  { %v5618_v44 = vadd.f32 %v5617_v38, %v5616_v36  ;;  %v5619_v45 = vpop.f32.mrb[18].mxu0  ;;  %v5728_v50 = vpop.f32.mrb[16].mxu1  ;;  %v7223_v36 = vld [vmem:[%s11111_s1 + $0x380] sm:$0xff]  }
 0x11a   :  { %v5620_v51 = vpop.f32.mrb[19].mxu0  ;;  %v5729_v54 = vpop.f32.mrb[17].mxu1 }
 0x11b   :  { %v2900_v52 = vadd.f32 %v5618_v44, %v8353_v48  ;;  %v5621_v53 = vadd.f32 %v5620_v51, %v5619_v45  ;;  %v5730_v56 = vadd.f32 %v5729_v54, %v5728_v50  ;;  %v5731_v57 = vpop.f32.mrb[18].mxu1  ;;  %v90_v45 = vld [vmem:[%s11110_s0 + $0x1e0] sm:$0xff]  ;;  %v863_v51 = vpack.c.bf16 %v113_v27, %v88_v26  ;;  %v191_v27 = vld [vmem:[%s11110_s0 + $0x508] sm:$0xff] }
 0x11c   :  { %3308 = vmatmul.mubr.bf16.gmra.mrb[124].mxu0 %v1209_v40  ;;  %v5732_v62 = vpop.f32.mrb[19].mxu1 }
 0x11d   :  { %v2903_v61 = vadd.f32 %v5621_v53, %v8353_v48  ;;  %3509 = vmatprep.mubr.bf16.mxu0 %v839_v46  ;;  %v8501_v0 = vadd.f32 %v5730_v56, %v2900_v52  ;;  %v5733_v1 = vadd.f32 %v5732_v62, %v5731_v57  ;;  %v141_v52 = vld [vmem:[%s11110_s0 + $0x378] sm:$0xff]  ;;  %v7227_v53 = vld [vmem:[%s11111_s1 + $0x388] sm:$0xff]   ;;  %v889_v56 = vpack.c.bf16 %v164_v34, %v139_v32  ;;  %v166_v57 = vld [vmem:[%s11110_s0 + $0x440] sm:$0xff] }
 0x11e   :  { %3469 = vmatmul.mubr.bf16.gmra.mrb[124].mxu1 %v1211_v55  ;;  %v7228_v62 = vld [vmem:[%s11111_s1 + $0x3d0] sm:$0xff]  }
 0x11f   :  { %v5622_v4 = vpop.f32.mrb[20].mxu0  ;;  %v8509_v6 = vadd.f32 %v5733_v1, %v2903_v61  ;;  %3670 = vmatprep.mubr.bf16.mxu1 %v841_v60  ;;  %v7216_v61 = vld [vmem:[%s11111_s1 + $0x358] sm:$0xff]  }
 0x120   :  { %v5623_v7 = vpop.f32.mrb[21].mxu0 }
 0x121   :  { %v5624_v12 = vadd.f32 %v5623_v7, %v5622_v4  ;;  %v5625_v13 = vpop.f32.mrb[22].mxu0  ;;  %v5734_v19 = vpop.f32.mrb[20].mxu1  ;;  %v865_v4 = vpack.c.bf16 %v115_v47, %v90_v45  ;;  %v163_v7 = vld [vmem:[%s11110_s0 + $0x428] sm:$0xff]  ;;  %v7234_v45 = vld [vmem:[%s11111_s1 + $0x3e0] sm:$0xff]  }
 0x122   :  { %v5626_v20 = vpop.f32.mrb[23].mxu0  ;;  %v5735_v24 = vpop.f32.mrb[21].mxu1 }
 0x123   :  { %v2908_v22 = vadd.f32 %v5624_v12, %v8353_v48  ;;  %v5627_v23 = vadd.f32 %v5626_v20, %v5625_v13  ;;  %v5736_v29 = vadd.f32 %v5735_v24, %v5734_v19  ;;  %v5737_v30 = vpop.f32.mrb[22].mxu1  ;;  %v891_v13 = vpack.c.bf16 %v166_v57, %v141_v52  ;;  %v140_v24 = vld [vmem:[%s11110_s0 + $0x370] sm:$0xff] }
 0x124   :  { %3510 = vmatmul.mubr.bf16.vlgmr.msra.gmra.mrb[128].mxu0 %v838_v9  ;;  %v5738_v40 = vpop.f32.mrb[23].mxu1  ;;  %v7217_v9 = vld [vmem:[%s11111_s1 + $0x318] sm:$0xff]   ;;  %v188_v52 = vld [vmem:[%s11110_s0 + $0x4f0] sm:$0xff] }
 0x125   :  { %v2911_v38 = vadd.f32 %v5627_v23, %v8353_v48  ;;  %6249 = vmatpush3.bf16.msra.mxu0 %v7211_v14  ;;  %3517 = vmatprep.mubr.bf16.mxu0 %v864_v16  ;;  %v8552_v43 = vadd.f32 %v5736_v29, %v2908_v22  ;;  %v5739_v44 = vadd.f32 %v5738_v40, %v5737_v30  ;;  %v189_v14 = vld [vmem:[%s11110_s0 + $0x4f8] sm:$0xff]  ;;  %v214_v16 = vld [vmem:[%s11110_s0 + $0x5c0] sm:$0xff] }
 0x126   :  { %6250 = vmatprep.subr.bf16.mxu0 %v7212_v21  ;;  %3671 = vmatmul.mubr.bf16.vlgmr.msra.gmra.mrb[128].mxu1 %v840_v25  ;;  %v7230_v21 = vld [vmem:[%s11111_s1 + $0x3d8] sm:$0xff]   ;;  %v888_v30 = vpack.c.bf16 %v163_v7, %v138_v5  ;;  %v190_v5 = vld [vmem:[%s11110_s0 + $0x500] sm:$0xff] }
 0x127   :  { %v5628_v46 = vpop.f32.mrb[24].mxu0  ;;  %v8560_v49 = vadd.f32 %v5739_v44, %v2911_v38  ;;  %3678 = vmatprep.mubr.bf16.mxu1 %v866_v31  ;;  %6361 = vmatpush3.bf16.msra.mxu1 %v7223_v36  ;;  %v165_v25 = vld [vmem:[%s11110_s0 + $0x438] sm:$0xff]  ;;  %v216_v36 = vld [vmem:[%s11110_s0 + $0x5d0] sm:$0xff]  ;;  %v7219_v38 = vld [vmem:[%s11111_s1 + $0x320] sm:$0xff]  }
 0x128   :  { %v5629_v50 = vpop.f32.mrb[25].mxu0  ;;  %6362 = vmatprep.subr.bf16.mxu1 %v7226_v41  ;;  %v7231_v31 = vld [vmem:[%s11111_s1 + $0x398] sm:$0xff]   ;;  %v7220_v44 = vld [vmem:[%s11111_s1 + $0x368] sm:$0xff]   ;;  %v916_v57 = vpack.c.bf16 %v216_v36, %v191_v27 }
 0x129   :  { %v5630_v54 = vadd.f32 %v5629_v50, %v5628_v46  ;;  %v5631_v55 = vpop.f32.mrb[26].mxu0  ;;  %6251 = vmatpush3.bf16.msra.mxu0 %v7213_v28  ;;  %v5740_v59 = vpop.f32.mrb[24].mxu1 }
 0x12a   :  { %v5632_v60 = vpop.f32.mrb[27].mxu0  ;;  %6252 = vmatprep.subr.bf16.mxu0 %v7214_v35  ;;  %v5741_v2 = vpop.f32.mrb[25].mxu1  ;;  %v914_v35 = vpack.c.bf16 %v214_v16, %v189_v14  ;;  %v241_v14 = vld [vmem:[%s11110_s0 + $0x698] sm:$0xff]  ;;  %v7237_v16 = vld [vmem:[%s11111_s1 + $0x3a8] sm:$0xff]  }
 0x12b   :  { %v2916_v63 = vadd.f32 %v5630_v54, %v8353_v48  ;;  %v5633_v1 = vadd.f32 %v5632_v60, %v5631_v55  ;;  %v5742_v11 = vadd.f32 %v5741_v2, %v5740_v59  ;;  %v5743_v12 = vpop.f32.mrb[26].mxu1  ;;  %6363 = vmatpush3.bf16.msra.mxu1 %v7227_v53  ;;  %v213_v53 = vld [vmem:[%s11110_s0 + $0x5b8] sm:$0xff]  ;;  %v7221_v54 = vld [vmem:[%s11111_s1 + $0x328] sm:$0xff]   ;;  %v264_v59 = vld [vmem:[%s11110_s0 + $0x750] sm:$0xff] }
 0x12c   :  { %3518 = vmatmul.mubr.bf16.gmra.mrb[132].mxu0 %v863_v51  ;;  %v5744_v20 = vpop.f32.mrb[27].mxu1  ;;  %6364 = vmatprep.subr.bf16.mxu1 %v7228_v62  ;;  %v890_v51 = vpack.c.bf16 %v165_v25, %v140_v24  ;;  %v7224_v60 = vld [vmem:[%s11111_s1 + $0x370] sm:$0xff]   ;;  %v7232_v25 = vld [vmem:[%s11111_s1 + $0x378] sm:$0xff]  }
 0x12d   :  { %v2919_v19 = vadd.f32 %v5633_v1, %v8353_v48  ;;  %3525 = vmatprep.mubr.bf16.mxu0 %v889_v56  ;;  %6253 = vmatpush3.bf16.msra.mxu0 %v7215_v58  ;;  %v8606_v22 = vadd.f32 %v5742_v11, %v2916_v63  ;;  %v5745_v23 = vadd.f32 %v5744_v20, %v5743_v12  ;;  %v239_v58 = vld [vmem:[%s11110_s0 + $0x688] sm:$0xff]  ;;  %v266_v20 = vld [vmem:[%s11110_s0 + $0x760] sm:$0xff] }
 0x12e   :  { %6254 = vmatprep.subr.bf16.mxu0 %v7216_v61  ;;  %3679 = vmatmul.mubr.bf16.gmra.mrb[132].mxu1 %v865_v4  ;;  %v7235_v61 = vld [vmem:[%s11111_s1 + $0x3a0] sm:$0xff]   ;;  %v7236_v1 = vld [vmem:[%s11111_s1 + $0x3e8] sm:$0xff]  }
 0x12f   :  { %v5634_v26 = vpop.f32.mrb[28].mxu0  ;;  %v8617_v28 = vadd.f32 %v5745_v23, %v2919_v19  ;;  %3686 = vmatprep.mubr.bf16.mxu1 %v891_v13  ;;  %6365 = vmatpush3.bf16.msra.mxu1 %v7229_v18  ;;  %v913_v13 = vpack.c.bf16 %v213_v53, %v188_v52  ;;  %v939_v19 = vpack.c.bf16 %v264_v59, %v239_v58 }
 0x130   :  { %v5635_v29 = vpop.f32.mrb[29].mxu0  ;;  %6366 = vmatprep.subr.bf16.mxu1 %v7230_v21  ;;  %v7225_v21 = vld [vmem:[%s11111_s1 + $0x330] sm:$0xff]  }
 0x131   :  { %v5636_v32 = vadd.f32 %v5635_v29, %v5634_v26  ;;  %v5637_v34 = vpop.f32.mrb[30].mxu0  ;;  %6255 = vmatpush3.bf16.msra.mxu0 %v7217_v9  ;;  %v5746_v40 = vpop.f32.mrb[28].mxu1  ;;  %v215_v9 = vld [vmem:[%s11110_s0 + $0x5c8] sm:$0xff]  ;;  %v7238_v26 = vld [vmem:[%s11111_s1 + $0x3f0] sm:$0xff]  }
 0x132   :  { %v5638_v41 = vpop.f32.mrb[31].mxu0  ;;  %6256 = vmatprep.subr.bf16.mxu0 %v7218_v17  ;;  %v5747_v50 = vpop.f32.mrb[29].mxu1 }
 0x133   :  { %v2924_v46 = vadd.f32 %v5636_v32, %v8353_v48  ;;  %v5639_v47 = vadd.f32 %v5638_v41, %v5637_v34  ;;  %v5748_v55 = vadd.f32 %v5747_v50, %v5746_v40  ;;  %v5749_v56 = vpop.f32.mrb[30].mxu1  ;;  %6367 = vmatpush3.bf16.msra.mxu1 %v7231_v31  ;;  %v915_v31 = vpack.c.bf16 %v215_v9, %v190_v5  ;;  %v238_v32 = vld [vmem:[%s11110_s0 + $0x680] sm:$0xff]  ;;  %v263_v34 = vld [vmem:[%s11110_s0 + $0x748] sm:$0xff]  ;;  %v289_v41 = vld [vmem:[%s11110_s0 + $0x818] sm:$0xff] }
 0x134   :  { %3526 = vmatmul.mubr.bf16.gmra.mrb[136].mxu0 %v888_v30  ;;  %v5750_v63 = vpop.f32.mrb[31].mxu1  ;;  %6368 = vmatprep.subr.bf16.mxu1 %v7234_v45  ;;  %v941_v40 = vpack.c.bf16 %v266_v20, %v241_v14  ;;  %v7239_v45 = vld [vmem:[%s11111_s1 + $0x3b0] sm:$0xff]   ;;  %v938_v59 = vpack.c.bf16 %v263_v34, %v238_v32 }
 0x135   :  { %v2927_v62 = vadd.f32 %v5639_v47, %v8353_v48  ;;  %3533 = vmatprep.mubr.bf16.mxu0 %v914_v35  ;;  %6257 = vmatpush3.bf16.msra.mxu0 %v7219_v38  ;;  %v8660_v2 = vadd.f32 %v5748_v55, %v2924_v46  ;;  %v5751_v4 = vadd.f32 %v5750_v63, %v5749_v56  ;;  %v7233_v35 = vld [vmem:[%s11111_s1 + $0x338] sm:$0xff]  }
 0x136   :  { %6258 = vmatprep.subr.bf16.mxu0 %v7220_v44  ;;  %3687 = vmatmul.mubr.bf16.gmra.mrb[136].mxu1 %v890_v51  ;;  %v314_v44 = vld [vmem:[%s11110_s0 + $0x8e0] sm:$0xff]  ;;  %v7240_v46 = vld [vmem:[%s11111_s1 + $0x3f8] sm:$0xff]  }
 0x137   :  { %v5640_v7 = vpop.f32.mrb[32].mxu0  ;;  %v8668_v11 = vadd.f32 %v5751_v4, %v2927_v62  ;;  %3694 = vmatprep.mubr.bf16.mxu1 %v916_v57  ;;  %6369 = vmatpush3.bf16.msra.mxu1 %v7235_v61  ;;  %v7242_v51 = vld [vmem:[%s11111_s1 + $0x440] sm:$0xff]   ;;  %v265_v56 = vld [vmem:[%s11110_s0 + $0x758] sm:$0xff]  ;;  %v964_v63 = vpack.c.bf16 %v314_v44, %v289_v41  ;;  %v316_v4 = vld [vmem:[%s11110_s0 + $0x8f0] sm:$0xff] }
 0x138   :  { %v5641_v12 = vpop.f32.mrb[33].mxu0  ;;  %6370 = vmatprep.subr.bf16.mxu1 %v7236_v1  ;;  %v291_v1 = vld [vmem:[%s11110_s0 + $0x828] sm:$0xff] }
 0x139   :  { %v5642_v17 = vadd.f32 %v5641_v12, %v5640_v7  ;;  %v5643_v18 = vpop.f32.mrb[34].mxu0  ;;  %6259 = vmatpush3.bf16.msra.mxu0 %v7221_v54  ;;  %v5752_v23 = vpop.f32.mrb[32].mxu1  ;;  %v240_v54 = vld [vmem:[%s11110_s0 + $0x690] sm:$0xff] }
 0x13a   :  { %v5644_v24 = vpop.f32.mrb[35].mxu0  ;;  %6260 = vmatprep.subr.bf16.mxu0 %v7224_v60  ;;  %v5753_v30 = vpop.f32.mrb[33].mxu1  ;;  %v7241_v60 = vld [vmem:[%s11111_s1 + $0x3b8] sm:$0xff]   ;;  %v940_v14 = vpack.c.bf16 %v265_v56, %v240_v54 }
 0x13b   :  { %v2932_v27 = vadd.f32 %v5642_v17, %v8353_v48  ;;  %v5645_v29 = vadd.f32 %v5644_v24, %v5643_v18  ;;  %v5754_v36 = vadd.f32 %v5753_v30, %v5752_v23  ;;  %v5755_v38 = vpop.f32.mrb[34].mxu1  ;;  %6371 = vmatpush3.bf16.msra.mxu1 %v7237_v16  ;;  %v288_v18 = vld [vmem:[%s11110_s0 + $0x810] sm:$0xff]  ;;  %v313_v23 = vld [vmem:[%s11110_s0 + $0x8d8] sm:$0xff] }
 0x13c   :  { %3534 = vmatmul.mubr.bf16.gmra.mrb[140].mxu0 %v913_v13  ;;  %v5756_v50 = vpop.f32.mrb[35].mxu1  ;;  %6372 = vmatprep.subr.bf16.mxu1 %v7238_v26  ;;  %v339_v26 = vld [vmem:[%s11110_s0 + $0x9a8] sm:$0xff] }
 0x13d   :  { %v2935_v47 = vadd.f32 %v5645_v29, %v8353_v48  ;;  %3541 = vmatprep.mubr.bf16.mxu0 %v939_v19  ;;  %6261 = vmatpush3.bf16.msra.mxu0 %v7225_v21  ;;  %v8714_v52 = vadd.f32 %v5754_v36, %v2932_v27  ;;  %v5757_v53 = vadd.f32 %v5756_v50, %v5755_v38  ;;  %v364_v27 = vld [vmem:[%s11110_s0 + $0xa70] sm:$0xff] }
 0x13e   :  { %6262 = vmatprep.subr.bf16.mxu0 %v7232_v25  ;;  %3695 = vmatmul.mubr.bf16.gmra.mrb[140].mxu1 %v915_v31  ;;  %v966_v19 = vpack.c.bf16 %v316_v4, %v291_v1 }
 0x13f   :  { %v5646_v55 = vpop.f32.mrb[36].mxu0  ;;  %v8722_v57 = vadd.f32 %v5757_v53, %v2935_v47  ;;  %3702 = vmatprep.mubr.bf16.mxu1 %v941_v40  ;;  %6373 = vmatpush3.bf16.msra.mxu1 %v7239_v45 }
 0x140   :  { %v5647_v58 = vpop.f32.mrb[37].mxu0  ;;  %6374 = vmatprep.subr.bf16.mxu1 %v7240_v46 }
 0x141   :  { %v5648_v61 = vadd.f32 %v5647_v58, %v5646_v55  ;;  %v5649_v62 = vpop.f32.mrb[38].mxu0  ;;  %6263 = vmatpush3.bf16.msra.mxu0 %v7233_v35  ;;  %v5758_v5 = vpop.f32.mrb[36].mxu1 }
 0x142   :  { %v5650_v7 = vpop.f32.mrb[39].mxu0  ;;  %6472 = vmatprep.subr.bf16.mxu0 %v7242_v51  ;;  %v5759_v13 = vpop.f32.mrb[37].mxu1 }
 0x143   :  { %v2940_v9 = vadd.f32 %v5648_v61, %v8353_v48  ;;  %v5651_v12 = vadd.f32 %v5650_v7, %v5649_v62  ;;  %v5760_v16 = vadd.f32 %v5759_v13, %v5758_v5  ;;  %v5761_v17 = vpop.f32.mrb[38].mxu1  ;;  %6375 = vmatpush3.bf16.msra.mxu1 %v7241_v60 }
 0x144   :  { %3542 = vmatmul.mubr.bf16.gmra.mrb[144].mxu0 %v938_v59  ;;  %v5762_v21 = vpop.f32.mrb[39].mxu1 }
 0x145   :  { %v2943_v20 = vadd.f32 %v5651_v12, %v8353_v48  ;;  %3549 = vmatprep.mubr.bf16.mxu0 %v964_v63  ;;  %v8741_v24 = vadd.f32 %v5760_v16, %v2940_v9  ;;  %v5763_v25 = vadd.f32 %v5762_v21, %v5761_v17 }
 0x146   :  { %3703 = vmatmul.mubr.bf16.gmra.mrb[144].mxu1 %v940_v14 }
 0x147   :  { %v5652_v29 = vpop.f32.mrb[40].mxu0 }
 0x148   :  { %14 = vsyncpa [#allocation4], 0  ;;  %v8749_v48 = vadd.f32 %v5763_v25, %v2943_v20  ;;  %v5653_v30 = vpop.f32.mrb[41].mxu0  ;;  %v963_v31 = vpack.c.bf16 %v313_v23, %v288_v18  ;;  %3710 = vmatprep.mubr.bf16.mxu1 %v966_v19  ;;  %v290_v32 = vld [vmem:[%s11110_s0 + $0x820] sm:$0xff]  ;;  %v315_v34 = vld [vmem:[%s11110_s0 + $0x8e8] sm:$0xff]  ;;  %v989_v38 = vpack.c.bf16 %v364_v27, %v339_v26  ;;  %vm2826_vm0 = vcmask 1042432  }
 0x149   :  { %v5654_v35 = vadd.f32 %v5653_v30, %v5652_v29  ;;  %v5655_v36 = vpop.f32.mrb[42].mxu0  ;;  %v341_v40 = vld [vmem:[%s11110_s0 + $0x9b8] sm:$0xff]  ;;  %v366_v41 = vld [vmem:[%s11110_s0 + $0xa80] sm:$0xff]  ;;  %v5764_v44 = vpop.f32.mrb[40].mxu1  ;;  %v965_v53 = vpack.c.bf16 %v315_v34, %v290_v32  ;;  %v363_v61 = vld [vmem:[%s11110_s0 + $0xa68] sm:$0xff]  ;;  %vm2827_vm1 = vcmask 1043456  }
 0x14a   :  { %v5656_v45 = vpop.f32.mrb[43].mxu0  ;;  %v8766_v46 = vld [vmem:[%s11112_s2] ss:$0 sm:$0xff]  ;;  %v5765_v51 = vpop.f32.mrb[41].mxu1  ;;  %v991_v56 = vpack.c.bf16 %v366_v41, %v341_v40  ;;  %v389_v1 = vld [vmem:[%s11110_s0 + $0xb38] sm:$0xff]  ;;  %v340_v13 = vld [vmem:[%s11110_s0 + $0x9b0] sm:$0xff] }
 0x14b   :  { %v2948_v47 = vadd.f32 %v8766_v46, %v5654_v35  ;;  %v5657_v50 = vadd.f32 %v5656_v45, %v5655_v36  ;;  %v5766_v54 = vadd.f32 %v5765_v51, %v5764_v44  ;;  %v5767_v55 = vpop.f32.mrb[42].mxu1  ;;  %v338_v60 = vld [vmem:[%s11110_s0 + $0x9a0] sm:$0xff]  ;;  %v365_v14 = vld [vmem:[%s11110_s0 + $0xa78] sm:$0xff]  ;;  %v391_v19 = vld [vmem:[%s11110_s0 + $0xb48] sm:$0xff]  ;;  %vm2777_vm2 = vcmask 56320  }
 0x14c   :  { %3550 = vmatmul.mubr.bf16.gmra.mrb[148].mxu0 %v963_v31  ;;  %v5768_v59 = vpop.f32.mrb[43].mxu1  ;;  %v414_v4 = vld [vmem:[%s11110_s0 + $0xc00] sm:$0xff]  ;;  %v988_v12 = vpack.c.bf16 %v363_v61, %v338_v60  ;;  %v416_v20 = vld [vmem:[%s11110_s0 + $0xc10] sm:$0xff]  ;;  %v990_v29 = vpack.c.bf16 %v365_v14, %v340_v13  ;;  %v439_v44 = vld [vmem:[%s11110_s0 + $0xcc8] sm:$0xff] }
 0x14d   :  { %v2951_v58 = vadd.f32 %v8766_v46, %v5657_v50  ;;  %3557 = vmatprep.mubr.bf16.mxu0 %v989_v38  ;;  %v8776_v62 = vadd.f32 %v5766_v54, %v2948_v47  ;;  %v5769_v63 = vadd.f32 %v5768_v59, %v5767_v55  ;;  %v1014_v18 = vpack.c.bf16 %v414_v4, %v389_v1  ;;  %v388_v36 = vld [vmem:[%s11110_s0 + $0xb30] sm:$0xff]  ;;  %v413_v38 = vld [vmem:[%s11110_s0 + $0xbf8] sm:$0xff]  ;;  %v390_v54 = vld [vmem:[%s11110_s0 + $0xb40] sm:$0xff] }
 0x14e   :  { %3711 = vmatmul.mubr.bf16.gmra.mrb[148].mxu1 %v965_v53  ;;  %v1016_v32 = vpack.c.bf16 %v416_v20, %v391_v19  ;;  %v464_v45 = vld [vmem:[%s11110_s0 + $0xd90] sm:$0xff]  ;;  %v1013_v53 = vpack.c.bf16 %v413_v38, %v388_v36  ;;  %v415_v55 = vld [vmem:[%s11110_s0 + $0xc08] sm:$0xff]  ;;  %v441_v60 = vld [vmem:[%s11110_s0 + $0xcd8] sm:$0xff] }
 0x14f   :  { %v5658_v5 = vpop.f32.mrb[44].mxu0  ;;  %v8784_v7 = vadd.f32 %v5769_v63, %v2951_v58  ;;  %3718 = vmatprep.mubr.bf16.mxu1 %v991_v56  ;;  %v1039_v59 = vpack.c.bf16 %v464_v45, %v439_v44  ;;  %v466_v61 = vld [vmem:[%s11110_s0 + $0xda0] sm:$0xff]  ;;  %v463_v20 = vld [vmem:[%s11110_s0 + $0xd88] sm:$0xff]  ;;  %v516_v44 = vld [vmem:[%s11110_s0 + $0xf30] sm:$0xff] }
 0x150   :  { %v5659_v9 = vpop.f32.mrb[45].mxu0  ;;  %v438_v19 = vld [vmem:[%s11110_s0 + $0xcc0] sm:$0xff] }
 0x151   :  { %v5660_v16 = vadd.f32 %v5659_v9, %v5658_v5  ;;  %v5661_v17 = vpop.f32.mrb[46].mxu0  ;;  %v5770_v21 = vpop.f32.mrb[44].mxu1 }
 0x152   :  { %v5662_v23 = vpop.f32.mrb[47].mxu0  ;;  %v5771_v27 = vpop.f32.mrb[45].mxu1 }
 0x153   :  { %v2956_v25 = vadd.f32 %v8766_v46, %v5660_v16  ;;  %v5663_v26 = vadd.f32 %v5662_v23, %v5661_v17  ;;  %v5772_v30 = vadd.f32 %v5771_v27, %v5770_v21  ;;  %v5773_v31 = vpop.f32.mrb[46].mxu1  ;;  %v1041_v16 = vpack.c.bf16 %v466_v61, %v441_v60 }
 0x154   :  { %3558 = vmatmul.mubr.bf16.gmra.mrb[152].mxu0 %v988_v12  ;;  %v5774_v35 = vpop.f32.mrb[47].mxu1  ;;  %v1015_v12 = vpack.c.bf16 %v415_v55, %v390_v54 }
 0x155   :  { %v2959_v34 = vadd.f32 %v8766_v46, %v5663_v26  ;;  %3565 = vmatprep.mubr.bf16.mxu0 %v1014_v18  ;;  %v8806_v40 = vadd.f32 %v5772_v30, %v2956_v25  ;;  %v5775_v41 = vadd.f32 %v5774_v35, %v5773_v31  ;;  %v489_v25 = vld [vmem:[%s11110_s0 + $0xe58] sm:$0xff]  ;;  %v514_v26 = vld [vmem:[%s11110_s0 + $0xf20] sm:$0xff]  ;;  %v1038_v31 = vpack.c.bf16 %v463_v20, %v438_v19  ;;  %v515_v19 = vld [vmem:[%s11110_s0 + $0xf28] sm:$0xff] }
 0x156   :  { %3719 = vmatmul.mubr.bf16.gmra.mrb[152].mxu1 %v990_v29  ;;  %v1064_v38 = vpack.c.bf16 %v514_v26, %v489_v25  ;;  %v541_v26 = vld [vmem:[%s11110_s0 + $0xff8] sm:$0xff] }
 0x157   :  { %v5664_v47 = vpop.f32.mrb[48].mxu0  ;;  %v8814_v50 = vadd.f32 %v5775_v41, %v2959_v34  ;;  %3726 = vmatprep.mubr.bf16.mxu1 %v1016_v32  ;;  %v440_v32 = vld [vmem:[%s11110_s0 + $0xcd0] sm:$0xff]  ;;  %v465_v34 = vld [vmem:[%s11110_s0 + $0xd98] sm:$0xff]  ;;  %v491_v41 = vld [vmem:[%s11110_s0 + $0xe68] sm:$0xff] }
 0x158   :  { %v5665_v51 = vpop.f32.mrb[49].mxu0  ;;  %v1040_v55 = vpack.c.bf16 %v465_v34, %v440_v32 }
 0x159   :  { %v5666_v56 = vadd.f32 %v5665_v51, %v5664_v47  ;;  %v5667_v58 = vpop.f32.mrb[50].mxu0  ;;  %v5776_v63 = vpop.f32.mrb[48].mxu1 }
 0x15a   :  { %v5668_v1 = vpop.f32.mrb[51].mxu0  ;;  %v5777_v9 = vpop.f32.mrb[49].mxu1 }
 0x15b   :  { %v2964_v4 = vadd.f32 %v8766_v46, %v5666_v56  ;;  %v5669_v5 = vadd.f32 %v5668_v1, %v5667_v58  ;;  %v5778_v13 = vadd.f32 %v5777_v9, %v5776_v63  ;;  %v5779_v14 = vpop.f32.mrb[50].mxu1  ;;  %v488_v63 = vld [vmem:[%s11110_s0 + $0xe50] sm:$0xff]  ;;  %v513_v1 = vld [vmem:[%s11110_s0 + $0xf18] sm:$0xff]  ;;  %v539_v9 = vld [vmem:[%s11110_s0 + $0xfe8] sm:$0xff] }
 0x15c   :  { %3566 = vmatmul.mubr.bf16.gmra.mrb[156].mxu0 %v1013_v53  ;;  %v5780_v18 = vpop.f32.mrb[51].mxu1 }
 0x15d   :  { %v2967_v17 = vadd.f32 %v8766_v46, %v5669_v5  ;;  %3573 = vmatprep.mubr.bf16.mxu0 %v1039_v59  ;;  %v8836_v21 = vadd.f32 %v5778_v13, %v2964_v4  ;;  %v5781_v23 = vadd.f32 %v5780_v18, %v5779_v14  ;;  %v1066_v59 = vpack.c.bf16 %v516_v44, %v491_v41  ;;  %v490_v18 = vld [vmem:[%s11110_s0 + $0xe60] sm:$0xff] }
 0x15e   :  { %3727 = vmatmul.mubr.bf16.gmra.mrb[156].mxu1 %v1015_v12  ;;  %v564_v12 = vld [vmem:[%s11110_s0 + $0x10b0] sm:$0xff] }
 0x15f   :  { %v5670_v27 = vpop.f32.mrb[52].mxu0  ;;  %v8844_v29 = vadd.f32 %v5781_v23, %v2967_v17  ;;  %3734 = vmatprep.mubr.bf16.mxu1 %v1041_v16  ;;  %v1063_v17 = vpack.c.bf16 %v513_v1, %v488_v63  ;;  %v1089_v25 = vpack.c.bf16 %v564_v12, %v539_v9  ;;  %v540_v1 = vld [vmem:[%s11110_s0 + $0xff0] sm:$0xff] }
 0x160   :  { %v5671_v30 = vpop.f32.mrb[53].mxu0 }
 0x161   :  { %v5672_v35 = vadd.f32 %v5671_v30, %v5670_v27  ;;  %v5673_v36 = vpop.f32.mrb[54].mxu0  ;;  %v5782_v45 = vpop.f32.mrb[52].mxu1  ;;  %v566_v27 = vld [vmem:[%s11110_s0 + $0x10c0] sm:$0xff] }
 0x162   :  { %v5674_v47 = vpop.f32.mrb[55].mxu0  ;;  %v5783_v54 = vpop.f32.mrb[53].mxu1  ;;  %v1091_v44 = vpack.c.bf16 %v566_v27, %v541_v26 }
 0x163   :  { %v2972_v51 = vadd.f32 %v8766_v46, %v5672_v35  ;;  %v5675_v53 = vadd.f32 %v5674_v47, %v5673_v36  ;;  %v5784_v56 = vadd.f32 %v5783_v54, %v5782_v45  ;;  %v5785_v58 = vpop.f32.mrb[54].mxu1  ;;  %v1065_v36 = vpack.c.bf16 %v515_v19, %v490_v18 }
 0x164   :  { %3574 = vmatmul.mubr.bf16.gmra.mrb[160].mxu0 %v1038_v31  ;;  %v5786_v61 = vpop.f32.mrb[55].mxu1 }
 0x165   :  { %v2975_v60 = vadd.f32 %v8766_v46, %v5675_v53  ;;  %3581 = vmatprep.mubr.bf16.mxu0 %v1064_v38  ;;  %v8866_v4 = vadd.f32 %v5784_v56, %v2972_v51  ;;  %v5787_v5 = vadd.f32 %v5786_v61, %v5785_v58  ;;  %v538_v51 = vld [vmem:[%s11110_s0 + $0xfe0] sm:$0xff]  ;;  %v563_v53 = vld [vmem:[%s11110_s0 + $0x10a8] sm:$0xff]  ;;  %v589_v56 = vld [vmem:[%s11110_s0 + $0x1178] sm:$0xff] }
 0x166   :  { %3735 = vmatmul.mubr.bf16.gmra.mrb[160].mxu1 %v1040_v55  ;;  %v614_v58 = vld [vmem:[%s11110_s0 + $0x1240] sm:$0xff]  ;;  %v1088_v63 = vpack.c.bf16 %v563_v53, %v538_v51 }
 0x167   :  { %v5676_v13 = vpop.f32.mrb[56].mxu0  ;;  %v8874_v14 = vadd.f32 %v5787_v5, %v2975_v60  ;;  %3742 = vmatprep.mubr.bf16.mxu1 %v1066_v59  ;;  %v565_v5 = vld [vmem:[%s11110_s0 + $0x10b8] sm:$0xff] }
 0x168   :  { %v5677_v16 = vpop.f32.mrb[57].mxu0  ;;  %v1090_v26 = vpack.c.bf16 %v565_v5, %v540_v1  ;;  %v666_v1 = vld [vmem:[%s11110_s0 + $0x13e0] sm:$0xff] }
 0x169   :  { %v5678_v20 = vadd.f32 %v5677_v16, %v5676_v13  ;;  %v5679_v23 = vpop.f32.mrb[58].mxu0  ;;  %v5788_v30 = vpop.f32.mrb[56].mxu1  ;;  %v1114_v13 = vpack.c.bf16 %v614_v58, %v589_v56  ;;  %v591_v16 = vld [vmem:[%s11110_s0 + $0x1188] sm:$0xff] }
 0x16a   :  { %v5680_v31 = vpop.f32.mrb[59].mxu0  ;;  %v5789_v35 = vpop.f32.mrb[57].mxu1  ;;  %v615_v56 = vld [vmem:[%s11110_s0 + $0x1248] sm:$0xff] }
 0x16b   :  { %v2980_v32 = vadd.f32 %v8766_v46, %v5678_v20  ;;  %v5681_v34 = vadd.f32 %v5680_v31, %v5679_v23  ;;  %v5790_v38 = vadd.f32 %v5789_v35, %v5788_v30  ;;  %v5791_v41 = vpop.f32.mrb[58].mxu1  ;;  %v588_v35 = vld [vmem:[%s11110_s0 + $0x1170] sm:$0xff] }
 0x16c   :  { %3582 = vmatmul.mubr.bf16.gmra.mrb[164].mxu0 %v1063_v17  ;;  %v5792_v47 = vpop.f32.mrb[59].mxu1  ;;  %v616_v17 = vld [vmem:[%s11110_s0 + $0x1250] sm:$0xff] }
 0x16d   :  { %v2983_v45 = vadd.f32 %v8766_v46, %v5681_v34  ;;  %3589 = vmatprep.mubr.bf16.mxu0 %v1089_v25  ;;  %v8896_v54 = vadd.f32 %v5790_v38, %v2980_v32  ;;  %v5793_v55 = vadd.f32 %v5792_v47, %v5791_v41  ;;  %v1116_v31 = vpack.c.bf16 %v616_v17, %v591_v16 }
 0x16e   :  { %3743 = vmatmul.mubr.bf16.gmra.mrb[164].mxu1 %v1065_v36  ;;  %v613_v36 = vld [vmem:[%s11110_s0 + $0x1238] sm:$0xff] }
 0x16f   :  { %v5682_v59 = vpop.f32.mrb[60].mxu0  ;;  %v8904_v60 = vadd.f32 %v5793_v55, %v2983_v45  ;;  %3750 = vmatprep.mubr.bf16.mxu1 %v1091_v44  ;;  %v639_v44 = vld [vmem:[%s11110_s0 + $0x1308] sm:$0xff]  ;;  %v1113_v53 = vpack.c.bf16 %v613_v36, %v588_v35  ;;  %v590_v55 = vld [vmem:[%s11110_s0 + $0x1180] sm:$0xff] }
 0x170   :  { %v5683_v61 = vpop.f32.mrb[61].mxu0  ;;  %v1115_v17 = vpack.c.bf16 %v615_v56, %v590_v55  ;;  %v691_v55 = vld [vmem:[%s11110_s0 + $0x14a8] sm:$0xff]  ;;  %v716_v56 = vld [vmem:[%s11110_s0 + $0x1570] sm:$0xff] }
 0x171   :  { %v5684_v9 = vadd.f32 %v5683_v61, %v5682_v59  ;;  %v5685_v12 = vpop.f32.mrb[62].mxu0  ;;  %v5794_v18 = vpop.f32.mrb[60].mxu1 }
 0x172   :  { %v5686_v19 = vpop.f32.mrb[63].mxu0  ;;  %v5795_v25 = vpop.f32.mrb[61].mxu1 }
 0x173   :  { %v2988_v20 = vadd.f32 %v8766_v46, %v5684_v9  ;;  %v5687_v23 = vadd.f32 %v5686_v19, %v5685_v12  ;;  %v5796_v27 = vadd.f32 %v5795_v25, %v5794_v18  ;;  %v5797_v30 = vpop.f32.mrb[62].mxu1  ;;  %v7254_v18 = vld [vmem:[%s11111_s1 + $0x4c0] sm:$0xff]  }
 0x174   :  { %3590 = vmatmul.mubr.bf16.gmra.mrb[168].mxu0 %v1088_v63  ;;  %v5798_v34 = vpop.f32.mrb[63].mxu1  ;;  %v641_v63 = vld [vmem:[%s11110_s0 + $0x1318] sm:$0xff]  ;;  %6584 = vmatprep.subr.bf16.mxu1 %v7254_v18  ;;  %v688_v18 = vld [vmem:[%s11110_s0 + $0x1490] sm:$0xff] }
 0x175   :  { %v2991_v32 = vadd.f32 %v8766_v46, %v5687_v23  ;;  %3597 = vmatprep.mubr.bf16.mxu0 %v1114_v13  ;;  %v8926_v38 = vadd.f32 %v5796_v27, %v2988_v20  ;;  %v5799_v41 = vadd.f32 %v5798_v34, %v5797_v30  ;;  %v664_v46 = vld [vmem:[%s11110_s0 + $0x13d0] sm:$0xff]  ;;  %v1141_v23 = vpack.c.bf16 %v666_v1, %v641_v63  ;;  %v638_v27 = vld [vmem:[%s11110_s0 + $0x1300] sm:$0xff] }
 0x176   :  { %3751 = vmatmul.mubr.bf16.gmra.mrb[168].mxu1 %v1090_v26  ;;  %v1139_v61 = vpack.c.bf16 %v664_v46, %v639_v44  ;;  %v640_v44 = vld [vmem:[%s11110_s0 + $0x1310] sm:$0xff]  ;;  %v665_v46 = vld [vmem:[%s11110_s0 + $0x13d8] sm:$0xff] }
 0x177   :  { %v5816_v45 = vpop.f32.mrb[64].mxu0  ;;  %v8934_v47 = vadd.f32 %v5799_v41, %v2991_v32  ;;  %3758 = vmatprep.mubr.bf16.mxu1 %v1116_v31  ;;  %v689_v32 = vld [vmem:[%s11110_s0 + $0x1498] sm:$0xff] }
 0x178   :  { %v5817_v51 = vpop.f32.mrb[65].mxu0 }
 0x179   :  { %v5818_v58 = vadd.f32 %v5817_v51, %v5816_v45  ;;  %v5819_v59 = vpop.f32.mrb[66].mxu0  ;;  %v5928_v5 = vpop.f32.mrb[64].mxu1 }
 0x17a   :  { %v5820_v9 = vpop.f32.mrb[67].mxu0  ;;  %v5929_v16 = vpop.f32.mrb[65].mxu1 }
 0x17b   :  { %v3190_v12 = vadd.f32 %v5818_v58, %v8381_v10  ;;  %v5821_v13 = vadd.f32 %v5820_v9, %v5819_v59  ;;  %v5930_v19 = vadd.f32 %v5929_v16, %v5928_v5  ;;  %v5931_v20 = vpop.f32.mrb[66].mxu1  ;;  %v663_v10 = vld [vmem:[%s11110_s0 + $0x13c8] sm:$0xff]  ;;  %v1140_v5 = vpack.c.bf16 %v665_v46, %v640_v44  ;;  %v766_v44 = vld [vmem:[%s11110_s0 + $0x1700] sm:$0xff] }
 0x17c   :  { %3598 = vmatmul.mubr.bf16.gmra.mrb[172].mxu0 %v1113_v53  ;;  %v5932_v26 = vpop.f32.mrb[67].mxu1  ;;  %v1138_v41 = vpack.c.bf16 %v663_v10, %v638_v27 }
 0x17d   :  { %v3193_v25 = vadd.f32 %v5821_v13, %v8389_v15  ;;  %3605 = vmatprep.mubr.bf16.mxu0 %v1139_v61  ;;  %v8959_v30 = vadd.f32 %v5930_v19, %v3190_v12  ;;  %v5933_v31 = vadd.f32 %v5932_v26, %v5931_v20  ;;  %v714_v15 = vld [vmem:[%s11110_s0 + $0x1560] sm:$0xff]  ;;  %v1166_v13 = vpack.c.bf16 %v716_v56, %v691_v55  ;;  %v713_v19 = vld [vmem:[%s11110_s0 + $0x1558] sm:$0xff] }
 0x17e   :  { %3759 = vmatmul.mubr.bf16.gmra.mrb[172].mxu1 %v1115_v17  ;;  %v1164_v53 = vpack.c.bf16 %v714_v15, %v689_v32  ;;  %v1163_v10 = vpack.c.bf16 %v713_v19, %v688_v18  ;;  %v715_v32 = vld [vmem:[%s11110_s0 + $0x1568] sm:$0xff] }
 0x17f   :  { %v5822_v34 = vpop.f32.mrb[68].mxu0  ;;  %v8967_v35 = vadd.f32 %v5933_v31, %v3193_v25  ;;  %3766 = vmatprep.mubr.bf16.mxu1 %v1141_v23  ;;  %v739_v23 = vld [vmem:[%s11110_s0 + $0x1628] sm:$0xff]  ;;  %v690_v31 = vld [vmem:[%s11110_s0 + $0x14a0] sm:$0xff] }
 0x180   :  { %v5823_v36 = vpop.f32.mrb[69].mxu0  ;;  %v1165_v56 = vpack.c.bf16 %v715_v32, %v690_v31  ;;  %v816_v31 = vld [vmem:[%s11110_s0 + $0x1890] sm:$0xff] }
 0x181   :  { %v5824_v45 = vadd.f32 %v5823_v36, %v5822_v34  ;;  %v5825_v51 = vpop.f32.mrb[70].mxu0  ;;  %v5934_v58 = vpop.f32.mrb[68].mxu1 }
 0x182   :  { %v5826_v59 = vpop.f32.mrb[71].mxu0  ;;  %v5935_v1 = vpop.f32.mrb[69].mxu1 }
 0x183   :  { %v3198_v61 = vadd.f32 %v5824_v45, %v8414_v39  ;;  %v5827_v63 = vadd.f32 %v5826_v59, %v5825_v51  ;;  %v5936_v9 = vadd.f32 %v5935_v1, %v5934_v58  ;;  %v5937_v12 = vpop.f32.mrb[70].mxu1 }
 0x184   :  { %3606 = vmatmul.mubr.bf16.gmra.mrb[176].mxu0 %v1138_v41  ;;  %v5938_v17 = vpop.f32.mrb[71].mxu1  ;;  %v741_v41 = vld [vmem:[%s11110_s0 + $0x1638] sm:$0xff] }
 0x185   :  { %v3201_v16 = vadd.f32 %v5827_v63, %v8416_v42  ;;  %3613 = vmatprep.mubr.bf16.mxu0 %v1164_v53  ;;  %v8989_v39 = vadd.f32 %v5936_v9, %v3198_v61  ;;  %v5939_v20 = vadd.f32 %v5938_v17, %v5937_v12  ;;  %v764_v42 = vld [vmem:[%s11110_s0 + $0x16f0] sm:$0xff]  ;;  %v1191_v61 = vpack.c.bf16 %v766_v44, %v741_v41  ;;  %v763_v9 = vld [vmem:[%s11110_s0 + $0x16e8] sm:$0xff] }
 0x186   :  { %3767 = vmatmul.mubr.bf16.gmra.mrb[176].mxu1 %v1140_v5  ;;  %v1189_v36 = vpack.c.bf16 %v764_v42, %v739_v23  ;;  %v738_v5 = vld [vmem:[%s11110_s0 + $0x1620] sm:$0xff]  ;;  %v765_v23 = vld [vmem:[%s11110_s0 + $0x16f8] sm:$0xff] }
 0x187   :  { %v5828_v25 = vpop.f32.mrb[72].mxu0  ;;  %v8997_v26 = vadd.f32 %v5939_v20, %v3201_v16  ;;  %3774 = vmatprep.mubr.bf16.mxu1 %v1166_v13  ;;  %v789_v13 = vld [vmem:[%s11110_s0 + $0x17b8] sm:$0xff]  ;;  %v1188_v19 = vpack.c.bf16 %v763_v9, %v738_v5  ;;  %v740_v20 = vld [vmem:[%s11110_s0 + $0x1630] sm:$0xff] }
 0x188   :  { %v5829_v27 = vpop.f32.mrb[73].mxu0  ;;  %v1190_v44 = vpack.c.bf16 %v765_v23, %v740_v20  ;;  %v70_v20 = vld [vmem:[%s11110_s0 + $0x140] sm:$0xff] }
 0x189   :  { %v5830_v15 = vadd.f32 %v5829_v27, %v5828_v25  ;;  %v5831_v34 = vpop.f32.mrb[74].mxu0  ;;  %v5940_v46 = vpop.f32.mrb[72].mxu1 }
 0x18a   :  { %v5832_v45 = vpop.f32.mrb[75].mxu0  ;;  %v5941_v55 = vpop.f32.mrb[73].mxu1 }
 0x18b   :  { %v3206_v51 = vadd.f32 %v5830_v15, %v8441_v3  ;;  %v5833_v53 = vadd.f32 %v5832_v45, %v5831_v34  ;;  %v5942_v58 = vadd.f32 %v5941_v55, %v5940_v46  ;;  %v5943_v59 = vpop.f32.mrb[74].mxu1 }
 0x18c   :  { %3614 = vmatmul.mubr.bf16.gmra.mrb[180].mxu0 %v1163_v10  ;;  %v5944_v1 = vpop.f32.mrb[75].mxu1  ;;  %v791_v10 = vld [vmem:[%s11110_s0 + $0x17c8] sm:$0xff] }
 0x18d   :  { %v3209_v63 = vadd.f32 %v5833_v53, %v8449_v8  ;;  %3621 = vmatprep.mubr.bf16.mxu0 %v1189_v36  ;;  %v9019_v3 = vadd.f32 %v5942_v58, %v3206_v51  ;;  %v5945_v12 = vadd.f32 %v5944_v1, %v5943_v59  ;;  %v814_v8 = vld [vmem:[%s11110_s0 + $0x1880] sm:$0xff]  ;;  %v1216_v51 = vpack.c.bf16 %v816_v31, %v791_v10  ;;  %v813_v58 = vld [vmem:[%s11110_s0 + $0x1878] sm:$0xff] }
 0x18e   :  { %3775 = vmatmul.mubr.bf16.gmra.mrb[180].mxu1 %v1165_v56  ;;  %v1214_v27 = vpack.c.bf16 %v814_v8, %v789_v13  ;;  %v788_v56 = vld [vmem:[%s11110_s0 + $0x17b0] sm:$0xff]  ;;  %v815_v13 = vld [vmem:[%s11110_s0 + $0x1888] sm:$0xff] }
 0x18f   :  { %v5834_v16 = vpop.f32.mrb[76].mxu0  ;;  %v9027_v17 = vadd.f32 %v5945_v12, %v3209_v63  ;;  %3782 = vmatprep.mubr.bf16.mxu1 %v1191_v61  ;;  %v43_v61 = vld [vmem:[%s11110_s0 + $0x68] sm:$0xff]  ;;  %v1213_v9 = vpack.c.bf16 %v813_v58, %v788_v56  ;;  %v790_v12 = vld [vmem:[%s11110_s0 + $0x17c0] sm:$0xff] }
 0x190   :  { %v5835_v18 = vpop.f32.mrb[77].mxu0  ;;  %v1215_v31 = vpack.c.bf16 %v815_v13, %v790_v12  ;;  %v95_v12 = vld [vmem:[%s11110_s0 + $0x208] sm:$0xff]  ;;  %v120_v13 = vld [vmem:[%s11110_s0 + $0x2d0] sm:$0xff] }
 0x191   :  { %v5836_v42 = vadd.f32 %v5835_v18, %v5834_v16  ;;  %v5837_v25 = vpop.f32.mrb[78].mxu0  ;;  %v5946_v32 = vpop.f32.mrb[76].mxu1 }
 0x192   :  { %v5838_v15 = vpop.f32.mrb[79].mxu0  ;;  %v5947_v41 = vpop.f32.mrb[77].mxu1 }
 0x193   :  { %v3214_v34 = vadd.f32 %v5836_v42, %v8471_v33  ;;  %v5839_v36 = vadd.f32 %v5838_v15, %v5837_v25  ;;  %v5948_v46 = vadd.f32 %v5947_v41, %v5946_v32  ;;  %v5949_v45 = vpop.f32.mrb[78].mxu1 }
 0x194   :  { %3622 = vmatmul.mubr.bf16.gmra.mrb[184].mxu0 %v1188_v19  ;;  %v5950_v55 = vpop.f32.mrb[79].mxu1  ;;  %v45_v19 = vld [vmem:[%s11110_s0 + $0x78] sm:$0xff] }
 0x195   :  { %v3217_v53 = vadd.f32 %v5839_v36, %v8476_v37  ;;  %3629 = vmatprep.mubr.bf16.mxu0 %v1214_v27  ;;  %v9049_v33 = vadd.f32 %v5948_v46, %v3214_v34  ;;  %v5951_v59 = vadd.f32 %v5950_v55, %v5949_v45  ;;  %v68_v37 = vld [vmem:[%s11110_s0 + $0x130] sm:$0xff]  ;;  %v845_v34 = vpack.c.bf16 %v70_v20, %v45_v19  ;;  %v67_v46 = vld [vmem:[%s11110_s0 + $0x128] sm:$0xff] }
 0x196   :  { %3783 = vmatmul.mubr.bf16.gmra.mrb[184].mxu1 %v1190_v44  ;;  %v843_v18 = vpack.c.bf16 %v68_v37, %v43_v61  ;;  %v42_v44 = vld [vmem:[%s11110_s0 + $0x60] sm:$0xff]  ;;  %v69_v61 = vld [vmem:[%s11110_s0 + $0x138] sm:$0xff] }
 0x197   :  { %v5840_v63 = vpop.f32.mrb[80].mxu0  ;;  %v9057_v1 = vadd.f32 %v5951_v59, %v3217_v53  ;;  %3790 = vmatprep.mubr.bf16.mxu1 %v1216_v51  ;;  %v93_v51 = vld [vmem:[%s11110_s0 + $0x1f8] sm:$0xff]  ;;  %v842_v58 = vpack.c.bf16 %v67_v46, %v42_v44  ;;  %v44_v59 = vld [vmem:[%s11110_s0 + $0x70] sm:$0xff] }
 0x198   :  { %v5841_v5 = vpop.f32.mrb[81].mxu0 }
 0x199   :  { %v5842_v8 = vadd.f32 %v5841_v5, %v5840_v63  ;;  %v5843_v16 = vpop.f32.mrb[82].mxu0  ;;  %v5952_v23 = vpop.f32.mrb[80].mxu1  ;;  %v7243_v5 = vld [vmem:[%s11111_s1 + $0x400] sm:$0xff]  }
 0x19a   :  { %v5844_v42 = vpop.f32.mrb[83].mxu0  ;;  %v5953_v10 = vpop.f32.mrb[81].mxu1 }
 0x19b   :  { %v3222_v25 = vadd.f32 %v5842_v8, %v8501_v0  ;;  %v5845_v27 = vadd.f32 %v5844_v42, %v5843_v16  ;;  %v5954_v32 = vadd.f32 %v5953_v10, %v5952_v23  ;;  %v5955_v15 = vpop.f32.mrb[82].mxu1  ;;  %v844_v42 = vpack.c.bf16 %v69_v61, %v44_v59  ;;  %v92_v10 = vld [vmem:[%s11110_s0 + $0x1f0] sm:$0xff]  ;;  %v94_v59 = vld [vmem:[%s11110_s0 + $0x200] sm:$0xff]  ;;  %v119_v61 = vld [vmem:[%s11110_s0 + $0x2c8] sm:$0xff] }
 0x19c   :  { %3630 = vmatmul.mubr.bf16.gmra.mrb[188].mxu0 %v1213_v9  ;;  %v5956_v41 = vpop.f32.mrb[83].mxu1 }
 0x19d   :  { %v3225_v36 = vadd.f32 %v5845_v27, %v8509_v6  ;;  %3831 = vmatprep.mubr.bf16.mxu0 %v843_v18  ;;  %v9079_v0 = vadd.f32 %v5954_v32, %v3222_v25  ;;  %v5957_v45 = vadd.f32 %v5956_v41, %v5955_v15  ;;  %v118_v6 = vld [vmem:[%s11110_s0 + $0x2c0] sm:$0xff]  ;;  %v7244_v18 = vld [vmem:[%s11111_s1 + $0x448] sm:$0xff]  }
 0x19e   :  { %3791 = vmatmul.mubr.bf16.gmra.mrb[188].mxu1 %v1215_v31  ;;  %v868_v9 = vpack.c.bf16 %v118_v6, %v93_v51  ;;  %v870_v31 = vpack.c.bf16 %v120_v13, %v95_v12  ;;  %v7255_v32 = vld [vmem:[%s11111_s1 + $0x480] sm:$0xff]   ;;  %v7258_v41 = vld [vmem:[%s11111_s1 + $0x4c8] sm:$0xff]   ;;  %v7246_v51 = vld [vmem:[%s11111_s1 + $0x450] sm:$0xff]  }
 0x19f   :  { %v5846_v53 = vpop.f32.mrb[84].mxu0  ;;  %v9087_v55 = vadd.f32 %v5957_v45, %v3225_v36  ;;  %3992 = vmatprep.mubr.bf16.mxu1 %v845_v34  ;;  %v7245_v36 = vld [vmem:[%s11111_s1 + $0x408] sm:$0xff]   ;;  %v168_v45 = vld [vmem:[%s11110_s0 + $0x450] sm:$0xff]  ;;  %v145_v12 = vld [vmem:[%s11110_s0 + $0x398] sm:$0xff] }
 0x1a0   :  { %v5847_v56 = vpop.f32.mrb[85].mxu0  ;;  %v170_v13 = vld [vmem:[%s11110_s0 + $0x460] sm:$0xff] }
 0x1a1   :  { %v5848_v37 = vadd.f32 %v5847_v56, %v5846_v53  ;;  %v5849_v63 = vpop.f32.mrb[86].mxu0  ;;  %v5958_v8 = vpop.f32.mrb[84].mxu1 }
 0x1a2   :  { %v5850_v16 = vpop.f32.mrb[87].mxu0  ;;  %v5959_v23 = vpop.f32.mrb[85].mxu1 }
 0x1a3   :  { %v3230_v19 = vadd.f32 %v5848_v37, %v8552_v43  ;;  %v5851_v20 = vadd.f32 %v5850_v16, %v5849_v63  ;;  %v5960_v25 = vadd.f32 %v5959_v23, %v5958_v8  ;;  %v5961_v27 = vpop.f32.mrb[86].mxu1  ;;  %v117_v43 = vld [vmem:[%s11110_s0 + $0x2b8] sm:$0xff]  ;;  %v7259_v37 = vld [vmem:[%s11111_s1 + $0x488] sm:$0xff]   ;;  %v7247_v8 = vld [vmem:[%s11111_s1 + $0x410] sm:$0xff]  }
 0x1a4   :  { %3832 = vmatmul.mubr.bf16.vlgmr.msra.gmra.mrb[192].mxu0 %v842_v58  ;;  %v5962_v34 = vpop.f32.mrb[87].mxu1  ;;  %v867_v58 = vpack.c.bf16 %v117_v43, %v92_v10 }
 0x1a5   :  { %v3233_v15 = vadd.f32 %v5851_v20, %v8560_v49  ;;  %6473 = vmatpush3.bf16.msra.mxu0 %v7243_v5  ;;  %3839 = vmatprep.mubr.bf16.mxu0 %v868_v9  ;;  %v9124_v44 = vadd.f32 %v5960_v25, %v3230_v19  ;;  %v5963_v46 = vadd.f32 %v5962_v34, %v5961_v27  ;;  %v143_v49 = vld [vmem:[%s11110_s0 + $0x388] sm:$0xff]  ;;  %v7248_v19 = vld [vmem:[%s11111_s1 + $0x458] sm:$0xff]   ;;  %v7260_v20 = vld [vmem:[%s11111_s1 + $0x4d0] sm:$0xff]  }
 0x1a6   :  { %6474 = vmatprep.subr.bf16.mxu0 %v7244_v18  ;;  %3993 = vmatmul.mubr.bf16.vlgmr.msra.gmra.mrb[192].mxu1 %v844_v42  ;;  %v893_v9 = vpack.c.bf16 %v168_v45, %v143_v49  ;;  %v869_v27 = vpack.c.bf16 %v119_v61, %v94_v59  ;;  %v7261_v34 = vld [vmem:[%s11111_s1 + $0x490] sm:$0xff]  }
 0x1a7   :  { %v5852_v6 = vpop.f32.mrb[88].mxu0  ;;  %v9135_v53 = vadd.f32 %v5963_v46, %v3233_v15  ;;  %4000 = vmatprep.mubr.bf16.mxu1 %v870_v31  ;;  %6585 = vmatpush3.bf16.msra.mxu1 %v7255_v32  ;;  %v142_v32 = vld [vmem:[%s11110_s0 + $0x380] sm:$0xff]  ;;  %v895_v15 = vpack.c.bf16 %v170_v13, %v145_v12  ;;  %v7262_v46 = vld [vmem:[%s11111_s1 + $0x4d8] sm:$0xff]  }
 0x1a8   :  { %v5853_v56 = vpop.f32.mrb[89].mxu0  ;;  %6586 = vmatprep.subr.bf16.mxu1 %v7258_v41  ;;  %v7249_v41 = vld [vmem:[%s11111_s1 + $0x418] sm:$0xff]  }
 0x1a9   :  { %v5854_v63 = vadd.f32 %v5853_v56, %v5852_v6  ;;  %v5855_v5 = vpop.f32.mrb[90].mxu0  ;;  %6475 = vmatpush3.bf16.msra.mxu0 %v7245_v36  ;;  %v5964_v16 = vpop.f32.mrb[88].mxu1  ;;  %v7250_v6 = vld [vmem:[%s11111_s1 + $0x460] sm:$0xff]  }
 0x1aa   :  { %v5856_v18 = vpop.f32.mrb[91].mxu0  ;;  %6476 = vmatprep.subr.bf16.mxu0 %v7246_v51  ;;  %v5965_v25 = vpop.f32.mrb[89].mxu1  ;;  %v218_v51 = vld [vmem:[%s11110_s0 + $0x5e0] sm:$0xff] }
 0x1ab   :  { %v3238_v23 = vadd.f32 %v5854_v63, %v8606_v22  ;;  %v5857_v42 = vadd.f32 %v5856_v18, %v5855_v5  ;;  %v5966_v10 = vadd.f32 %v5965_v25, %v5964_v16  ;;  %v5967_v31 = vpop.f32.mrb[90].mxu1  ;;  %6587 = vmatpush3.bf16.msra.mxu1 %v7259_v37  ;;  %v167_v22 = vld [vmem:[%s11110_s0 + $0x448] sm:$0xff]  ;;  %v144_v37 = vld [vmem:[%s11110_s0 + $0x390] sm:$0xff]  ;;  %v169_v63 = vld [vmem:[%s11110_s0 + $0x458] sm:$0xff] }
 0x1ac   :  { %3840 = vmatmul.mubr.bf16.gmra.mrb[196].mxu0 %v867_v58  ;;  %v5968_v36 = vpop.f32.mrb[91].mxu1  ;;  %6588 = vmatprep.subr.bf16.mxu1 %v7260_v20  ;;  %v892_v61 = vpack.c.bf16 %v167_v22, %v142_v32  ;;  %v7263_v5 = vld [vmem:[%s11111_s1 + $0x498] sm:$0xff]   ;;  %v220_v16 = vld [vmem:[%s11110_s0 + $0x5f0] sm:$0xff]  ;;  %v7251_v18 = vld [vmem:[%s11111_s1 + $0x420] sm:$0xff]  }
 0x1ad   :  { %v3241_v43 = vadd.f32 %v5857_v42, %v8617_v28  ;;  %3847 = vmatprep.mubr.bf16.mxu0 %v893_v9  ;;  %6477 = vmatpush3.bf16.msra.mxu0 %v7247_v8  ;;  %v9178_v49 = vadd.f32 %v5966_v10, %v3238_v23  ;;  %v5969_v45 = vadd.f32 %v5968_v36, %v5967_v31  ;;  %v193_v28 = vld [vmem:[%s11110_s0 + $0x518] sm:$0xff]  ;;  %v195_v8 = vld [vmem:[%s11110_s0 + $0x528] sm:$0xff]  ;;  %v7266_v42 = vld [vmem:[%s11111_s1 + $0x4e0] sm:$0xff]  }
 0x1ae   :  { %6478 = vmatprep.subr.bf16.mxu0 %v7248_v19  ;;  %4001 = vmatmul.mubr.bf16.gmra.mrb[196].mxu1 %v869_v27  ;;  %v918_v13 = vpack.c.bf16 %v218_v51, %v193_v28  ;;  %v7252_v23 = vld [vmem:[%s11111_s1 + $0x468] sm:$0xff]   ;;  %v894_v31 = vpack.c.bf16 %v169_v63, %v144_v37  ;;  %v7267_v36 = vld [vmem:[%s11111_s1 + $0x4a0] sm:$0xff]  }
 0x1af   :  { %v5858_v56 = vpop.f32.mrb[92].mxu0  ;;  %v9189_v58 = vadd.f32 %v5969_v45, %v3241_v43  ;;  %4008 = vmatprep.mubr.bf16.mxu1 %v895_v15  ;;  %6589 = vmatpush3.bf16.msra.mxu1 %v7261_v34  ;;  %v192_v34 = vld [vmem:[%s11110_s0 + $0x510] sm:$0xff]  ;;  %v920_v43 = vpack.c.bf16 %v220_v16, %v195_v8  ;;  %v7268_v45 = vld [vmem:[%s11111_s1 + $0x4e8] sm:$0xff]  }
 0x1b0   :  { %v5859_v59 = vpop.f32.mrb[93].mxu0  ;;  %6590 = vmatprep.subr.bf16.mxu1 %v7262_v46  ;;  %v7253_v46 = vld [vmem:[%s11111_s1 + $0x428] sm:$0xff]  }
 0x1b1   :  { %v5860_v9 = vadd.f32 %v5859_v59, %v5858_v56  ;;  %v5861_v12 = vpop.f32.mrb[94].mxu0  ;;  %6479 = vmatpush3.bf16.msra.mxu0 %v7249_v41  ;;  %v5970_v19 = vpop.f32.mrb[92].mxu1  ;;  %v7256_v56 = vld [vmem:[%s11111_s1 + $0x470] sm:$0xff]  }
 0x1b2   :  { %v5862_v20 = vpop.f32.mrb[95].mxu0  ;;  %6480 = vmatprep.subr.bf16.mxu0 %v7250_v6  ;;  %v5971_v10 = vpop.f32.mrb[93].mxu1  ;;  %v268_v6 = vld [vmem:[%s11110_s0 + $0x770] sm:$0xff] }
 0x1b3   :  { %v3246_v25 = vadd.f32 %v5860_v9, %v8660_v2  ;;  %v5863_v27 = vadd.f32 %v5862_v20, %v5861_v12  ;;  %v5972_v32 = vadd.f32 %v5971_v10, %v5970_v19  ;;  %v5973_v15 = vpop.f32.mrb[94].mxu1  ;;  %6591 = vmatpush3.bf16.msra.mxu1 %v7263_v5  ;;  %v217_v2 = vld [vmem:[%s11110_s0 + $0x5d8] sm:$0xff]  ;;  %v194_v5 = vld [vmem:[%s11110_s0 + $0x520] sm:$0xff]  ;;  %v219_v9 = vld [vmem:[%s11110_s0 + $0x5e8] sm:$0xff] }
 0x1b4   :  { %3848 = vmatmul.mubr.bf16.gmra.mrb[200].mxu0 %v892_v61  ;;  %v5974_v41 = vpop.f32.mrb[95].mxu1  ;;  %6592 = vmatprep.subr.bf16.mxu1 %v7266_v42  ;;  %v917_v63 = vpack.c.bf16 %v217_v2, %v192_v34  ;;  %v7269_v12 = vld [vmem:[%s11111_s1 + $0x4a8] sm:$0xff]   ;;  %v270_v19 = vld [vmem:[%s11110_s0 + $0x780] sm:$0xff]  ;;  %v7257_v20 = vld [vmem:[%s11111_s1 + $0x430] sm:$0xff]  }
 0x1b5   :  { %v3249_v22 = vadd.f32 %v5863_v27, %v8668_v11  ;;  %3855 = vmatprep.mubr.bf16.mxu0 %v918_v13  ;;  %6481 = vmatpush3.bf16.msra.mxu0 %v7251_v18  ;;  %v9232_v28 = vadd.f32 %v5972_v32, %v3246_v25  ;;  %v5975_v51 = vadd.f32 %v5974_v41, %v5973_v15  ;;  %v243_v11 = vld [vmem:[%s11110_s0 + $0x6a8] sm:$0xff]  ;;  %v245_v18 = vld [vmem:[%s11110_s0 + $0x6b8] sm:$0xff]  ;;  %v7270_v27 = vld [vmem:[%s11111_s1 + $0x4f0] sm:$0xff]  }
 0x1b6   :  { %6482 = vmatprep.subr.bf16.mxu0 %v7252_v23  ;;  %4009 = vmatmul.mubr.bf16.gmra.mrb[200].mxu1 %v894_v31  ;;  %v943_v16 = vpack.c.bf16 %v268_v6, %v243_v11  ;;  %v7264_v25 = vld [vmem:[%s11111_s1 + $0x478] sm:$0xff]   ;;  %v919_v15 = vpack.c.bf16 %v219_v9, %v194_v5  ;;  %v7271_v41 = vld [vmem:[%s11111_s1 + $0x4b0] sm:$0xff]  }
 0x1b7   :  { %v5864_v59 = vpop.f32.mrb[96].mxu0  ;;  %v9243_v61 = vadd.f32 %v5975_v51, %v3249_v22  ;;  %4016 = vmatprep.mubr.bf16.mxu1 %v920_v43  ;;  %6593 = vmatpush3.bf16.msra.mxu1 %v7267_v36  ;;  %v242_v36 = vld [vmem:[%s11110_s0 + $0x6a0] sm:$0xff]  ;;  %v945_v22 = vpack.c.bf16 %v270_v19, %v245_v18  ;;  %v7272_v51 = vld [vmem:[%s11111_s1 + $0x4f8] sm:$0xff]   ;;  %v244_v9 = vld [vmem:[%s11110_s0 + $0x6b0] sm:$0xff] }
 0x1b8   :  { %v5865_v37 = vpop.f32.mrb[97].mxu0  ;;  %6594 = vmatprep.subr.bf16.mxu1 %v7268_v45  ;;  %v7265_v45 = vld [vmem:[%s11111_s1 + $0x438] sm:$0xff]  }
 0x1b9   :  { %v5866_v13 = vadd.f32 %v5865_v37, %v5864_v59  ;;  %v5867_v8 = vpop.f32.mrb[98].mxu0  ;;  %6483 = vmatpush3.bf16.msra.mxu0 %v7253_v46  ;;  %v5976_v23 = vpop.f32.mrb[96].mxu1  ;;  %v7274_v59 = vld [vmem:[%s11111_s1 + $0x540] sm:$0xff]  }
 0x1ba   :  { %v5868_v42 = vpop.f32.mrb[99].mxu0  ;;  %6484 = vmatprep.subr.bf16.mxu0 %v7256_v56  ;;  %v5977_v32 = vpop.f32.mrb[97].mxu1  ;;  %v318_v56 = vld [vmem:[%s11110_s0 + $0x900] sm:$0xff] }
 0x1bb   :  { %v3254_v10 = vadd.f32 %v5866_v13, %v8714_v52  ;;  %v5869_v31 = vadd.f32 %v5868_v42, %v5867_v8  ;;  %v5978_v34 = vadd.f32 %v5977_v32, %v5976_v23  ;;  %v5979_v43 = vpop.f32.mrb[98].mxu1  ;;  %6595 = vmatpush3.bf16.msra.mxu1 %v7269_v12  ;;  %v267_v52 = vld [vmem:[%s11110_s0 + $0x768] sm:$0xff]  ;;  %v269_v12 = vld [vmem:[%s11110_s0 + $0x778] sm:$0xff]  ;;  %v320_v23 = vld [vmem:[%s11110_s0 + $0x910] sm:$0xff] }
 0x1bc   :  { %3856 = vmatmul.mubr.bf16.gmra.mrb[204].mxu0 %v917_v63  ;;  %v5980_v46 = vpop.f32.mrb[99].mxu1  ;;  %6596 = vmatprep.subr.bf16.mxu1 %v7270_v27  ;;  %v942_v5 = vpack.c.bf16 %v267_v52, %v242_v36  ;;  %v7273_v13 = vld [vmem:[%s11111_s1 + $0x4b8] sm:$0xff]   ;;  %v944_v32 = vpack.c.bf16 %v269_v12, %v244_v9  ;;  %v368_v52 = vld [vmem:[%s11110_s0 + $0xa90] sm:$0xff]  ;;  %v370_v12 = vld [vmem:[%s11110_s0 + $0xaa0] sm:$0xff] }
 0x1bd   :  { %v3257_v2 = vadd.f32 %v5869_v31, %v8722_v57  ;;  %3863 = vmatprep.mubr.bf16.mxu0 %v943_v16  ;;  %6485 = vmatpush3.bf16.msra.mxu0 %v7257_v20  ;;  %v9286_v11 = vadd.f32 %v5978_v34, %v3254_v10  ;;  %v5981_v6 = vadd.f32 %v5980_v46, %v5979_v43  ;;  %v293_v57 = vld [vmem:[%s11110_s0 + $0x838] sm:$0xff]  ;;  %v295_v20 = vld [vmem:[%s11110_s0 + $0x848] sm:$0xff] }
 0x1be   :  { %6486 = vmatprep.subr.bf16.mxu0 %v7264_v25  ;;  %4017 = vmatmul.mubr.bf16.gmra.mrb[204].mxu1 %v919_v15  ;;  %v968_v19 = vpack.c.bf16 %v318_v56, %v293_v57  ;;  %v970_v43 = vpack.c.bf16 %v320_v23, %v295_v20  ;;  %v343_v46 = vld [vmem:[%s11110_s0 + $0x9c8] sm:$0xff]  ;;  %v294_v57 = vld [vmem:[%s11110_s0 + $0x840] sm:$0xff]  ;;  %v345_v9 = vld [vmem:[%s11110_s0 + $0x9d8] sm:$0xff] }
 0x1bf   :  { %v5870_v37 = vpop.f32.mrb[100].mxu0  ;;  %4024 = vmatprep.mubr.bf16.mxu1 %v945_v22  ;;  %6597 = vmatpush3.bf16.msra.mxu1 %v7271_v41  ;;  %v9306_v8 = vadd.f32 %v5981_v6, %v3257_v2  ;;  %v292_v41 = vld [vmem:[%s11110_s0 + $0x830] sm:$0xff]  ;;  %v319_v56 = vld [vmem:[%s11110_s0 + $0x908] sm:$0xff] }
 0x1c0   :  { %v5871_v63 = vpop.f32.mrb[101].mxu0  ;;  %6598 = vmatprep.subr.bf16.mxu1 %v7272_v51  ;;  %v969_v23 = vpack.c.bf16 %v319_v56, %v294_v57  ;;  %v420_v57 = vld [vmem:[%s11110_s0 + $0xc30] sm:$0xff] }
 0x1c1   :  { %v5872_v16 = vadd.f32 %v5871_v63, %v5870_v37  ;;  %v5873_v18 = vpop.f32.mrb[102].mxu0  ;;  %6487 = vmatpush3.bf16.msra.mxu0 %v7265_v45  ;;  %v5982_v42 = vpop.f32.mrb[100].mxu1 }
 0x1c2   :  { %v5874_v25 = vpop.f32.mrb[103].mxu0  ;;  %6696 = vmatprep.subr.bf16.mxu0 %v7274_v59  ;;  %v5983_v31 = vpop.f32.mrb[101].mxu1 }
 0x1c3   :  { %v3262_v27 = vadd.f32 %v5872_v16, %v8741_v24  ;;  %v5875_v10 = vadd.f32 %v5874_v25, %v5873_v18  ;;  %v5984_v15 = vadd.f32 %v5983_v31, %v5982_v42  ;;  %v5985_v34 = vpop.f32.mrb[102].mxu1  ;;  %6599 = vmatpush3.bf16.msra.mxu1 %v7273_v13  ;;  %v317_v24 = vld [vmem:[%s11110_s0 + $0x8f8] sm:$0xff] }
 0x1c4   :  { %3864 = vmatmul.mubr.bf16.gmra.mrb[208].mxu0 %v942_v5  ;;  %v5986_v22 = vpop.f32.mrb[103].mxu1  ;;  %v967_v6 = vpack.c.bf16 %v317_v24, %v292_v41  ;;  %v993_v5 = vpack.c.bf16 %v368_v52, %v343_v46  ;;  %v344_v24 = vld [vmem:[%s11110_s0 + $0x9d0] sm:$0xff] }
 0x1c5   :  { %v3265_v36 = vadd.f32 %v5875_v10, %v8749_v48  ;;  %3871 = vmatprep.mubr.bf16.mxu0 %v968_v19  ;;  %v5987_v2 = vadd.f32 %v5986_v22, %v5985_v34  ;;  %v9328_v48 = vadd.f32 %v5984_v15, %v3262_v27  ;;  %v995_v27 = vpack.c.bf16 %v370_v12, %v345_v9  ;;  %v367_v15 = vld [vmem:[%s11110_s0 + $0xa88] sm:$0xff]  ;;  %v393_v34 = vld [vmem:[%s11110_s0 + $0xb58] sm:$0xff] }
 0x1c6   :  { %4025 = vmatmul.mubr.bf16.gmra.mrb[208].mxu1 %v944_v32  ;;  %v342_v32 = vld [vmem:[%s11110_s0 + $0x9c0] sm:$0xff] }
 0x1c7   :  { %v5876_v45 = vpop.f32.mrb[104].mxu0  ;;  %4032 = vmatprep.mubr.bf16.mxu1 %v970_v43  ;;  %v9336_v59 = vadd.f32 %v5987_v2, %v3265_v36  ;;  %v418_v43 = vld [vmem:[%s11110_s0 + $0xc20] sm:$0xff]  ;;  %v992_v41 = vpack.c.bf16 %v367_v15, %v342_v32  ;;  %v369_v2 = vld [vmem:[%s11110_s0 + $0xa98] sm:$0xff] }
 0x1c8   :  { %v5877_v51 = vpop.f32.mrb[105].mxu0  ;;  %v994_v12 = vpack.c.bf16 %v369_v2, %v344_v24  ;;  %v394_v15 = vld [vmem:[%s11110_s0 + $0xb60] sm:$0xff] }
 0x1c9   :  { %v5878_v37 = vadd.f32 %v5877_v51, %v5876_v45  ;;  %v5879_v63 = vpop.f32.mrb[106].mxu0  ;;  %v5988_v13 = vpop.f32.mrb[104].mxu1  ;;  %v1018_v51 = vpack.c.bf16 %v418_v43, %v393_v34  ;;  %v470_v24 = vld [vmem:[%s11110_s0 + $0xdc0] sm:$0xff] }
 0x1ca   :  { %v5880_v16 = vpop.f32.mrb[107].mxu0  ;;  %v5989_v20 = vpop.f32.mrb[105].mxu1 }
 0x1cb   :  { %v3270_v18 = vadd.f32 %v5878_v37, %v8776_v62  ;;  %v5881_v19 = vadd.f32 %v5880_v16, %v5879_v63  ;;  %v5990_v42 = vadd.f32 %v5989_v20, %v5988_v13  ;;  %v5991_v25 = vpop.f32.mrb[106].mxu1 }
 0x1cc   :  { %3872 = vmatmul.mubr.bf16.gmra.mrb[212].mxu0 %v967_v6  ;;  %v5992_v31 = vpop.f32.mrb[107].mxu1  ;;  %v395_v6 = vld [vmem:[%s11110_s0 + $0xb68] sm:$0xff] }
 0x1cd   :  { %v3273_v10 = vadd.f32 %v5881_v19, %v8784_v7  ;;  %3879 = vmatprep.mubr.bf16.mxu0 %v993_v5  ;;  %v5993_v62 = vadd.f32 %v5992_v31, %v5991_v25  ;;  %v9358_v7 = vadd.f32 %v5990_v42, %v3270_v18  ;;  %v1020_v18 = vpack.c.bf16 %v420_v57, %v395_v6  ;;  %v417_v42 = vld [vmem:[%s11110_s0 + $0xc18] sm:$0xff]  ;;  %v443_v25 = vld [vmem:[%s11110_s0 + $0xce8] sm:$0xff] }
 0x1ce   :  { %4033 = vmatmul.mubr.bf16.gmra.mrb[212].mxu1 %v969_v23  ;;  %v392_v23 = vld [vmem:[%s11110_s0 + $0xb50] sm:$0xff] }
 0x1cf   :  { %v5882_v36 = vpop.f32.mrb[108].mxu0  ;;  %4040 = vmatprep.mubr.bf16.mxu1 %v995_v27  ;;  %v9366_v46 = vadd.f32 %v5993_v62, %v3273_v10  ;;  %v468_v27 = vld [vmem:[%s11110_s0 + $0xdb0] sm:$0xff]  ;;  %v1017_v32 = vpack.c.bf16 %v417_v42, %v392_v23  ;;  %v419_v62 = vld [vmem:[%s11110_s0 + $0xc28] sm:$0xff] }
 0x1d0   :  { %v5883_v22 = vpop.f32.mrb[109].mxu0  ;;  %v1019_v57 = vpack.c.bf16 %v419_v62, %v394_v15  ;;  %v444_v42 = vld [vmem:[%s11110_s0 + $0xcf0] sm:$0xff] }
 0x1d1   :  { %v5884_v52 = vadd.f32 %v5883_v22, %v5882_v36  ;;  %v5885_v45 = vpop.f32.mrb[110].mxu0  ;;  %v5994_v56 = vpop.f32.mrb[108].mxu1  ;;  %v1043_v22 = vpack.c.bf16 %v468_v27, %v443_v25  ;;  %v520_v15 = vld [vmem:[%s11110_s0 + $0xf50] sm:$0xff] }
 0x1d2   :  { %v5886_v37 = vpop.f32.mrb[111].mxu0  ;;  %v5995_v9 = vpop.f32.mrb[109].mxu1 }
 0x1d3   :  { %v3278_v63 = vadd.f32 %v5884_v52, %v8806_v40  ;;  %v5887_v5 = vadd.f32 %v5886_v37, %v5885_v45  ;;  %v5996_v13 = vadd.f32 %v5995_v9, %v5994_v56  ;;  %v5997_v16 = vpop.f32.mrb[110].mxu1 }
 0x1d4   :  { %3880 = vmatmul.mubr.bf16.gmra.mrb[216].mxu0 %v992_v41  ;;  %v5998_v20 = vpop.f32.mrb[111].mxu1  ;;  %v445_v41 = vld [vmem:[%s11110_s0 + $0xcf8] sm:$0xff] }
 0x1d5   :  { %v3281_v19 = vadd.f32 %v5887_v5, %v8814_v50  ;;  %3887 = vmatprep.mubr.bf16.mxu0 %v1018_v51  ;;  %v5999_v40 = vadd.f32 %v5998_v20, %v5997_v16  ;;  %v9388_v50 = vadd.f32 %v5996_v13, %v3278_v63  ;;  %v1045_v63 = vpack.c.bf16 %v470_v24, %v445_v41  ;;  %v467_v13 = vld [vmem:[%s11110_s0 + $0xda8] sm:$0xff]  ;;  %v493_v16 = vld [vmem:[%s11110_s0 + $0xe78] sm:$0xff] }
 0x1d6   :  { %4041 = vmatmul.mubr.bf16.gmra.mrb[216].mxu1 %v994_v12  ;;  %v442_v12 = vld [vmem:[%s11110_s0 + $0xce0] sm:$0xff] }
 0x1d7   :  { %v5888_v10 = vpop.f32.mrb[112].mxu0  ;;  %4048 = vmatprep.mubr.bf16.mxu1 %v1020_v18  ;;  %v9396_v34 = vadd.f32 %v5999_v40, %v3281_v19  ;;  %v518_v18 = vld [vmem:[%s11110_s0 + $0xf40] sm:$0xff]  ;;  %v1042_v23 = vpack.c.bf16 %v467_v13, %v442_v12  ;;  %v469_v40 = vld [vmem:[%s11110_s0 + $0xdb8] sm:$0xff] }
 0x1d8   :  { %v5889_v31 = vpop.f32.mrb[113].mxu0  ;;  %v1044_v24 = vpack.c.bf16 %v469_v40, %v444_v42  ;;  %v494_v13 = vld [vmem:[%s11110_s0 + $0xe80] sm:$0xff] }
 0x1d9   :  { %v5890_v43 = vadd.f32 %v5889_v31, %v5888_v10  ;;  %v5891_v36 = vpop.f32.mrb[114].mxu0  ;;  %v6000_v2 = vpop.f32.mrb[112].mxu1  ;;  %v1068_v31 = vpack.c.bf16 %v518_v18, %v493_v16  ;;  %v570_v42 = vld [vmem:[%s11110_s0 + $0x10e0] sm:$0xff] }
 0x1da   :  { %v5892_v52 = vpop.f32.mrb[115].mxu0  ;;  %v6001_v6 = vpop.f32.mrb[113].mxu1 }
 0x1db   :  { %v3286_v45 = vadd.f32 %v5890_v43, %v8836_v21  ;;  %v5893_v51 = vadd.f32 %v5892_v52, %v5891_v36  ;;  %v6002_v56 = vadd.f32 %v6001_v6, %v6000_v2  ;;  %v6003_v37 = vpop.f32.mrb[114].mxu1 }
 0x1dc   :  { %3888 = vmatmul.mubr.bf16.gmra.mrb[220].mxu0 %v1017_v32  ;;  %v6004_v9 = vpop.f32.mrb[115].mxu1  ;;  %v495_v32 = vld [vmem:[%s11110_s0 + $0xe88] sm:$0xff] }
 0x1dd   :  { %v3289_v5 = vadd.f32 %v5893_v51, %v8844_v29  ;;  %3895 = vmatprep.mubr.bf16.mxu0 %v1043_v22  ;;  %v6005_v21 = vadd.f32 %v6004_v9, %v6003_v37  ;;  %v9418_v29 = vadd.f32 %v6002_v56, %v3286_v45  ;;  %v1070_v45 = vpack.c.bf16 %v520_v15, %v495_v32  ;;  %v517_v56 = vld [vmem:[%s11110_s0 + $0xf38] sm:$0xff]  ;;  %v543_v37 = vld [vmem:[%s11110_s0 + $0x1008] sm:$0xff] }
 0x1de   :  { %4049 = vmatmul.mubr.bf16.gmra.mrb[220].mxu1 %v1019_v57  ;;  %v492_v57 = vld [vmem:[%s11110_s0 + $0xe70] sm:$0xff] }
 0x1df   :  { %v5894_v19 = vpop.f32.mrb[116].mxu0  ;;  %4056 = vmatprep.mubr.bf16.mxu1 %v1045_v63  ;;  %v9426_v25 = vadd.f32 %v6005_v21, %v3289_v5  ;;  %v568_v63 = vld [vmem:[%s11110_s0 + $0x10d0] sm:$0xff]  ;;  %v1067_v12 = vpack.c.bf16 %v517_v56, %v492_v57  ;;  %v519_v21 = vld [vmem:[%s11110_s0 + $0xf48] sm:$0xff] }
 0x1e0   :  { %v5895_v20 = vpop.f32.mrb[117].mxu0  ;;  %v1069_v15 = vpack.c.bf16 %v519_v21, %v494_v13  ;;  %v544_v56 = vld [vmem:[%s11110_s0 + $0x1010] sm:$0xff] }
 0x1e1   :  { %v5896_v27 = vadd.f32 %v5895_v20, %v5894_v19  ;;  %v5897_v10 = vpop.f32.mrb[118].mxu0  ;;  %v6006_v62 = vpop.f32.mrb[116].mxu1  ;;  %v1093_v20 = vpack.c.bf16 %v568_v63, %v543_v37  ;;  %v620_v13 = vld [vmem:[%s11110_s0 + $0x1270] sm:$0xff] }
 0x1e2   :  { %v5898_v43 = vpop.f32.mrb[119].mxu0  ;;  %v6007_v41 = vpop.f32.mrb[117].mxu1 }
 0x1e3   :  { %v3294_v36 = vadd.f32 %v5896_v27, %v8866_v4  ;;  %v5899_v22 = vadd.f32 %v5898_v43, %v5897_v10  ;;  %v6008_v2 = vadd.f32 %v6007_v41, %v6006_v62  ;;  %v6009_v52 = vpop.f32.mrb[118].mxu1 }
 0x1e4   :  { %3896 = vmatmul.mubr.bf16.gmra.mrb[224].mxu0 %v1042_v23  ;;  %v6010_v6 = vpop.f32.mrb[119].mxu1  ;;  %v545_v23 = vld [vmem:[%s11110_s0 + $0x1018] sm:$0xff] }
 0x1e5   :  { %v3297_v51 = vadd.f32 %v5899_v22, %v8874_v14  ;;  %3903 = vmatprep.mubr.bf16.mxu0 %v1068_v31  ;;  %v6011_v4 = vadd.f32 %v6010_v6, %v6009_v52  ;;  %v9448_v14 = vadd.f32 %v6008_v2, %v3294_v36  ;;  %v1095_v36 = vpack.c.bf16 %v570_v42, %v545_v23  ;;  %v567_v2 = vld [vmem:[%s11110_s0 + $0x10c8] sm:$0xff]  ;;  %v593_v52 = vld [vmem:[%s11110_s0 + $0x1198] sm:$0xff] }
 0x1e6   :  { %4057 = vmatmul.mubr.bf16.gmra.mrb[224].mxu1 %v1044_v24  ;;  %v542_v24 = vld [vmem:[%s11110_s0 + $0x1000] sm:$0xff] }
 0x1e7   :  { %v5900_v5 = vpop.f32.mrb[120].mxu0  ;;  %4064 = vmatprep.mubr.bf16.mxu1 %v1070_v45  ;;  %v9456_v16 = vadd.f32 %v6011_v4, %v3297_v51  ;;  %v618_v45 = vld [vmem:[%s11110_s0 + $0x1260] sm:$0xff]  ;;  %v1092_v57 = vpack.c.bf16 %v567_v2, %v542_v24  ;;  %v569_v4 = vld [vmem:[%s11110_s0 + $0x10d8] sm:$0xff] }
 0x1e8   :  { %v5901_v9 = vpop.f32.mrb[121].mxu0  ;;  %v1094_v42 = vpack.c.bf16 %v569_v4, %v544_v56  ;;  %v594_v2 = vld [vmem:[%s11110_s0 + $0x11a0] sm:$0xff] }
 0x1e9   :  { %v5902_v18 = vadd.f32 %v5901_v9, %v5900_v5  ;;  %v5903_v19 = vpop.f32.mrb[122].mxu0  ;;  %v6012_v40 = vpop.f32.mrb[120].mxu1  ;;  %v1118_v9 = vpack.c.bf16 %v618_v45, %v593_v52  ;;  %v670_v56 = vld [vmem:[%s11110_s0 + $0x1400] sm:$0xff] }
 0x1ea   :  { %v5904_v27 = vpop.f32.mrb[123].mxu0  ;;  %v6013_v32 = vpop.f32.mrb[121].mxu1 }
 0x1eb   :  { %v3302_v10 = vadd.f32 %v5902_v18, %v8896_v54  ;;  %v5905_v31 = vadd.f32 %v5904_v27, %v5903_v19  ;;  %v6014_v62 = vadd.f32 %v6013_v32, %v6012_v40  ;;  %v6015_v43 = vpop.f32.mrb[122].mxu1 }
 0x1ec   :  { %3904 = vmatmul.mubr.bf16.gmra.mrb[228].mxu0 %v1067_v12  ;;  %v6016_v41 = vpop.f32.mrb[123].mxu1  ;;  %v595_v12 = vld [vmem:[%s11110_s0 + $0x11a8] sm:$0xff] }
 0x1ed   :  { %v3305_v22 = vadd.f32 %v5905_v31, %v8904_v60  ;;  %3911 = vmatprep.mubr.bf16.mxu0 %v1093_v20  ;;  %v6017_v54 = vadd.f32 %v6016_v41, %v6015_v43  ;;  %v9478_v60 = vadd.f32 %v6014_v62, %v3302_v10  ;;  %v1120_v10 = vpack.c.bf16 %v620_v13, %v595_v12  ;;  %v617_v62 = vld [vmem:[%s11110_s0 + $0x1258] sm:$0xff]  ;;  %v643_v43 = vld [vmem:[%s11110_s0 + $0x1328] sm:$0xff] }
 0x1ee   :  { %4065 = vmatmul.mubr.bf16.gmra.mrb[228].mxu1 %v1069_v15  ;;  %v592_v15 = vld [vmem:[%s11110_s0 + $0x1190] sm:$0xff] }
 0x1ef   :  { %v5906_v51 = vpop.f32.mrb[124].mxu0  ;;  %4072 = vmatprep.mubr.bf16.mxu1 %v1095_v36  ;;  %v9486_v37 = vadd.f32 %v6017_v54, %v3305_v22  ;;  %v668_v36 = vld [vmem:[%s11110_s0 + $0x13f0] sm:$0xff]  ;;  %v1117_v24 = vpack.c.bf16 %v617_v62, %v592_v15  ;;  %v619_v54 = vld [vmem:[%s11110_s0 + $0x1268] sm:$0xff] }
 0x1f0   :  { %v5907_v6 = vpop.f32.mrb[125].mxu0  ;;  %v1119_v13 = vpack.c.bf16 %v619_v54, %v594_v2  ;;  %v695_v2 = vld [vmem:[%s11110_s0 + $0x14c8] sm:$0xff]  ;;  %v720_v54 = vld [vmem:[%s11110_s0 + $0x1590] sm:$0xff] }
 0x1f1   :  { %v5908_v63 = vadd.f32 %v5907_v6, %v5906_v51  ;;  %v5909_v5 = vpop.f32.mrb[126].mxu0  ;;  %v6018_v21 = vpop.f32.mrb[124].mxu1  ;;  %v1143_v6 = vpack.c.bf16 %v668_v36, %v643_v43  ;;  %v669_v43 = vld [vmem:[%s11110_s0 + $0x13f8] sm:$0xff] }
 0x1f2   :  { %v5910_v18 = vpop.f32.mrb[127].mxu0  ;;  %v6019_v23 = vpop.f32.mrb[125].mxu1 }
 0x1f3   :  { %v3310_v19 = vadd.f32 %v5908_v63, %v8926_v38  ;;  %v5911_v20 = vadd.f32 %v5910_v18, %v5909_v5  ;;  %v6020_v40 = vadd.f32 %v6019_v23, %v6018_v21  ;;  %v6021_v27 = vpop.f32.mrb[126].mxu1  ;;  %v7286_v21 = vld [vmem:[%s11111_s1 + $0x5c0] sm:$0xff]  }
 0x1f4   :  { %3912 = vmatmul.mubr.bf16.gmra.mrb[232].mxu0 %v1092_v57  ;;  %v6022_v32 = vpop.f32.mrb[127].mxu1  ;;  %v645_v57 = vld [vmem:[%s11110_s0 + $0x1338] sm:$0xff]  ;;  %6808 = vmatprep.subr.bf16.mxu1 %v7286_v21  ;;  %v692_v21 = vld [vmem:[%s11110_s0 + $0x14b0] sm:$0xff] }
 0x1f5   :  { %v3313_v31 = vadd.f32 %v5911_v20, %v8934_v47  ;;  %3919 = vmatprep.mubr.bf16.mxu0 %v1118_v9  ;;  %v6023_v38 = vadd.f32 %v6022_v32, %v6021_v27  ;;  %v9508_v47 = vadd.f32 %v6020_v40, %v3310_v19  ;;  %v1145_v20 = vpack.c.bf16 %v670_v56, %v645_v57  ;;  %v642_v40 = vld [vmem:[%s11110_s0 + $0x1320] sm:$0xff] }
 0x1f6   :  { %4073 = vmatmul.mubr.bf16.gmra.mrb[232].mxu1 %v1094_v42 }
 0x1f7   :  { %v6040_v22 = vpop.f32.mrb[128].mxu0  ;;  %4080 = vmatprep.mubr.bf16.mxu1 %v1120_v10  ;;  %v9516_v52 = vadd.f32 %v6023_v38, %v3313_v31  ;;  %v693_v10 = vld [vmem:[%s11110_s0 + $0x14b8] sm:$0xff]  ;;  %v644_v38 = vld [vmem:[%s11110_s0 + $0x1330] sm:$0xff] }
 0x1f8   :  { %v6041_v41 = vpop.f32.mrb[129].mxu0 }
 0x1f9   :  { %v6042_v45 = vadd.f32 %v6041_v41, %v6040_v22  ;;  %v6043_v51 = vpop.f32.mrb[130].mxu0  ;;  %v6152_v4 = vpop.f32.mrb[128].mxu1 }
 0x1fa   :  { %v6044_v63 = vpop.f32.mrb[131].mxu0  ;;  %v6153_v12 = vpop.f32.mrb[129].mxu1 }
 0x1fb   :  { %v3512_v5 = vadd.f32 %v6042_v45, %v8959_v30  ;;  %v6045_v9 = vadd.f32 %v6044_v63, %v6043_v51  ;;  %v6154_v18 = vadd.f32 %v6153_v12, %v6152_v4  ;;  %v6155_v19 = vpop.f32.mrb[130].mxu1  ;;  %v667_v30 = vld [vmem:[%s11110_s0 + $0x13e8] sm:$0xff]  ;;  %v1144_v4 = vpack.c.bf16 %v669_v43, %v644_v38  ;;  %v770_v38 = vld [vmem:[%s11110_s0 + $0x1720] sm:$0xff] }
 0x1fc   :  { %3920 = vmatmul.mubr.bf16.gmra.mrb[236].mxu0 %v1117_v24  ;;  %v6156_v42 = vpop.f32.mrb[131].mxu1  ;;  %v1142_v62 = vpack.c.bf16 %v667_v30, %v642_v40  ;;  %v694_v30 = vld [vmem:[%s11110_s0 + $0x14c0] sm:$0xff] }
 0x1fd   :  { %v3515_v23 = vadd.f32 %v6045_v9, %v8967_v35  ;;  %3927 = vmatprep.mubr.bf16.mxu0 %v1143_v6  ;;  %v6157_v27 = vadd.f32 %v6156_v42, %v6155_v19  ;;  %v718_v35 = vld [vmem:[%s11110_s0 + $0x1580] sm:$0xff]  ;;  %v9541_v31 = vadd.f32 %v6154_v18, %v3512_v5  ;;  %v1170_v9 = vpack.c.bf16 %v720_v54, %v695_v2  ;;  %v717_v18 = vld [vmem:[%s11110_s0 + $0x1578] sm:$0xff]  ;;  %v743_v19 = vld [vmem:[%s11110_s0 + $0x1648] sm:$0xff] }
 0x1fe   :  { %4081 = vmatmul.mubr.bf16.gmra.mrb[236].mxu1 %v1119_v13  ;;  %v1168_v24 = vpack.c.bf16 %v718_v35, %v693_v10  ;;  %v1167_v40 = vpack.c.bf16 %v717_v18, %v692_v21  ;;  %v744_v18 = vld [vmem:[%s11110_s0 + $0x1650] sm:$0xff] }
 0x1ff   :  { %v6046_v32 = vpop.f32.mrb[132].mxu0  ;;  %4088 = vmatprep.mubr.bf16.mxu1 %v1145_v20  ;;  %v9549_v36 = vadd.f32 %v6157_v27, %v3515_v23  ;;  %v768_v20 = vld [vmem:[%s11110_s0 + $0x1710] sm:$0xff]  ;;  %v719_v27 = vld [vmem:[%s11110_s0 + $0x1588] sm:$0xff] }
 0x200   :  { %v6047_v15 = vpop.f32.mrb[133].mxu0  ;;  %v1169_v54 = vpack.c.bf16 %v719_v27, %v694_v30  ;;  %v820_v30 = vld [vmem:[%s11110_s0 + $0x18b0] sm:$0xff] }
 0x201   :  { %v6048_v22 = vadd.f32 %v6047_v15, %v6046_v32  ;;  %v6049_v41 = vpop.f32.mrb[134].mxu0  ;;  %v6158_v45 = vpop.f32.mrb[132].mxu1  ;;  %v1193_v15 = vpack.c.bf16 %v768_v20, %v743_v19 }
 0x202   :  { %v6050_v51 = vpop.f32.mrb[135].mxu0  ;;  %v6159_v56 = vpop.f32.mrb[133].mxu1 }
 0x203   :  { %v3520_v6 = vadd.f32 %v6048_v22, %v8989_v39  ;;  %v6051_v57 = vadd.f32 %v6050_v51, %v6049_v41  ;;  %v6160_v63 = vadd.f32 %v6159_v56, %v6158_v45  ;;  %v6161_v5 = vpop.f32.mrb[134].mxu1 }
 0x204   :  { %3928 = vmatmul.mubr.bf16.gmra.mrb[240].mxu0 %v1142_v62  ;;  %v6162_v13 = vpop.f32.mrb[135].mxu1  ;;  %v745_v62 = vld [vmem:[%s11110_s0 + $0x1658] sm:$0xff] }
 0x205   :  { %v3523_v12 = vadd.f32 %v6051_v57, %v8997_v26  ;;  %3935 = vmatprep.mubr.bf16.mxu0 %v1168_v24  ;;  %v6163_v39 = vadd.f32 %v6162_v13, %v6161_v5  ;;  %v9571_v26 = vadd.f32 %v6160_v63, %v3520_v6  ;;  %v1195_v6 = vpack.c.bf16 %v770_v38, %v745_v62  ;;  %v767_v63 = vld [vmem:[%s11110_s0 + $0x1708] sm:$0xff]  ;;  %v793_v5 = vld [vmem:[%s11110_s0 + $0x17d8] sm:$0xff] }
 0x206   :  { %4089 = vmatmul.mubr.bf16.gmra.mrb[240].mxu1 %v1144_v4  ;;  %v742_v4 = vld [vmem:[%s11110_s0 + $0x1640] sm:$0xff] }
 0x207   :  { %v6052_v23 = vpop.f32.mrb[136].mxu0  ;;  %4096 = vmatprep.mubr.bf16.mxu1 %v1170_v9  ;;  %v9579_v10 = vadd.f32 %v6163_v39, %v3523_v12  ;;  %v818_v9 = vld [vmem:[%s11110_s0 + $0x18a0] sm:$0xff]  ;;  %v1192_v21 = vpack.c.bf16 %v767_v63, %v742_v4  ;;  %v769_v39 = vld [vmem:[%s11110_s0 + $0x1718] sm:$0xff] }
 0x208   :  { %v6053_v42 = vpop.f32.mrb[137].mxu0  ;;  %v1194_v38 = vpack.c.bf16 %v769_v39, %v744_v18  ;;  %v794_v63 = vld [vmem:[%s11110_s0 + $0x17e0] sm:$0xff] }
 0x209   :  { %v6054_v35 = vadd.f32 %v6053_v42, %v6052_v23  ;;  %v6055_v32 = vpop.f32.mrb[138].mxu0  ;;  %v6164_v43 = vpop.f32.mrb[136].mxu1  ;;  %v1218_v42 = vpack.c.bf16 %v818_v9, %v793_v5  ;;  %v74_v18 = vld [vmem:[%s11110_s0 + $0x160] sm:$0xff] }
 0x20a   :  { %v6056_v22 = vpop.f32.mrb[139].mxu0  ;;  %v6165_v2 = vpop.f32.mrb[137].mxu1 }
 0x20b   :  { %v3528_v41 = vadd.f32 %v6054_v35, %v9019_v3  ;;  %v6057_v24 = vadd.f32 %v6056_v22, %v6055_v32  ;;  %v6166_v45 = vadd.f32 %v6165_v2, %v6164_v43  ;;  %v6167_v51 = vpop.f32.mrb[138].mxu1 }
 0x20c   :  { %3936 = vmatmul.mubr.bf16.gmra.mrb[244].mxu0 %v1167_v40  ;;  %v6168_v56 = vpop.f32.mrb[139].mxu1  ;;  %v795_v40 = vld [vmem:[%s11110_s0 + $0x17e8] sm:$0xff] }
 0x20d   :  { %v3531_v57 = vadd.f32 %v6057_v24, %v9027_v17  ;;  %3943 = vmatprep.mubr.bf16.mxu0 %v1193_v15  ;;  %v6169_v3 = vadd.f32 %v6168_v56, %v6167_v51  ;;  %v9601_v17 = vadd.f32 %v6166_v45, %v3528_v41  ;;  %v1220_v41 = vpack.c.bf16 %v820_v30, %v795_v40  ;;  %v817_v45 = vld [vmem:[%s11110_s0 + $0x1898] sm:$0xff]  ;;  %v47_v51 = vld [vmem:[%s11110_s0 + $0x88] sm:$0xff] }
 0x20e   :  { %4097 = vmatmul.mubr.bf16.gmra.mrb[244].mxu1 %v1169_v54  ;;  %v792_v54 = vld [vmem:[%s11110_s0 + $0x17d0] sm:$0xff] }
 0x20f   :  { %v6058_v12 = vpop.f32.mrb[140].mxu0  ;;  %4104 = vmatprep.mubr.bf16.mxu1 %v1195_v6  ;;  %v9609_v19 = vadd.f32 %v6169_v3, %v3531_v57  ;;  %v72_v6 = vld [vmem:[%s11110_s0 + $0x150] sm:$0xff]  ;;  %v1217_v4 = vpack.c.bf16 %v817_v45, %v792_v54  ;;  %v819_v3 = vld [vmem:[%s11110_s0 + $0x18a8] sm:$0xff] }
 0x210   :  { %v6059_v13 = vpop.f32.mrb[141].mxu0  ;;  %v1219_v30 = vpack.c.bf16 %v819_v3, %v794_v63  ;;  %v48_v45 = vld [vmem:[%s11110_s0 + $0x90] sm:$0xff]  ;;  %v99_v63 = vld [vmem:[%s11110_s0 + $0x228] sm:$0xff] }
 0x211   :  { %v6060_v20 = vadd.f32 %v6059_v13, %v6058_v12  ;;  %v6061_v23 = vpop.f32.mrb[142].mxu0  ;;  %v6170_v27 = vpop.f32.mrb[140].mxu1  ;;  %v847_v13 = vpack.c.bf16 %v72_v6, %v47_v51  ;;  %v124_v3 = vld [vmem:[%s11110_s0 + $0x2f0] sm:$0xff] }
 0x212   :  { %v6062_v35 = vpop.f32.mrb[143].mxu0  ;;  %v6171_v62 = vpop.f32.mrb[141].mxu1 }
 0x213   :  { %v3536_v32 = vadd.f32 %v6060_v20, %v9049_v33  ;;  %v6063_v15 = vadd.f32 %v6062_v35, %v6061_v23  ;;  %v6172_v43 = vadd.f32 %v6171_v62, %v6170_v27  ;;  %v6173_v22 = vpop.f32.mrb[142].mxu1 }
 0x214   :  { %3944 = vmatmul.mubr.bf16.gmra.mrb[248].mxu0 %v1192_v21  ;;  %v6174_v2 = vpop.f32.mrb[143].mxu1  ;;  %v49_v21 = vld [vmem:[%s11110_s0 + $0x98] sm:$0xff] }
 0x215   :  { %v3539_v24 = vadd.f32 %v6063_v15, %v9057_v1  ;;  %3951 = vmatprep.mubr.bf16.mxu0 %v1218_v42  ;;  %v6175_v33 = vadd.f32 %v6174_v2, %v6173_v22  ;;  %v9631_v1 = vadd.f32 %v6172_v43, %v3536_v32  ;;  %v849_v32 = vpack.c.bf16 %v74_v18, %v49_v21  ;;  %v71_v43 = vld [vmem:[%s11110_s0 + $0x148] sm:$0xff]  ;;  %v97_v22 = vld [vmem:[%s11110_s0 + $0x218] sm:$0xff] }
 0x216   :  { %4105 = vmatmul.mubr.bf16.gmra.mrb[248].mxu1 %v1194_v38  ;;  %v46_v38 = vld [vmem:[%s11110_s0 + $0x80] sm:$0xff] }
 0x217   :  { %v6064_v57 = vpop.f32.mrb[144].mxu0  ;;  %4112 = vmatprep.mubr.bf16.mxu1 %v1220_v41  ;;  %v9639_v5 = vadd.f32 %v6175_v33, %v3539_v24  ;;  %v122_v41 = vld [vmem:[%s11110_s0 + $0x2e0] sm:$0xff]  ;;  %v846_v54 = vpack.c.bf16 %v71_v43, %v46_v38  ;;  %v73_v33 = vld [vmem:[%s11110_s0 + $0x158] sm:$0xff]  ;;  %v172_v43 = vld [vmem:[%s11110_s0 + $0x470] sm:$0xff] }
 0x218   :  { %v6065_v56 = vpop.f32.mrb[145].mxu0 }
 0x219   :  { %v6066_v9 = vadd.f32 %v6065_v56, %v6064_v57  ;;  %v6067_v12 = vpop.f32.mrb[146].mxu0  ;;  %v6176_v39 = vpop.f32.mrb[144].mxu1  ;;  %v7275_v56 = vld [vmem:[%s11111_s1 + $0x500] sm:$0xff]  }
 0x21a   :  { %v6068_v20 = vpop.f32.mrb[147].mxu0  ;;  %v6177_v40 = vpop.f32.mrb[145].mxu1 }
 0x21b   :  { %v3544_v23 = vadd.f32 %v6066_v9, %v9079_v0  ;;  %v6069_v42 = vadd.f32 %v6068_v20, %v6067_v12  ;;  %v6178_v27 = vadd.f32 %v6177_v40, %v6176_v39  ;;  %v6179_v35 = vpop.f32.mrb[146].mxu1  ;;  %v848_v20 = vpack.c.bf16 %v73_v33, %v48_v45  ;;  %v96_v40 = vld [vmem:[%s11110_s0 + $0x210] sm:$0xff]  ;;  %v123_v45 = vld [vmem:[%s11110_s0 + $0x2e8] sm:$0xff] }
 0x21c   :  { %3952 = vmatmul.mubr.bf16.gmra.mrb[252].mxu0 %v1217_v4  ;;  %v6180_v62 = vpop.f32.mrb[147].mxu1  ;;  %v872_v4 = vpack.c.bf16 %v122_v41, %v97_v22  ;;  %v7291_v33 = vld [vmem:[%s11111_s1 + $0x588] sm:$0xff]  }
 0x21d   :  { %v3547_v15 = vadd.f32 %v6069_v42, %v9087_v55  ;;  %4153 = vmatprep.mubr.bf16.mxu0 %v847_v13  ;;  %v6181_v0 = vadd.f32 %v6180_v62, %v6179_v35  ;;  %v9661_v55 = vadd.f32 %v6178_v27, %v3544_v23  ;;  %v7276_v13 = vld [vmem:[%s11111_s1 + $0x548] sm:$0xff]   ;;  %v7287_v27 = vld [vmem:[%s11111_s1 + $0x580] sm:$0xff]  }
 0x21e   :  { %4113 = vmatmul.mubr.bf16.gmra.mrb[252].mxu1 %v1219_v30  ;;  %v874_v30 = vpack.c.bf16 %v124_v3, %v99_v63  ;;  %v7290_v62 = vld [vmem:[%s11111_s1 + $0x5c8] sm:$0xff]   ;;  %v149_v63 = vld [vmem:[%s11110_s0 + $0x3b8] sm:$0xff]  ;;  %v174_v3 = vld [vmem:[%s11110_s0 + $0x480] sm:$0xff] }
 0x21f   :  { %v6070_v24 = vpop.f32.mrb[148].mxu0  ;;  %4314 = vmatprep.mubr.bf16.mxu1 %v849_v32  ;;  %v9669_v51 = vadd.f32 %v6181_v0, %v3547_v15  ;;  %v7277_v15 = vld [vmem:[%s11111_s1 + $0x508] sm:$0xff]   ;;  %v7278_v0 = vld [vmem:[%s11111_s1 + $0x550] sm:$0xff]  }
 0x220   :  { %v6071_v2 = vpop.f32.mrb[149].mxu0 }
 0x221   :  { %v6072_v6 = vadd.f32 %v6071_v2, %v6070_v24  ;;  %v6073_v57 = vpop.f32.mrb[150].mxu0  ;;  %v6182_v9 = vpop.f32.mrb[148].mxu1 }
 0x222   :  { %v6074_v12 = vpop.f32.mrb[151].mxu0  ;;  %v6183_v39 = vpop.f32.mrb[149].mxu1 }
 0x223   :  { %v3552_v21 = vadd.f32 %v6072_v6, %v9124_v44  ;;  %v6075_v18 = vadd.f32 %v6074_v12, %v6073_v57  ;;  %v6184_v23 = vadd.f32 %v6183_v39, %v6182_v9  ;;  %v6185_v42 = vpop.f32.mrb[150].mxu1  ;;  %v121_v44 = vld [vmem:[%s11110_s0 + $0x2d8] sm:$0xff]  ;;  %v7279_v9 = vld [vmem:[%s11111_s1 + $0x510] sm:$0xff]  }
 0x224   :  { %4154 = vmatmul.mubr.bf16.vlgmr.msra.gmra.mrb[0].mxu0 %v846_v54  ;;  %v6186_v32 = vpop.f32.mrb[151].mxu1  ;;  %v871_v2 = vpack.c.bf16 %v121_v44, %v96_v40  ;;  %v98_v54 = vld [vmem:[%s11110_s0 + $0x220] sm:$0xff] }
 0x225   :  { %v3555_v35 = vadd.f32 %v6075_v18, %v9135_v53  ;;  %6697 = vmatpush3.bf16.msra.mxu0 %v7275_v56  ;;  %4161 = vmatprep.mubr.bf16.mxu0 %v872_v4  ;;  %v6187_v38 = vadd.f32 %v6186_v32, %v6185_v42  ;;  %v147_v53 = vld [vmem:[%s11110_s0 + $0x3a8] sm:$0xff]  ;;  %v9709_v22 = vadd.f32 %v6184_v23, %v3552_v21  ;;  %v7280_v21 = vld [vmem:[%s11111_s1 + $0x558] sm:$0xff]   ;;  %v7292_v18 = vld [vmem:[%s11111_s1 + $0x5d0] sm:$0xff]  }
 0x226   :  { %6698 = vmatprep.subr.bf16.mxu0 %v7276_v13  ;;  %4315 = vmatmul.mubr.bf16.vlgmr.msra.gmra.mrb[0].mxu1 %v848_v20  ;;  %v897_v4 = vpack.c.bf16 %v172_v43, %v147_v53  ;;  %v873_v42 = vpack.c.bf16 %v123_v45, %v98_v54  ;;  %v7293_v32 = vld [vmem:[%s11111_s1 + $0x590] sm:$0xff]   ;;  %v222_v43 = vld [vmem:[%s11110_s0 + $0x600] sm:$0xff] }
 0x227   :  { %v6076_v41 = vpop.f32.mrb[152].mxu0  ;;  %4322 = vmatprep.mubr.bf16.mxu1 %v874_v30  ;;  %6809 = vmatpush3.bf16.msra.mxu1 %v7287_v27  ;;  %v9720_v6 = vadd.f32 %v6187_v38, %v3555_v35  ;;  %v146_v27 = vld [vmem:[%s11110_s0 + $0x3a0] sm:$0xff]  ;;  %v899_v35 = vpack.c.bf16 %v174_v3, %v149_v63  ;;  %v7294_v38 = vld [vmem:[%s11111_s1 + $0x5d8] sm:$0xff]   ;;  %v148_v45 = vld [vmem:[%s11110_s0 + $0x3b0] sm:$0xff] }
 0x228   :  { %v6077_v24 = vpop.f32.mrb[153].mxu0  ;;  %6810 = vmatprep.subr.bf16.mxu1 %v7290_v62  ;;  %v7281_v62 = vld [vmem:[%s11111_s1 + $0x518] sm:$0xff]  }
 0x229   :  { %v6078_v57 = vadd.f32 %v6077_v24, %v6076_v41  ;;  %v6079_v56 = vpop.f32.mrb[154].mxu0  ;;  %6699 = vmatpush3.bf16.msra.mxu0 %v7277_v15  ;;  %v6188_v12 = vpop.f32.mrb[152].mxu1 }
 0x22a   :  { %v6080_v13 = vpop.f32.mrb[155].mxu0  ;;  %6700 = vmatprep.subr.bf16.mxu0 %v7278_v0  ;;  %v6189_v23 = vpop.f32.mrb[153].mxu1  ;;  %v7282_v0 = vld [vmem:[%s11111_s1 + $0x560] sm:$0xff]  }
 0x22b   :  { %v3560_v39 = vadd.f32 %v6078_v57, %v9178_v49  ;;  %v6081_v20 = vadd.f32 %v6080_v13, %v6079_v56  ;;  %v6190_v40 = vadd.f32 %v6189_v23, %v6188_v12  ;;  %v6191_v30 = vpop.f32.mrb[154].mxu1  ;;  %6811 = vmatpush3.bf16.msra.mxu1 %v7291_v33  ;;  %v171_v49 = vld [vmem:[%s11110_s0 + $0x468] sm:$0xff]  ;;  %v173_v33 = vld [vmem:[%s11110_s0 + $0x478] sm:$0xff]  ;;  %v224_v12 = vld [vmem:[%s11110_s0 + $0x610] sm:$0xff] }
 0x22c   :  { %4162 = vmatmul.mubr.bf16.gmra.mrb[4].mxu0 %v871_v2  ;;  %v6192_v15 = vpop.f32.mrb[155].mxu1  ;;  %6812 = vmatprep.subr.bf16.mxu1 %v7292_v18  ;;  %v896_v54 = vpack.c.bf16 %v171_v49, %v146_v27  ;;  %v7295_v57 = vld [vmem:[%s11111_s1 + $0x598] sm:$0xff]   ;;  %v7283_v13 = vld [vmem:[%s11111_s1 + $0x520] sm:$0xff]  }
 0x22d   :  { %v3563_v44 = vadd.f32 %v6081_v20, %v9189_v58  ;;  %4169 = vmatprep.mubr.bf16.mxu0 %v897_v4  ;;  %6701 = vmatpush3.bf16.msra.mxu0 %v7279_v9  ;;  %v6193_v53 = vadd.f32 %v6192_v15, %v6191_v30  ;;  %v197_v58 = vld [vmem:[%s11110_s0 + $0x538] sm:$0xff]  ;;  %v9763_v41 = vadd.f32 %v6190_v40, %v3560_v39  ;;  %v199_v9 = vld [vmem:[%s11110_s0 + $0x548] sm:$0xff]  ;;  %v7298_v20 = vld [vmem:[%s11111_s1 + $0x5e0] sm:$0xff]  }
 0x22e   :  { %6702 = vmatprep.subr.bf16.mxu0 %v7280_v21  ;;  %4323 = vmatmul.mubr.bf16.gmra.mrb[4].mxu1 %v873_v42  ;;  %v922_v3 = vpack.c.bf16 %v222_v43, %v197_v58  ;;  %v7284_v39 = vld [vmem:[%s11111_s1 + $0x568] sm:$0xff]   ;;  %v898_v30 = vpack.c.bf16 %v173_v33, %v148_v45  ;;  %v7299_v15 = vld [vmem:[%s11111_s1 + $0x5a0] sm:$0xff]   ;;  %v272_v43 = vld [vmem:[%s11110_s0 + $0x790] sm:$0xff] }
 0x22f   :  { %v6082_v24 = vpop.f32.mrb[156].mxu0  ;;  %4330 = vmatprep.mubr.bf16.mxu1 %v899_v35  ;;  %6813 = vmatpush3.bf16.msra.mxu1 %v7293_v32  ;;  %v9774_v56 = vadd.f32 %v6193_v53, %v3563_v44  ;;  %v196_v32 = vld [vmem:[%s11110_s0 + $0x530] sm:$0xff]  ;;  %v924_v44 = vpack.c.bf16 %v224_v12, %v199_v9  ;;  %v7300_v53 = vld [vmem:[%s11111_s1 + $0x5e8] sm:$0xff]   ;;  %v198_v33 = vld [vmem:[%s11110_s0 + $0x540] sm:$0xff] }
 0x230   :  { %v6083_v2 = vpop.f32.mrb[157].mxu0  ;;  %6814 = vmatprep.subr.bf16.mxu1 %v7294_v38  ;;  %v7285_v38 = vld [vmem:[%s11111_s1 + $0x528] sm:$0xff]  }
 0x231   :  { %v6084_v4 = vadd.f32 %v6083_v2, %v6082_v24  ;;  %v6085_v63 = vpop.f32.mrb[158].mxu0  ;;  %6703 = vmatpush3.bf16.msra.mxu0 %v7281_v62  ;;  %v6194_v21 = vpop.f32.mrb[156].mxu1 }
 0x232   :  { %v6086_v18 = vpop.f32.mrb[159].mxu0  ;;  %6704 = vmatprep.subr.bf16.mxu0 %v7282_v0  ;;  %v6195_v40 = vpop.f32.mrb[157].mxu1  ;;  %v7288_v0 = vld [vmem:[%s11111_s1 + $0x570] sm:$0xff]  }
 0x233   :  { %v3568_v23 = vadd.f32 %v6084_v4, %v9232_v28  ;;  %v6087_v42 = vadd.f32 %v6086_v18, %v6085_v63  ;;  %v6196_v27 = vadd.f32 %v6195_v40, %v6194_v21  ;;  %v6197_v35 = vpop.f32.mrb[158].mxu1  ;;  %6815 = vmatpush3.bf16.msra.mxu1 %v7295_v57  ;;  %v221_v28 = vld [vmem:[%s11110_s0 + $0x5f8] sm:$0xff]  ;;  %v223_v57 = vld [vmem:[%s11110_s0 + $0x608] sm:$0xff]  ;;  %v7340_v63 = vmov 65535  }
 0x234   :  { %4170 = vmatmul.mubr.bf16.gmra.mrb[8].mxu0 %v896_v54  ;;  %v6198_v62 = vpop.f32.mrb[159].mxu1  ;;  %6816 = vmatprep.subr.bf16.mxu1 %v7298_v20  ;;  %v921_v45 = vpack.c.bf16 %v221_v28, %v196_v32  ;;  %v7301_v4 = vld [vmem:[%s11111_s1 + $0x5a8] sm:$0xff]   ;;  %v249_v18 = vld [vmem:[%s11110_s0 + $0x6d8] sm:$0xff]  ;;  %v7289_v20 = vld [vmem:[%s11111_s1 + $0x530] sm:$0xff]  }
 0x235   :  { %v3571_v49 = vadd.f32 %v6087_v42, %v9243_v61  ;;  %4177 = vmatprep.mubr.bf16.mxu0 %v922_v3  ;;  %6705 = vmatpush3.bf16.msra.mxu0 %v7283_v13  ;;  %v6199_v58 = vadd.f32 %v6198_v62, %v6197_v35  ;;  %v247_v61 = vld [vmem:[%s11110_s0 + $0x6c8] sm:$0xff]  ;;  %v9817_v24 = vadd.f32 %v6196_v27, %v3568_v23  ;;  %v2828_v3 = vsel %vm2826_vm0, 4294967295, %v7340_v63  ;;  %v7296_v40 = vld [vmem:[%s11111_s1 + $0x578] sm:$0xff]   ;;  %v7306_v27 = vld [vmem:[%s11111_s1 + $0x600] ss:$0 sps:$4 sm:$0xff]  }
 0x236   :  { %6706 = vmatprep.subr.bf16.mxu0 %v7284_v39  ;;  %4331 = vmatmul.mubr.bf16.gmra.mrb[8].mxu1 %v898_v30  ;;  %v947_v21 = vpack.c.bf16 %v272_v43, %v247_v61  ;;  %v274_v39 = vld [vmem:[%s11110_s0 + $0x7a0] sm:$0xff]  ;;  %v7302_v30 = vld [vmem:[%s11111_s1 + $0x5f0] sm:$0xff]   ;;  %v271_v43 = vld [vmem:[%s11110_s0 + $0x788] sm:$0xff] }
 0x237   :  { %v6088_v2 = vpop.f32.mrb[160].mxu0  ;;  %4338 = vmatprep.mubr.bf16.mxu1 %v924_v44  ;;  %6817 = vmatpush3.bf16.msra.mxu1 %v7299_v15  ;;  %v9829_v9 = vadd.f32 %v6199_v58, %v3571_v49  ;;  %v923_v15 = vpack.c.bf16 %v223_v57, %v198_v33  ;;  %v2829_v49 = vsel %vm2827_vm1, %v2828_v3, 0  ;;  %v7303_v58 = vld [vmem:[%s11111_s1 + $0x5b0] sm:$0xff]   ;;  %v322_v33 = vld [vmem:[%s11110_s0 + $0x920] sm:$0xff] }
 0x238   :  { %v6089_v54 = vpop.f32.mrb[161].mxu0  ;;  %6818 = vmatprep.subr.bf16.mxu1 %v7300_v53  ;;  %v949_v53 = vpack.c.bf16 %v274_v39, %v249_v18  ;;  %v9875_v57 = vand.u32 %v7306_v27, %v2829_v49  ;;  %v7305_v18 = vld [vmem:[%s11111_s1 + $0x5b8] sm:$0xff]  }
 0x239   :  { %v6090_v12 = vadd.f32 %v6089_v54, %v6088_v2  ;;  %v6091_v13 = vpop.f32.mrb[162].mxu0  ;;  %6707 = vmatpush3.bf16.msra.mxu0 %v7285_v38  ;;  %v6200_v23 = vpop.f32.mrb[160].mxu1  ;;  %v246_v38 = vld [vmem:[%s11110_s0 + $0x6c0] sm:$0xff]  ;;  %v7304_v2 = vld [vmem:[%s11111_s1 + $0x5f8] sm:$0xff]  }
 0x23a   :  { %v6092_v42 = vpop.f32.mrb[163].mxu0  ;;  %6708 = vmatprep.subr.bf16.mxu0 %v7288_v0  ;;  %v6201_v44 = vpop.f32.mrb[161].mxu1  ;;  %v7297_v0 = vld [vmem:[%s11111_s1 + $0x538] sm:$0xff]  }
 0x23b   :  { %v6093_v35 = vadd.f32 %v6092_v42, %v6091_v13  ;;  %v3576_v32 = vadd.f32 %v6090_v12, %v9286_v11  ;;  %v6202_v62 = vadd.f32 %v6201_v44, %v6200_v23  ;;  %v6203_v28 = vpop.f32.mrb[162].mxu1  ;;  %6819 = vmatpush3.bf16.msra.mxu1 %v7301_v4  ;;  %v946_v12 = vpack.c.bf16 %v271_v43, %v246_v38  ;;  %v248_v13 = vld [vmem:[%s11110_s0 + $0x6d0] sm:$0xff]  ;;  %v299_v42 = vld [vmem:[%s11110_s0 + $0x868] sm:$0xff] }
 0x23c   :  { %4178 = vmatmul.mubr.bf16.gmra.mrb[12].mxu0 %v921_v45  ;;  %v6204_v11 = vpop.f32.mrb[163].mxu1  ;;  %6820 = vmatprep.subr.bf16.mxu1 %v7302_v30  ;;  %v347_v43 = vld [vmem:[%s11110_s0 + $0x9e8] sm:$0xff] }
 0x23d   :  { %v3579_v61 = vadd.f32 %v6093_v35, %v9306_v8  ;;  %4185 = vmatprep.mubr.bf16.mxu0 %v947_v21  ;;  %6709 = vmatpush3.bf16.msra.mxu0 %v7289_v20  ;;  %v9867_v54 = vadd.f32 %v6202_v62, %v3576_v32  ;;  %v6205_v45 = vadd.f32 %v6204_v11, %v6203_v28  ;;  %v297_v8 = vld [vmem:[%s11110_s0 + $0x858] sm:$0xff] }
 0x23e   :  { %6710 = vmatprep.subr.bf16.mxu0 %v7296_v40  ;;  %4339 = vmatmul.mubr.bf16.gmra.mrb[12].mxu1 %v923_v15  ;;  %v273_v21 = vld [vmem:[%s11110_s0 + $0x798] sm:$0xff]  ;;  %v972_v23 = vpack.c.bf16 %v322_v33, %v297_v8  ;;  %v324_v40 = vld [vmem:[%s11110_s0 + $0x930] sm:$0xff]  ;;  %v298_v33 = vld [vmem:[%s11110_s0 + $0x860] sm:$0xff] }
 0x23f   :  { %v6094_v4 = vpop.f32.mrb[164].mxu0  ;;  %v9877_v63 = vadd.f32 %v6205_v45, %v3579_v61  ;;  %4346 = vmatprep.mubr.bf16.mxu1 %v949_v53  ;;  %6821 = vmatpush3.bf16.msra.mxu1 %v7303_v58  ;;  %v948_v15 = vpack.c.bf16 %v273_v21, %v248_v13  ;;  %v974_v28 = vpack.c.bf16 %v324_v40, %v299_v42  ;;  %v296_v58 = vld [vmem:[%s11110_s0 + $0x850] sm:$0xff]  ;;  %v349_v21 = vld [vmem:[%s11110_s0 + $0x9f8] sm:$0xff] }
 0x240   :  { %v6095_v3 = vpop.f32.mrb[165].mxu0  ;;  %6822 = vmatprep.subr.bf16.mxu1 %v7304_v2 }
 0x241   :  { %v6096_v39 = vadd.f32 %v6095_v3, %v6094_v4  ;;  %v6097_v20 = vpop.f32.mrb[166].mxu0  ;;  %6711 = vmatpush3.bf16.msra.mxu0 %v7297_v0  ;;  %v6206_v30 = vpop.f32.mrb[164].mxu1  ;;  %v323_v4 = vld [vmem:[%s11110_s0 + $0x928] sm:$0xff] }
 0x242   :  { %v6098_v27 = vpop.f32.mrb[167].mxu0  ;;  %6995 = vmatprep.subr.bf16.mxu0 %v9875_v57  ;;  %v6207_v44 = vpop.f32.mrb[165].mxu1 }
 0x243   :  { %v3584_v35 = vadd.f32 %v6096_v39, %v9328_v48  ;;  %v6099_v32 = vadd.f32 %v6098_v27, %v6097_v20  ;;  %v6208_v49 = vadd.f32 %v6207_v44, %v6206_v30  ;;  %v6209_v62 = vpop.f32.mrb[166].mxu1  ;;  %6823 = vmatpush3.bf16.msra.mxu1 %v7305_v18  ;;  %v321_v48 = vld [vmem:[%s11110_s0 + $0x918] sm:$0xff]  ;;  %v374_v18 = vld [vmem:[%s11110_s0 + $0xac0] sm:$0xff]  ;;  %v973_v30 = vpack.c.bf16 %v323_v4, %v298_v33  ;;  %v399_v33 = vld [vmem:[%s11110_s0 + $0xb88] sm:$0xff] }
 0x244   :  { %4186 = vmatmul.mubr.bf16.gmra.mrb[16].mxu0 %v946_v12  ;;  %v6210_v53 = vpop.f32.mrb[167].mxu1  ;;  %v971_v8 = vpack.c.bf16 %v321_v48, %v296_v58  ;;  %v424_v4 = vld [vmem:[%s11110_s0 + $0xc50] sm:$0xff] }
 0x245   :  { %v3587_v38 = vadd.f32 %v6099_v32, %v9336_v59  ;;  %4193 = vmatprep.mubr.bf16.mxu0 %v972_v23  ;;  %v9903_v61 = vadd.f32 %v6208_v49, %v3584_v35  ;;  %v6211_v11 = vadd.f32 %v6210_v53, %v6209_v62  ;;  %v372_v59 = vld [vmem:[%s11110_s0 + $0xab0] sm:$0xff]  ;;  %v999_v32 = vpack.c.bf16 %v374_v18, %v349_v21  ;;  %v346_v49 = vld [vmem:[%s11110_s0 + $0x9e0] sm:$0xff]  ;;  %v371_v62 = vld [vmem:[%s11110_s0 + $0xaa8] sm:$0xff] }
 0x246   :  { %4347 = vmatmul.mubr.bf16.gmra.mrb[16].mxu1 %v948_v15  ;;  %v997_v13 = vpack.c.bf16 %v372_v59, %v347_v43  ;;  %v348_v43 = vld [vmem:[%s11110_s0 + $0x9f0] sm:$0xff]  ;;  %v373_v59 = vld [vmem:[%s11110_s0 + $0xab8] sm:$0xff] }
 0x247   :  { %v6100_v0 = vpop.f32.mrb[168].mxu0  ;;  %v9911_v2 = vadd.f32 %v6211_v11, %v3587_v38  ;;  %4354 = vmatprep.mubr.bf16.mxu1 %v974_v28  ;;  %v397_v38 = vld [vmem:[%s11110_s0 + $0xb78] sm:$0xff]  ;;  %v996_v11 = vpack.c.bf16 %v371_v62, %v346_v49 }
 0x248   :  { %v6101_v45 = vpop.f32.mrb[169].mxu0 }
 0x249   :  { %v6102_v3 = vadd.f32 %v6101_v45, %v6100_v0  ;;  %v6103_v12 = vpop.f32.mrb[170].mxu0  ;;  %v6212_v39 = vpop.f32.mrb[168].mxu1 }
 0x24a   :  { %v6104_v20 = vpop.f32.mrb[171].mxu0  ;;  %v6213_v40 = vpop.f32.mrb[169].mxu1 }
 0x24b   :  { %v3592_v23 = vadd.f32 %v6102_v3, %v9358_v7  ;;  %v6105_v42 = vadd.f32 %v6104_v20, %v6103_v12  ;;  %v6214_v27 = vadd.f32 %v6213_v40, %v6212_v39  ;;  %v6215_v35 = vpop.f32.mrb[170].mxu1  ;;  %v998_v39 = vpack.c.bf16 %v373_v59, %v348_v43  ;;  %v449_v43 = vld [vmem:[%s11110_s0 + $0xd18] sm:$0xff]  ;;  %v474_v59 = vld [vmem:[%s11110_s0 + $0xde0] sm:$0xff] }
 0x24c   :  { %4194 = vmatmul.mubr.bf16.gmra.mrb[20].mxu0 %v971_v8  ;;  %v6216_v15 = vpop.f32.mrb[171].mxu1 }
 0x24d   :  { %v3595_v44 = vadd.f32 %v6105_v42, %v9366_v46  ;;  %4201 = vmatprep.mubr.bf16.mxu0 %v997_v13  ;;  %v9933_v7 = vadd.f32 %v6214_v27, %v3592_v23  ;;  %v6217_v28 = vadd.f32 %v6216_v15, %v6215_v35  ;;  %v422_v46 = vld [vmem:[%s11110_s0 + $0xc40] sm:$0xff]  ;;  %v1024_v42 = vpack.c.bf16 %v424_v4, %v399_v33  ;;  %v396_v27 = vld [vmem:[%s11110_s0 + $0xb70] sm:$0xff]  ;;  %v421_v35 = vld [vmem:[%s11110_s0 + $0xc38] sm:$0xff] }
 0x24e   :  { %4355 = vmatmul.mubr.bf16.gmra.mrb[20].mxu1 %v973_v30  ;;  %v1022_v8 = vpack.c.bf16 %v422_v46, %v397_v38  ;;  %v398_v38 = vld [vmem:[%s11110_s0 + $0xb80] sm:$0xff]  ;;  %v423_v46 = vld [vmem:[%s11110_s0 + $0xc48] sm:$0xff] }
 0x24f   :  { %v6106_v53 = vpop.f32.mrb[172].mxu0  ;;  %v9941_v58 = vadd.f32 %v6217_v28, %v3595_v44  ;;  %4362 = vmatprep.mubr.bf16.mxu1 %v999_v32  ;;  %v447_v44 = vld [vmem:[%s11110_s0 + $0xd08] sm:$0xff]  ;;  %v1021_v28 = vpack.c.bf16 %v421_v35, %v396_v27 }
 0x250   :  { %v6107_v48 = vpop.f32.mrb[173].mxu0 }
 0x251   :  { %v6108_v0 = vadd.f32 %v6107_v48, %v6106_v53  ;;  %v6109_v45 = vpop.f32.mrb[174].mxu0  ;;  %v6218_v3 = vpop.f32.mrb[172].mxu1 }
 0x252   :  { %v6110_v12 = vpop.f32.mrb[175].mxu0  ;;  %v6219_v18 = vpop.f32.mrb[173].mxu1 }
 0x253   :  { %v3600_v13 = vadd.f32 %v6108_v0, %v9388_v50  ;;  %v6111_v21 = vadd.f32 %v6110_v12, %v6109_v45  ;;  %v6220_v20 = vadd.f32 %v6219_v18, %v6218_v3  ;;  %v6221_v23 = vpop.f32.mrb[174].mxu1  ;;  %v1023_v3 = vpack.c.bf16 %v423_v46, %v398_v38  ;;  %v499_v38 = vld [vmem:[%s11110_s0 + $0xea8] sm:$0xff]  ;;  %v524_v46 = vld [vmem:[%s11110_s0 + $0xf70] sm:$0xff] }
 0x254   :  { %4202 = vmatmul.mubr.bf16.gmra.mrb[24].mxu0 %v996_v11  ;;  %v6222_v30 = vpop.f32.mrb[175].mxu1 }
 0x255   :  { %v3603_v40 = vadd.f32 %v6111_v21, %v9396_v34  ;;  %4209 = vmatprep.mubr.bf16.mxu0 %v1022_v8  ;;  %v9963_v50 = vadd.f32 %v6220_v20, %v3600_v13  ;;  %v6223_v32 = vadd.f32 %v6222_v30, %v6221_v23  ;;  %v472_v34 = vld [vmem:[%s11110_s0 + $0xdd0] sm:$0xff]  ;;  %v1049_v21 = vpack.c.bf16 %v474_v59, %v449_v43  ;;  %v446_v20 = vld [vmem:[%s11110_s0 + $0xd00] sm:$0xff]  ;;  %v471_v23 = vld [vmem:[%s11110_s0 + $0xdc8] sm:$0xff] }
 0x256   :  { %4363 = vmatmul.mubr.bf16.gmra.mrb[24].mxu1 %v998_v39  ;;  %v1047_v11 = vpack.c.bf16 %v472_v34, %v447_v44  ;;  %v448_v44 = vld [vmem:[%s11110_s0 + $0xd10] sm:$0xff]  ;;  %v473_v34 = vld [vmem:[%s11110_s0 + $0xdd8] sm:$0xff] }
 0x257   :  { %v6112_v15 = vpop.f32.mrb[176].mxu0  ;;  %v9971_v49 = vadd.f32 %v6223_v32, %v3603_v40  ;;  %4370 = vmatprep.mubr.bf16.mxu1 %v1024_v42  ;;  %v497_v40 = vld [vmem:[%s11110_s0 + $0xe98] sm:$0xff]  ;;  %v1046_v32 = vpack.c.bf16 %v471_v23, %v446_v20 }
 0x258   :  { %v6113_v62 = vpop.f32.mrb[177].mxu0 }
 0x259   :  { %v6114_v53 = vadd.f32 %v6113_v62, %v6112_v15  ;;  %v6115_v48 = vpop.f32.mrb[178].mxu0  ;;  %v6224_v0 = vpop.f32.mrb[176].mxu1 }
 0x25a   :  { %v6116_v45 = vpop.f32.mrb[179].mxu0  ;;  %v6225_v4 = vpop.f32.mrb[177].mxu1 }
 0x25b   :  { %v3608_v8 = vadd.f32 %v6114_v53, %v9418_v29  ;;  %v6117_v33 = vadd.f32 %v6116_v45, %v6115_v48  ;;  %v6226_v12 = vadd.f32 %v6225_v4, %v6224_v0  ;;  %v6227_v13 = vpop.f32.mrb[178].mxu1  ;;  %v1048_v0 = vpack.c.bf16 %v473_v34, %v448_v44  ;;  %v549_v44 = vld [vmem:[%s11110_s0 + $0x1038] sm:$0xff]  ;;  %v574_v34 = vld [vmem:[%s11110_s0 + $0x1100] sm:$0xff] }
 0x25c   :  { %4210 = vmatmul.mubr.bf16.gmra.mrb[28].mxu0 %v1021_v28  ;;  %v6228_v39 = vpop.f32.mrb[179].mxu1 }
 0x25d   :  { %v3611_v18 = vadd.f32 %v6117_v33, %v9426_v25  ;;  %4217 = vmatprep.mubr.bf16.mxu0 %v1047_v11  ;;  %v9993_v29 = vadd.f32 %v6226_v12, %v3608_v8  ;;  %v6229_v42 = vadd.f32 %v6228_v39, %v6227_v13  ;;  %v522_v25 = vld [vmem:[%s11110_s0 + $0xf60] sm:$0xff]  ;;  %v1074_v33 = vpack.c.bf16 %v524_v46, %v499_v38  ;;  %v496_v12 = vld [vmem:[%s11110_s0 + $0xe90] sm:$0xff]  ;;  %v521_v13 = vld [vmem:[%s11110_s0 + $0xf58] sm:$0xff] }
 0x25e   :  { %4371 = vmatmul.mubr.bf16.gmra.mrb[28].mxu1 %v1023_v3  ;;  %v1072_v28 = vpack.c.bf16 %v522_v25, %v497_v40  ;;  %v498_v40 = vld [vmem:[%s11110_s0 + $0xea0] sm:$0xff]  ;;  %v523_v25 = vld [vmem:[%s11110_s0 + $0xf68] sm:$0xff] }
 0x25f   :  { %v6118_v30 = vpop.f32.mrb[180].mxu0  ;;  %v10001_v27 = vadd.f32 %v6229_v42, %v3611_v18  ;;  %4378 = vmatprep.mubr.bf16.mxu1 %v1049_v21  ;;  %v547_v18 = vld [vmem:[%s11110_s0 + $0x1028] sm:$0xff]  ;;  %v1071_v42 = vpack.c.bf16 %v521_v13, %v496_v12 }
 0x260   :  { %v6119_v35 = vpop.f32.mrb[181].mxu0 }
 0x261   :  { %v6120_v15 = vadd.f32 %v6119_v35, %v6118_v30  ;;  %v6121_v62 = vpop.f32.mrb[182].mxu0  ;;  %v6230_v53 = vpop.f32.mrb[180].mxu1 }
 0x262   :  { %v6122_v48 = vpop.f32.mrb[183].mxu0  ;;  %v6231_v59 = vpop.f32.mrb[181].mxu1 }
 0x263   :  { %v3616_v11 = vadd.f32 %v6120_v15, %v9448_v14  ;;  %v6123_v43 = vadd.f32 %v6122_v48, %v6121_v62  ;;  %v6232_v45 = vadd.f32 %v6231_v59, %v6230_v53  ;;  %v6233_v8 = vpop.f32.mrb[182].mxu1  ;;  %v1073_v53 = vpack.c.bf16 %v523_v25, %v498_v40  ;;  %v599_v40 = vld [vmem:[%s11110_s0 + $0x11c8] sm:$0xff]  ;;  %v624_v25 = vld [vmem:[%s11110_s0 + $0x1290] sm:$0xff] }
 0x264   :  { %4218 = vmatmul.mubr.bf16.gmra.mrb[32].mxu0 %v1046_v32  ;;  %v6234_v3 = vpop.f32.mrb[183].mxu1 }
 0x265   :  { %v3619_v4 = vadd.f32 %v6123_v43, %v9456_v16  ;;  %4225 = vmatprep.mubr.bf16.mxu0 %v1072_v28  ;;  %v10023_v14 = vadd.f32 %v6232_v45, %v3616_v11  ;;  %v6235_v21 = vadd.f32 %v6234_v3, %v6233_v8  ;;  %v572_v16 = vld [vmem:[%s11110_s0 + $0x10f0] sm:$0xff]  ;;  %v1099_v43 = vpack.c.bf16 %v574_v34, %v549_v44  ;;  %v546_v45 = vld [vmem:[%s11110_s0 + $0x1020] sm:$0xff]  ;;  %v571_v8 = vld [vmem:[%s11110_s0 + $0x10e8] sm:$0xff] }
 0x266   :  { %4379 = vmatmul.mubr.bf16.gmra.mrb[32].mxu1 %v1048_v0  ;;  %v1097_v32 = vpack.c.bf16 %v572_v16, %v547_v18  ;;  %v548_v18 = vld [vmem:[%s11110_s0 + $0x1030] sm:$0xff]  ;;  %v573_v16 = vld [vmem:[%s11110_s0 + $0x10f8] sm:$0xff] }
 0x267   :  { %v6124_v39 = vpop.f32.mrb[184].mxu0  ;;  %v10031_v20 = vadd.f32 %v6235_v21, %v3619_v4  ;;  %4386 = vmatprep.mubr.bf16.mxu1 %v1074_v33  ;;  %v597_v4 = vld [vmem:[%s11110_s0 + $0x11b8] sm:$0xff]  ;;  %v1096_v21 = vpack.c.bf16 %v571_v8, %v546_v45 }
 0x268   :  { %v6125_v23 = vpop.f32.mrb[185].mxu0 }
 0x269   :  { %v6126_v30 = vadd.f32 %v6125_v23, %v6124_v39  ;;  %v6127_v35 = vpop.f32.mrb[186].mxu0  ;;  %v6236_v15 = vpop.f32.mrb[184].mxu1 }
 0x26a   :  { %v6128_v62 = vpop.f32.mrb[187].mxu0  ;;  %v6237_v46 = vpop.f32.mrb[185].mxu1 }
 0x26b   :  { %v3624_v28 = vadd.f32 %v6126_v30, %v9478_v60  ;;  %v6129_v38 = vadd.f32 %v6128_v62, %v6127_v35  ;;  %v6238_v48 = vadd.f32 %v6237_v46, %v6236_v15  ;;  %v6239_v11 = vpop.f32.mrb[186].mxu1  ;;  %v1098_v15 = vpack.c.bf16 %v573_v16, %v548_v18  ;;  %v649_v18 = vld [vmem:[%s11110_s0 + $0x1358] sm:$0xff]  ;;  %v674_v16 = vld [vmem:[%s11110_s0 + $0x1420] sm:$0xff] }
 0x26c   :  { %4226 = vmatmul.mubr.bf16.gmra.mrb[36].mxu0 %v1071_v42  ;;  %v6240_v0 = vpop.f32.mrb[187].mxu1 }
 0x26d   :  { %v3627_v59 = vadd.f32 %v6129_v38, %v9486_v37  ;;  %4233 = vmatprep.mubr.bf16.mxu0 %v1097_v32  ;;  %v10053_v60 = vadd.f32 %v6238_v48, %v3624_v28  ;;  %v6241_v33 = vadd.f32 %v6240_v0, %v6239_v11  ;;  %v622_v37 = vld [vmem:[%s11110_s0 + $0x1280] sm:$0xff]  ;;  %v1124_v38 = vpack.c.bf16 %v624_v25, %v599_v40  ;;  %v596_v48 = vld [vmem:[%s11110_s0 + $0x11b0] sm:$0xff]  ;;  %v621_v11 = vld [vmem:[%s11110_s0 + $0x1278] sm:$0xff] }
 0x26e   :  { %4387 = vmatmul.mubr.bf16.gmra.mrb[36].mxu1 %v1073_v53  ;;  %v1122_v42 = vpack.c.bf16 %v622_v37, %v597_v4  ;;  %v598_v4 = vld [vmem:[%s11110_s0 + $0x11c0] sm:$0xff]  ;;  %v623_v37 = vld [vmem:[%s11110_s0 + $0x1288] sm:$0xff] }
 0x26f   :  { %v6130_v3 = vpop.f32.mrb[188].mxu0  ;;  %v10061_v12 = vadd.f32 %v6241_v33, %v3627_v59  ;;  %4394 = vmatprep.mubr.bf16.mxu1 %v1099_v43  ;;  %v647_v59 = vld [vmem:[%s11110_s0 + $0x1348] sm:$0xff]  ;;  %v1121_v33 = vpack.c.bf16 %v621_v11, %v596_v48 }
 0x270   :  { %v6131_v13 = vpop.f32.mrb[189].mxu0 }
 0x271   :  { %v6132_v39 = vadd.f32 %v6131_v13, %v6130_v3  ;;  %v6133_v23 = vpop.f32.mrb[190].mxu0  ;;  %v6242_v30 = vpop.f32.mrb[188].mxu1 }
 0x272   :  { %v6134_v35 = vpop.f32.mrb[191].mxu0  ;;  %v6243_v34 = vpop.f32.mrb[189].mxu1 }
 0x273   :  { %v3632_v32 = vadd.f32 %v6132_v39, %v9508_v47  ;;  %v6135_v44 = vadd.f32 %v6134_v35, %v6133_v23  ;;  %v6244_v62 = vadd.f32 %v6243_v34, %v6242_v30  ;;  %v6245_v28 = vpop.f32.mrb[190].mxu1  ;;  %v1123_v30 = vpack.c.bf16 %v623_v37, %v598_v4  ;;  %v699_v4 = vld [vmem:[%s11110_s0 + $0x14e8] sm:$0xff]  ;;  %v724_v37 = vld [vmem:[%s11110_s0 + $0x15b0] sm:$0xff] }
 0x274   :  { %4234 = vmatmul.mubr.bf16.gmra.mrb[40].mxu0 %v1096_v21  ;;  %v6246_v53 = vpop.f32.mrb[191].mxu1 }
 0x275   :  { %v3635_v46 = vadd.f32 %v6135_v44, %v9516_v52  ;;  %4241 = vmatprep.mubr.bf16.mxu0 %v1122_v42  ;;  %v10083_v47 = vadd.f32 %v6244_v62, %v3632_v32  ;;  %v6247_v43 = vadd.f32 %v6246_v53, %v6245_v28  ;;  %v672_v52 = vld [vmem:[%s11110_s0 + $0x1410] sm:$0xff]  ;;  %v1149_v44 = vpack.c.bf16 %v674_v16, %v649_v18  ;;  %v646_v62 = vld [vmem:[%s11110_s0 + $0x1340] sm:$0xff]  ;;  %v671_v28 = vld [vmem:[%s11110_s0 + $0x1408] sm:$0xff] }
 0x276   :  { %4395 = vmatmul.mubr.bf16.gmra.mrb[40].mxu1 %v1098_v15  ;;  %v1147_v21 = vpack.c.bf16 %v672_v52, %v647_v59  ;;  %v648_v59 = vld [vmem:[%s11110_s0 + $0x1350] sm:$0xff]  ;;  %v673_v52 = vld [vmem:[%s11110_s0 + $0x1418] sm:$0xff] }
 0x277   :  { %v6264_v0 = vpop.f32.mrb[192].mxu0  ;;  %v10091_v45 = vadd.f32 %v6247_v43, %v3635_v46  ;;  %4402 = vmatprep.mubr.bf16.mxu1 %v1124_v38  ;;  %v697_v46 = vld [vmem:[%s11110_s0 + $0x14d8] sm:$0xff]  ;;  %v1146_v43 = vpack.c.bf16 %v671_v28, %v646_v62 }
 0x278   :  { %v6265_v8 = vpop.f32.mrb[193].mxu0 }
 0x279   :  { %v6266_v3 = vadd.f32 %v6265_v8, %v6264_v0  ;;  %v6267_v13 = vpop.f32.mrb[194].mxu0  ;;  %v6376_v39 = vpop.f32.mrb[192].mxu1 }
 0x27a   :  { %v6268_v23 = vpop.f32.mrb[195].mxu0  ;;  %v6377_v25 = vpop.f32.mrb[193].mxu1 }
 0x27b   :  { %v3834_v42 = vadd.f32 %v6266_v3, %v9541_v31  ;;  %v6269_v40 = vadd.f32 %v6268_v23, %v6267_v13  ;;  %v6378_v35 = vadd.f32 %v6377_v25, %v6376_v39  ;;  %v6379_v32 = vpop.f32.mrb[194].mxu1  ;;  %v1148_v39 = vpack.c.bf16 %v673_v52, %v648_v59  ;;  %v749_v59 = vld [vmem:[%s11110_s0 + $0x1678] sm:$0xff]  ;;  %v774_v52 = vld [vmem:[%s11110_s0 + $0x1740] sm:$0xff] }
 0x27c   :  { %4242 = vmatmul.mubr.bf16.gmra.mrb[44].mxu0 %v1121_v33  ;;  %v6380_v15 = vpop.f32.mrb[195].mxu1 }
 0x27d   :  { %v3837_v34 = vadd.f32 %v6269_v40, %v9549_v36  ;;  %4249 = vmatprep.mubr.bf16.mxu0 %v1147_v21  ;;  %v10113_v31 = vadd.f32 %v6378_v35, %v3834_v42  ;;  %v6381_v38 = vadd.f32 %v6380_v15, %v6379_v32  ;;  %v722_v36 = vld [vmem:[%s11110_s0 + $0x15a0] sm:$0xff]  ;;  %v1174_v40 = vpack.c.bf16 %v724_v37, %v699_v4  ;;  %v696_v35 = vld [vmem:[%s11110_s0 + $0x14d0] sm:$0xff]  ;;  %v721_v32 = vld [vmem:[%s11110_s0 + $0x1598] sm:$0xff] }
 0x27e   :  { %4403 = vmatmul.mubr.bf16.gmra.mrb[44].mxu1 %v1123_v30  ;;  %v1172_v33 = vpack.c.bf16 %v722_v36, %v697_v46  ;;  %v698_v46 = vld [vmem:[%s11110_s0 + $0x14e0] sm:$0xff]  ;;  %v723_v36 = vld [vmem:[%s11110_s0 + $0x15a8] sm:$0xff] }
 0x27f   :  { %v6270_v53 = vpop.f32.mrb[196].mxu0  ;;  %v10121_v48 = vadd.f32 %v6381_v38, %v3837_v34  ;;  %4410 = vmatprep.mubr.bf16.mxu1 %v1149_v44  ;;  %v747_v34 = vld [vmem:[%s11110_s0 + $0x1668] sm:$0xff]  ;;  %v1171_v38 = vpack.c.bf16 %v721_v32, %v696_v35 }
 0x280   :  { %v6271_v11 = vpop.f32.mrb[197].mxu0 }
 0x281   :  { %v6272_v0 = vadd.f32 %v6271_v11, %v6270_v53  ;;  %v6273_v8 = vpop.f32.mrb[198].mxu0  ;;  %v6382_v3 = vpop.f32.mrb[196].mxu1 }
 0x282   :  { %v6274_v13 = vpop.f32.mrb[199].mxu0  ;;  %v6383_v16 = vpop.f32.mrb[197].mxu1 }
 0x283   :  { %v3842_v21 = vadd.f32 %v6272_v0, %v9571_v26  ;;  %v6275_v18 = vadd.f32 %v6274_v13, %v6273_v8  ;;  %v6384_v23 = vadd.f32 %v6383_v16, %v6382_v3  ;;  %v6385_v42 = vpop.f32.mrb[198].mxu1  ;;  %v1173_v3 = vpack.c.bf16 %v723_v36, %v698_v46  ;;  %v799_v46 = vld [vmem:[%s11110_s0 + $0x1808] sm:$0xff]  ;;  %v824_v36 = vld [vmem:[%s11110_s0 + $0x18d0] sm:$0xff] }
 0x284   :  { %4250 = vmatmul.mubr.bf16.gmra.mrb[48].mxu0 %v1146_v43  ;;  %v6386_v30 = vpop.f32.mrb[199].mxu1 }
 0x285   :  { %v3845_v25 = vadd.f32 %v6275_v18, %v9579_v10  ;;  %4257 = vmatprep.mubr.bf16.mxu0 %v1172_v33  ;;  %v10143_v26 = vadd.f32 %v6384_v23, %v3842_v21  ;;  %v6387_v44 = vadd.f32 %v6386_v30, %v6385_v42  ;;  %v772_v10 = vld [vmem:[%s11110_s0 + $0x1730] sm:$0xff]  ;;  %v1199_v18 = vpack.c.bf16 %v774_v52, %v749_v59  ;;  %v746_v23 = vld [vmem:[%s11110_s0 + $0x1660] sm:$0xff]  ;;  %v771_v42 = vld [vmem:[%s11110_s0 + $0x1728] sm:$0xff] }
 0x286   :  { %4411 = vmatmul.mubr.bf16.gmra.mrb[48].mxu1 %v1148_v39  ;;  %v1197_v43 = vpack.c.bf16 %v772_v10, %v747_v34  ;;  %v748_v34 = vld [vmem:[%s11110_s0 + $0x1670] sm:$0xff]  ;;  %v773_v10 = vld [vmem:[%s11110_s0 + $0x1738] sm:$0xff] }
 0x287   :  { %v6276_v15 = vpop.f32.mrb[200].mxu0  ;;  %v10151_v62 = vadd.f32 %v6387_v44, %v3845_v25  ;;  %4418 = vmatprep.mubr.bf16.mxu1 %v1174_v40  ;;  %v797_v25 = vld [vmem:[%s11110_s0 + $0x17f8] sm:$0xff]  ;;  %v1196_v44 = vpack.c.bf16 %v771_v42, %v746_v23 }
 0x288   :  { %v6277_v28 = vpop.f32.mrb[201].mxu0 }
 0x289   :  { %v6278_v53 = vadd.f32 %v6277_v28, %v6276_v15  ;;  %v6279_v11 = vpop.f32.mrb[202].mxu0  ;;  %v6388_v0 = vpop.f32.mrb[200].mxu1 }
 0x28a   :  { %v6280_v8 = vpop.f32.mrb[203].mxu0  ;;  %v6389_v37 = vpop.f32.mrb[201].mxu1 }
 0x28b   :  { %v3850_v33 = vadd.f32 %v6278_v53, %v9601_v17  ;;  %v6281_v4 = vadd.f32 %v6280_v8, %v6279_v11  ;;  %v6390_v13 = vadd.f32 %v6389_v37, %v6388_v0  ;;  %v6391_v21 = vpop.f32.mrb[202].mxu1  ;;  %v1198_v0 = vpack.c.bf16 %v773_v10, %v748_v34  ;;  %v53_v34 = vld [vmem:[%s11110_s0 + $0xb8] sm:$0xff]  ;;  %v78_v10 = vld [vmem:[%s11110_s0 + $0x180] sm:$0xff] }
 0x28c   :  { %4258 = vmatmul.mubr.bf16.gmra.mrb[52].mxu0 %v1171_v38  ;;  %v6392_v39 = vpop.f32.mrb[203].mxu1 }
 0x28d   :  { %v3853_v16 = vadd.f32 %v6281_v4, %v9609_v19  ;;  %4265 = vmatprep.mubr.bf16.mxu0 %v1197_v43  ;;  %v10173_v17 = vadd.f32 %v6390_v13, %v3850_v33  ;;  %v6393_v40 = vadd.f32 %v6392_v39, %v6391_v21  ;;  %v822_v19 = vld [vmem:[%s11110_s0 + $0x18c0] sm:$0xff]  ;;  %v1224_v4 = vpack.c.bf16 %v824_v36, %v799_v46  ;;  %v796_v13 = vld [vmem:[%s11110_s0 + $0x17f0] sm:$0xff]  ;;  %v821_v21 = vld [vmem:[%s11110_s0 + $0x18b8] sm:$0xff] }
 0x28e   :  { %4419 = vmatmul.mubr.bf16.gmra.mrb[52].mxu1 %v1173_v3  ;;  %v1222_v38 = vpack.c.bf16 %v822_v19, %v797_v25  ;;  %v798_v25 = vld [vmem:[%s11110_s0 + $0x1800] sm:$0xff]  ;;  %v823_v19 = vld [vmem:[%s11110_s0 + $0x18c8] sm:$0xff] }
 0x28f   :  { %v6282_v30 = vpop.f32.mrb[204].mxu0  ;;  %v10181_v35 = vadd.f32 %v6393_v40, %v3853_v16  ;;  %4426 = vmatprep.mubr.bf16.mxu1 %v1199_v18  ;;  %v51_v16 = vld [vmem:[%s11110_s0 + $0xa8] sm:$0xff]  ;;  %v1221_v40 = vpack.c.bf16 %v821_v21, %v796_v13 }
 0x290   :  { %v6283_v32 = vpop.f32.mrb[205].mxu0 }
 0x291   :  { %v6284_v15 = vadd.f32 %v6283_v32, %v6282_v30  ;;  %v6285_v28 = vpop.f32.mrb[206].mxu0  ;;  %v6394_v53 = vpop.f32.mrb[204].mxu1 }
 0x292   :  { %v6286_v11 = vpop.f32.mrb[207].mxu0  ;;  %v6395_v52 = vpop.f32.mrb[205].mxu1 }
 0x293   :  { %v3858_v43 = vadd.f32 %v6284_v15, %v9631_v1  ;;  %v6287_v59 = vadd.f32 %v6286_v11, %v6285_v28  ;;  %v6396_v8 = vadd.f32 %v6395_v52, %v6394_v53  ;;  %v6397_v33 = vpop.f32.mrb[206].mxu1  ;;  %v1223_v53 = vpack.c.bf16 %v823_v19, %v798_v25  ;;  %v103_v25 = vld [vmem:[%s11110_s0 + $0x248] sm:$0xff]  ;;  %v128_v19 = vld [vmem:[%s11110_s0 + $0x310] sm:$0xff] }
 0x294   :  { %4266 = vmatmul.mubr.bf16.gmra.mrb[56].mxu0 %v1196_v44  ;;  %v6398_v3 = vpop.f32.mrb[207].mxu1 }
 0x295   :  { %v3861_v37 = vadd.f32 %v6287_v59, %v9639_v5  ;;  %4273 = vmatprep.mubr.bf16.mxu0 %v1222_v38  ;;  %v10203_v1 = vadd.f32 %v6396_v8, %v3858_v43  ;;  %v6399_v18 = vadd.f32 %v6398_v3, %v6397_v33  ;;  %v76_v5 = vld [vmem:[%s11110_s0 + $0x170] sm:$0xff]  ;;  %v853_v59 = vpack.c.bf16 %v78_v10, %v53_v34  ;;  %v50_v8 = vld [vmem:[%s11110_s0 + $0xa0] sm:$0xff]  ;;  %v75_v33 = vld [vmem:[%s11110_s0 + $0x168] sm:$0xff] }
 0x296   :  { %4427 = vmatmul.mubr.bf16.gmra.mrb[56].mxu1 %v1198_v0  ;;  %v851_v44 = vpack.c.bf16 %v76_v5, %v51_v16  ;;  %v52_v16 = vld [vmem:[%s11110_s0 + $0xb0] sm:$0xff]  ;;  %v77_v5 = vld [vmem:[%s11110_s0 + $0x178] sm:$0xff] }
 0x297   :  { %v6288_v39 = vpop.f32.mrb[208].mxu0  ;;  %v10211_v23 = vadd.f32 %v6399_v18, %v3861_v37  ;;  %4434 = vmatprep.mubr.bf16.mxu1 %v1224_v4  ;;  %v101_v37 = vld [vmem:[%s11110_s0 + $0x238] sm:$0xff]  ;;  %v850_v18 = vpack.c.bf16 %v75_v33, %v50_v8 }
 0x298   :  { %v6289_v42 = vpop.f32.mrb[209].mxu0 }
 0x299   :  { %v6290_v30 = vadd.f32 %v6289_v42, %v6288_v39  ;;  %v6291_v32 = vpop.f32.mrb[210].mxu0  ;;  %v6400_v15 = vpop.f32.mrb[208].mxu1 }
 0x29a   :  { %v6292_v28 = vpop.f32.mrb[211].mxu0  ;;  %v6401_v36 = vpop.f32.mrb[209].mxu1 }
 0x29b   :  { %v3866_v38 = vadd.f32 %v6290_v30, %v9661_v55  ;;  %v6293_v46 = vadd.f32 %v6292_v28, %v6291_v32  ;;  %v6402_v11 = vadd.f32 %v6401_v36, %v6400_v15  ;;  %v6403_v43 = vpop.f32.mrb[210].mxu1  ;;  %v852_v15 = vpack.c.bf16 %v77_v5, %v52_v16  ;;  %v178_v16 = vld [vmem:[%s11110_s0 + $0x4a0] sm:$0xff] }
 0x29c   :  { %4274 = vmatmul.mubr.bf16.gmra.mrb[60].mxu0 %v1221_v40  ;;  %v6404_v0 = vpop.f32.mrb[211].mxu1 }
 0x29d   :  { %v3869_v52 = vadd.f32 %v6293_v46, %v9669_v51  ;;  %4475 = vmatprep.mubr.bf16.mxu0 %v851_v44  ;;  %v10233_v55 = vadd.f32 %v6402_v11, %v3866_v38  ;;  %v6405_v4 = vadd.f32 %v6404_v0, %v6403_v43  ;;  %v126_v51 = vld [vmem:[%s11110_s0 + $0x300] sm:$0xff]  ;;  %v878_v46 = vpack.c.bf16 %v128_v19, %v103_v25  ;;  %v100_v11 = vld [vmem:[%s11110_s0 + $0x230] sm:$0xff] }
 0x29e   :  { %4435 = vmatmul.mubr.bf16.gmra.mrb[60].mxu1 %v1223_v53  ;;  %v876_v40 = vpack.c.bf16 %v126_v51, %v101_v37  ;;  %v127_v37 = vld [vmem:[%s11110_s0 + $0x308] sm:$0xff] }
 0x29f   :  { %v6294_v3 = vpop.f32.mrb[212].mxu0  ;;  %v10241_v13 = vadd.f32 %v6405_v4, %v3869_v52  ;;  %4636 = vmatprep.mubr.bf16.mxu1 %v853_v59  ;;  %v151_v52 = vld [vmem:[%s11110_s0 + $0x3c8] sm:$0xff]  ;;  %v102_v4 = vld [vmem:[%s11110_s0 + $0x240] sm:$0xff] }
 0x2a0   :  { %v6295_v21 = vpop.f32.mrb[213].mxu0  ;;  %v877_v19 = vpack.c.bf16 %v127_v37, %v102_v4  ;;  %v228_v4 = vld [vmem:[%s11110_s0 + $0x630] sm:$0xff] }
 0x2a1   :  { %v6296_v39 = vadd.f32 %v6295_v21, %v6294_v3  ;;  %v6297_v42 = vpop.f32.mrb[214].mxu0  ;;  %v6406_v30 = vpop.f32.mrb[212].mxu1 }
 0x2a2   :  { %v6298_v32 = vpop.f32.mrb[215].mxu0  ;;  %v6407_v10 = vpop.f32.mrb[213].mxu1 }
 0x2a3   :  { %v3874_v44 = vadd.f32 %v6296_v39, %v9709_v22  ;;  %v6299_v34 = vadd.f32 %v6298_v32, %v6297_v42  ;;  %v6408_v28 = vadd.f32 %v6407_v10, %v6406_v30  ;;  %v6409_v38 = vpop.f32.mrb[214].mxu1  ;;  %v125_v22 = vld [vmem:[%s11110_s0 + $0x2f8] sm:$0xff] }
 0x2a4   :  { %4476 = vmatmul.mubr.bf16.vlgmr.msra.gmra.mrb[64].mxu0 %v850_v18  ;;  %v6410_v53 = vpop.f32.mrb[215].mxu1  ;;  %v875_v33 = vpack.c.bf16 %v125_v22, %v100_v11  ;;  %v153_v18 = vld [vmem:[%s11110_s0 + $0x3d8] sm:$0xff] }
 0x2a5   :  { %v3877_v36 = vadd.f32 %v6299_v34, %v9720_v6  ;;  %6996 = vmatpush3.bf16.msra.mxu0 %v9875_v57  ;;  %4483 = vmatprep.mubr.bf16.mxu0 %v876_v40  ;;  %v10264_v43 = vadd.f32 %v6408_v28, %v3874_v44  ;;  %v6411_v59 = vadd.f32 %v6410_v53, %v6409_v38  ;;  %v176_v6 = vld [vmem:[%s11110_s0 + $0x490] sm:$0xff]  ;;  %v175_v28 = vld [vmem:[%s11110_s0 + $0x488] sm:$0xff] }
 0x2a6   :  { %4637 = vmatmul.mubr.bf16.vlgmr.msra.gmra.mrb[64].mxu1 %v852_v15  ;;  %v901_v21 = vpack.c.bf16 %v176_v6, %v151_v52  ;;  %v903_v44 = vpack.c.bf16 %v178_v16, %v153_v18  ;;  %v150_v15 = vld [vmem:[%s11110_s0 + $0x3c0] sm:$0xff]  ;;  %v177_v52 = vld [vmem:[%s11110_s0 + $0x498] sm:$0xff] }
 0x2a7   :  { %v6300_v57 = vpop.f32.mrb[216].mxu0  ;;  %v10272_v0 = vadd.f32 %v6411_v59, %v3877_v36  ;;  %4644 = vmatprep.mubr.bf16.mxu1 %v878_v46  ;;  %v201_v46 = vld [vmem:[%s11110_s0 + $0x558] sm:$0xff]  ;;  %v900_v22 = vpack.c.bf16 %v175_v28, %v150_v15  ;;  %v152_v59 = vld [vmem:[%s11110_s0 + $0x3d0] sm:$0xff] }
 0x2a8   :  { %v6301_v8 = vpop.f32.mrb[217].mxu0  ;;  %v902_v16 = vpack.c.bf16 %v177_v52, %v152_v59  ;;  %v278_v59 = vld [vmem:[%s11110_s0 + $0x7c0] sm:$0xff] }
 0x2a9   :  { %v6302_v51 = vadd.f32 %v6301_v8, %v6300_v57  ;;  %v6303_v3 = vpop.f32.mrb[218].mxu0  ;;  %v6412_v5 = vpop.f32.mrb[216].mxu1 }
 0x2aa   :  { %v6304_v39 = vpop.f32.mrb[219].mxu0  ;;  %v6413_v25 = vpop.f32.mrb[217].mxu1 }
 0x2ab   :  { %v3882_v42 = vadd.f32 %v6302_v51, %v9763_v41  ;;  %v6305_v40 = vadd.f32 %v6304_v39, %v6303_v3  ;;  %v6414_v30 = vadd.f32 %v6413_v25, %v6412_v5  ;;  %v6415_v32 = vpop.f32.mrb[218].mxu1 }
 0x2ac   :  { %4484 = vmatmul.mubr.bf16.gmra.mrb[68].mxu0 %v875_v33  ;;  %v6416_v10 = vpop.f32.mrb[219].mxu1  ;;  %v203_v33 = vld [vmem:[%s11110_s0 + $0x568] sm:$0xff] }
 0x2ad   :  { %v3885_v34 = vadd.f32 %v6305_v40, %v9774_v56  ;;  %4491 = vmatprep.mubr.bf16.mxu0 %v901_v21  ;;  %v10294_v41 = vadd.f32 %v6414_v30, %v3882_v42  ;;  %v6417_v38 = vadd.f32 %v6416_v10, %v6415_v32  ;;  %v226_v56 = vld [vmem:[%s11110_s0 + $0x620] sm:$0xff]  ;;  %v928_v42 = vpack.c.bf16 %v228_v4, %v203_v33  ;;  %v225_v30 = vld [vmem:[%s11110_s0 + $0x618] sm:$0xff] }
 0x2ae   :  { %4645 = vmatmul.mubr.bf16.gmra.mrb[68].mxu1 %v877_v19  ;;  %v926_v8 = vpack.c.bf16 %v226_v56, %v201_v46  ;;  %v200_v19 = vld [vmem:[%s11110_s0 + $0x550] sm:$0xff]  ;;  %v227_v46 = vld [vmem:[%s11110_s0 + $0x628] sm:$0xff] }
 0x2af   :  { %v6306_v36 = vpop.f32.mrb[220].mxu0  ;;  %v10302_v53 = vadd.f32 %v6417_v38, %v3885_v34  ;;  %4652 = vmatprep.mubr.bf16.mxu1 %v903_v44  ;;  %v251_v44 = vld [vmem:[%s11110_s0 + $0x6e8] sm:$0xff]  ;;  %v925_v28 = vpack.c.bf16 %v225_v30, %v200_v19  ;;  %v202_v38 = vld [vmem:[%s11110_s0 + $0x560] sm:$0xff] }
 0x2b0   :  { %v6307_v11 = vpop.f32.mrb[221].mxu0  ;;  %v927_v4 = vpack.c.bf16 %v227_v46, %v202_v38  ;;  %v328_v38 = vld [vmem:[%s11110_s0 + $0x950] sm:$0xff] }
 0x2b1   :  { %v6308_v6 = vadd.f32 %v6307_v11, %v6306_v36  ;;  %v6309_v57 = vpop.f32.mrb[222].mxu0  ;;  %v6418_v37 = vpop.f32.mrb[220].mxu1 }
 0x2b2   :  { %v6310_v51 = vpop.f32.mrb[223].mxu0  ;;  %v6419_v18 = vpop.f32.mrb[221].mxu1 }
 0x2b3   :  { %v3890_v3 = vadd.f32 %v6308_v6, %v9817_v24  ;;  %v6311_v21 = vadd.f32 %v6310_v51, %v6309_v57  ;;  %v6420_v5 = vadd.f32 %v6419_v18, %v6418_v37  ;;  %v6421_v39 = vpop.f32.mrb[222].mxu1 }
 0x2b4   :  { %4492 = vmatmul.mubr.bf16.gmra.mrb[72].mxu0 %v900_v22  ;;  %v6422_v25 = vpop.f32.mrb[223].mxu1  ;;  %v253_v22 = vld [vmem:[%s11110_s0 + $0x6f8] sm:$0xff] }
 0x2b5   :  { %v3893_v40 = vadd.f32 %v6311_v21, %v9829_v9  ;;  %4499 = vmatprep.mubr.bf16.mxu0 %v926_v8  ;;  %v10324_v24 = vadd.f32 %v6420_v5, %v3890_v3  ;;  %v6423_v32 = vadd.f32 %v6422_v25, %v6421_v39  ;;  %v276_v9 = vld [vmem:[%s11110_s0 + $0x7b0] sm:$0xff]  ;;  %v953_v3 = vpack.c.bf16 %v278_v59, %v253_v22  ;;  %v275_v5 = vld [vmem:[%s11110_s0 + $0x7a8] sm:$0xff] }
 0x2b6   :  { %4653 = vmatmul.mubr.bf16.gmra.mrb[72].mxu1 %v902_v16  ;;  %v951_v11 = vpack.c.bf16 %v276_v9, %v251_v44  ;;  %v250_v16 = vld [vmem:[%s11110_s0 + $0x6e0] sm:$0xff]  ;;  %v277_v44 = vld [vmem:[%s11110_s0 + $0x7b8] sm:$0xff] }
 0x2b7   :  { %v6312_v34 = vpop.f32.mrb[224].mxu0  ;;  %v10332_v10 = vadd.f32 %v6423_v32, %v3893_v40  ;;  %4660 = vmatprep.mubr.bf16.mxu1 %v928_v42  ;;  %v301_v42 = vld [vmem:[%s11110_s0 + $0x878] sm:$0xff]  ;;  %v950_v30 = vpack.c.bf16 %v275_v5, %v250_v16  ;;  %v252_v32 = vld [vmem:[%s11110_s0 + $0x6f0] sm:$0xff] }
 0x2b8   :  { %v6313_v15 = vpop.f32.mrb[225].mxu0  ;;  %v952_v59 = vpack.c.bf16 %v277_v44, %v252_v32  ;;  %v378_v32 = vld [vmem:[%s11110_s0 + $0xae0] sm:$0xff] }
 0x2b9   :  { %v6314_v56 = vadd.f32 %v6313_v15, %v6312_v34  ;;  %v6315_v36 = vpop.f32.mrb[226].mxu0  ;;  %v6424_v52 = vpop.f32.mrb[224].mxu1 }
 0x2ba   :  { %v6316_v6 = vpop.f32.mrb[227].mxu0  ;;  %v6425_v33 = vpop.f32.mrb[225].mxu1 }
 0x2bb   :  { %v3898_v57 = vadd.f32 %v6314_v56, %v9867_v54  ;;  %v6317_v8 = vadd.f32 %v6316_v6, %v6315_v36  ;;  %v6426_v37 = vadd.f32 %v6425_v33, %v6424_v52  ;;  %v6427_v51 = vpop.f32.mrb[226].mxu1 }
 0x2bc   :  { %4500 = vmatmul.mubr.bf16.gmra.mrb[76].mxu0 %v925_v28  ;;  %v6428_v18 = vpop.f32.mrb[227].mxu1  ;;  %v303_v28 = vld [vmem:[%s11110_s0 + $0x888] sm:$0xff] }
 0x2bd   :  { %v3901_v21 = vadd.f32 %v6317_v8, %v9877_v63  ;;  %4507 = vmatprep.mubr.bf16.mxu0 %v951_v11  ;;  %v10354_v54 = vadd.f32 %v6426_v37, %v3898_v57  ;;  %v6429_v39 = vadd.f32 %v6428_v18, %v6427_v51  ;;  %v326_v63 = vld [vmem:[%s11110_s0 + $0x940] sm:$0xff]  ;;  %v978_v57 = vpack.c.bf16 %v328_v38, %v303_v28  ;;  %v325_v37 = vld [vmem:[%s11110_s0 + $0x938] sm:$0xff] }
 0x2be   :  { %4661 = vmatmul.mubr.bf16.gmra.mrb[76].mxu1 %v927_v4  ;;  %v976_v15 = vpack.c.bf16 %v326_v63, %v301_v42  ;;  %v300_v4 = vld [vmem:[%s11110_s0 + $0x870] sm:$0xff]  ;;  %v327_v42 = vld [vmem:[%s11110_s0 + $0x948] sm:$0xff] }
 0x2bf   :  { %v6318_v40 = vpop.f32.mrb[228].mxu0  ;;  %v10362_v25 = vadd.f32 %v6429_v39, %v3901_v21  ;;  %4668 = vmatprep.mubr.bf16.mxu1 %v953_v3  ;;  %v351_v3 = vld [vmem:[%s11110_s0 + $0xa08] sm:$0xff]  ;;  %v975_v5 = vpack.c.bf16 %v325_v37, %v300_v4  ;;  %v302_v39 = vld [vmem:[%s11110_s0 + $0x880] sm:$0xff] }
 0x2c0   :  { %v6319_v19 = vpop.f32.mrb[229].mxu0  ;;  %v977_v38 = vpack.c.bf16 %v327_v42, %v302_v39  ;;  %v428_v39 = vld [vmem:[%s11110_s0 + $0xc70] sm:$0xff] }
 0x2c1   :  { %v6320_v9 = vadd.f32 %v6319_v19, %v6318_v40  ;;  %v6321_v34 = vpop.f32.mrb[230].mxu0  ;;  %v6430_v46 = vpop.f32.mrb[228].mxu1 }
 0x2c2   :  { %v6322_v56 = vpop.f32.mrb[231].mxu0  ;;  %v6431_v22 = vpop.f32.mrb[229].mxu1 }
 0x2c3   :  { %v3906_v36 = vadd.f32 %v6320_v9, %v9903_v61  ;;  %v6323_v11 = vadd.f32 %v6322_v56, %v6321_v34  ;;  %v6432_v52 = vadd.f32 %v6431_v22, %v6430_v46  ;;  %v6433_v6 = vpop.f32.mrb[230].mxu1 }
 0x2c4   :  { %4508 = vmatmul.mubr.bf16.gmra.mrb[80].mxu0 %v950_v30  ;;  %v6434_v33 = vpop.f32.mrb[231].mxu1  ;;  %v353_v30 = vld [vmem:[%s11110_s0 + $0xa18] sm:$0xff] }
 0x2c5   :  { %v3909_v8 = vadd.f32 %v6323_v11, %v9911_v2  ;;  %4515 = vmatprep.mubr.bf16.mxu0 %v976_v15  ;;  %v10384_v61 = vadd.f32 %v6432_v52, %v3906_v36  ;;  %v6435_v51 = vadd.f32 %v6434_v33, %v6433_v6  ;;  %v376_v2 = vld [vmem:[%s11110_s0 + $0xad0] sm:$0xff]  ;;  %v1003_v36 = vpack.c.bf16 %v378_v32, %v353_v30  ;;  %v375_v52 = vld [vmem:[%s11110_s0 + $0xac8] sm:$0xff] }
 0x2c6   :  { %4669 = vmatmul.mubr.bf16.gmra.mrb[80].mxu1 %v952_v59  ;;  %v1001_v19 = vpack.c.bf16 %v376_v2, %v351_v3  ;;  %v350_v59 = vld [vmem:[%s11110_s0 + $0xa00] sm:$0xff]  ;;  %v377_v3 = vld [vmem:[%s11110_s0 + $0xad8] sm:$0xff] }
 0x2c7   :  { %v6324_v21 = vpop.f32.mrb[232].mxu0  ;;  %v10392_v18 = vadd.f32 %v6435_v51, %v3909_v8  ;;  %4676 = vmatprep.mubr.bf16.mxu1 %v978_v57  ;;  %v401_v57 = vld [vmem:[%s11110_s0 + $0xb98] sm:$0xff]  ;;  %v1000_v37 = vpack.c.bf16 %v375_v52, %v350_v59  ;;  %v352_v51 = vld [vmem:[%s11110_s0 + $0xa10] sm:$0xff] }
 0x2c8   :  { %v6325_v16 = vpop.f32.mrb[233].mxu0  ;;  %v1002_v32 = vpack.c.bf16 %v377_v3, %v352_v51  ;;  %v478_v51 = vld [vmem:[%s11110_s0 + $0xe00] sm:$0xff] }
 0x2c9   :  { %v6326_v63 = vadd.f32 %v6325_v16, %v6324_v21  ;;  %v6327_v40 = vpop.f32.mrb[234].mxu0  ;;  %v6436_v44 = vpop.f32.mrb[232].mxu1 }
 0x2ca   :  { %v6328_v9 = vpop.f32.mrb[235].mxu0  ;;  %v6437_v28 = vpop.f32.mrb[233].mxu1 }
 0x2cb   :  { %v3914_v34 = vadd.f32 %v6326_v63, %v9933_v7  ;;  %v6329_v15 = vadd.f32 %v6328_v9, %v6327_v40  ;;  %v6438_v46 = vadd.f32 %v6437_v28, %v6436_v44  ;;  %v6439_v56 = vpop.f32.mrb[234].mxu1 }
 0x2cc   :  { %4516 = vmatmul.mubr.bf16.gmra.mrb[84].mxu0 %v975_v5  ;;  %v6440_v22 = vpop.f32.mrb[235].mxu1  ;;  %v403_v5 = vld [vmem:[%s11110_s0 + $0xba8] sm:$0xff] }
 0x2cd   :  { %v3917_v11 = vadd.f32 %v6329_v15, %v9941_v58  ;;  %4523 = vmatprep.mubr.bf16.mxu0 %v1001_v19  ;;  %v10414_v7 = vadd.f32 %v6438_v46, %v3914_v34  ;;  %v6441_v6 = vadd.f32 %v6440_v22, %v6439_v56  ;;  %v426_v58 = vld [vmem:[%s11110_s0 + $0xc60] sm:$0xff]  ;;  %v1028_v34 = vpack.c.bf16 %v428_v39, %v403_v5  ;;  %v425_v46 = vld [vmem:[%s11110_s0 + $0xc58] sm:$0xff] }
 0x2ce   :  { %4677 = vmatmul.mubr.bf16.gmra.mrb[84].mxu1 %v977_v38  ;;  %v1026_v16 = vpack.c.bf16 %v426_v58, %v401_v57  ;;  %v400_v38 = vld [vmem:[%s11110_s0 + $0xb90] sm:$0xff]  ;;  %v427_v57 = vld [vmem:[%s11110_s0 + $0xc68] sm:$0xff] }
 0x2cf   :  { %v6330_v8 = vpop.f32.mrb[236].mxu0  ;;  %v10422_v33 = vadd.f32 %v6441_v6, %v3917_v11  ;;  %4684 = vmatprep.mubr.bf16.mxu1 %v1003_v36  ;;  %v451_v36 = vld [vmem:[%s11110_s0 + $0xd28] sm:$0xff]  ;;  %v1025_v52 = vpack.c.bf16 %v425_v46, %v400_v38  ;;  %v402_v6 = vld [vmem:[%s11110_s0 + $0xba0] sm:$0xff] }
 0x2d0   :  { %v6331_v4 = vpop.f32.mrb[237].mxu0  ;;  %v1027_v39 = vpack.c.bf16 %v427_v57, %v402_v6  ;;  %v528_v6 = vld [vmem:[%s11110_s0 + $0xf90] sm:$0xff] }
 0x2d1   :  { %v6332_v2 = vadd.f32 %v6331_v4, %v6330_v8  ;;  %v6333_v21 = vpop.f32.mrb[238].mxu0  ;;  %v6442_v42 = vpop.f32.mrb[236].mxu1 }
 0x2d2   :  { %v6334_v63 = vpop.f32.mrb[239].mxu0  ;;  %v6443_v30 = vpop.f32.mrb[237].mxu1 }
 0x2d3   :  { %v3922_v40 = vadd.f32 %v6332_v2, %v9963_v50  ;;  %v6335_v19 = vadd.f32 %v6334_v63, %v6333_v21  ;;  %v6444_v44 = vadd.f32 %v6443_v30, %v6442_v42  ;;  %v6445_v9 = vpop.f32.mrb[238].mxu1 }
 0x2d4   :  { %4524 = vmatmul.mubr.bf16.gmra.mrb[88].mxu0 %v1000_v37  ;;  %v6446_v28 = vpop.f32.mrb[239].mxu1  ;;  %v453_v37 = vld [vmem:[%s11110_s0 + $0xd38] sm:$0xff] }
 0x2d5   :  { %v3925_v15 = vadd.f32 %v6335_v19, %v9971_v49  ;;  %4531 = vmatprep.mubr.bf16.mxu0 %v1026_v16  ;;  %v10444_v50 = vadd.f32 %v6444_v44, %v3922_v40  ;;  %v6447_v56 = vadd.f32 %v6446_v28, %v6445_v9  ;;  %v476_v49 = vld [vmem:[%s11110_s0 + $0xdf0] sm:$0xff]  ;;  %v1053_v40 = vpack.c.bf16 %v478_v51, %v453_v37  ;;  %v475_v44 = vld [vmem:[%s11110_s0 + $0xde8] sm:$0xff] }
 0x2d6   :  { %4685 = vmatmul.mubr.bf16.gmra.mrb[88].mxu1 %v1002_v32  ;;  %v1051_v4 = vpack.c.bf16 %v476_v49, %v451_v36  ;;  %v450_v32 = vld [vmem:[%s11110_s0 + $0xd20] sm:$0xff]  ;;  %v477_v36 = vld [vmem:[%s11110_s0 + $0xdf8] sm:$0xff] }
 0x2d7   :  { %v6336_v11 = vpop.f32.mrb[240].mxu0  ;;  %v10452_v22 = vadd.f32 %v6447_v56, %v3925_v15  ;;  %4692 = vmatprep.mubr.bf16.mxu1 %v1028_v34  ;;  %v501_v34 = vld [vmem:[%s11110_s0 + $0xeb8] sm:$0xff]  ;;  %v1050_v46 = vpack.c.bf16 %v475_v44, %v450_v32  ;;  %v452_v56 = vld [vmem:[%s11110_s0 + $0xd30] sm:$0xff] }
 0x2d8   :  { %v6337_v59 = vpop.f32.mrb[241].mxu0  ;;  %v1052_v51 = vpack.c.bf16 %v477_v36, %v452_v56  ;;  %v578_v56 = vld [vmem:[%s11110_s0 + $0x1120] sm:$0xff] }
 0x2d9   :  { %v6338_v58 = vadd.f32 %v6337_v59, %v6336_v11  ;;  %v6339_v8 = vpop.f32.mrb[242].mxu0  ;;  %v6448_v3 = vpop.f32.mrb[240].mxu1 }
 0x2da   :  { %v6340_v2 = vpop.f32.mrb[243].mxu0  ;;  %v6449_v5 = vpop.f32.mrb[241].mxu1 }
 0x2db   :  { %v3930_v21 = vadd.f32 %v6338_v58, %v9993_v29  ;;  %v6341_v16 = vadd.f32 %v6340_v2, %v6339_v8  ;;  %v6450_v42 = vadd.f32 %v6449_v5, %v6448_v3  ;;  %v6451_v63 = vpop.f32.mrb[242].mxu1 }
 0x2dc   :  { %4532 = vmatmul.mubr.bf16.gmra.mrb[92].mxu0 %v1025_v52  ;;  %v6452_v30 = vpop.f32.mrb[243].mxu1  ;;  %v503_v52 = vld [vmem:[%s11110_s0 + $0xec8] sm:$0xff] }
 0x2dd   :  { %v3933_v19 = vadd.f32 %v6341_v16, %v10001_v27  ;;  %4539 = vmatprep.mubr.bf16.mxu0 %v1051_v4  ;;  %v10474_v29 = vadd.f32 %v6450_v42, %v3930_v21  ;;  %v6453_v9 = vadd.f32 %v6452_v30, %v6451_v63  ;;  %v526_v27 = vld [vmem:[%s11110_s0 + $0xf80] sm:$0xff]  ;;  %v1078_v21 = vpack.c.bf16 %v528_v6, %v503_v52  ;;  %v525_v42 = vld [vmem:[%s11110_s0 + $0xf78] sm:$0xff] }
 0x2de   :  { %4693 = vmatmul.mubr.bf16.gmra.mrb[92].mxu1 %v1027_v39  ;;  %v1076_v59 = vpack.c.bf16 %v526_v27, %v501_v34  ;;  %v500_v39 = vld [vmem:[%s11110_s0 + $0xeb0] sm:$0xff]  ;;  %v527_v34 = vld [vmem:[%s11110_s0 + $0xf88] sm:$0xff] }
 0x2df   :  { %v6342_v15 = vpop.f32.mrb[244].mxu0  ;;  %v10482_v28 = vadd.f32 %v6453_v9, %v3933_v19  ;;  %4700 = vmatprep.mubr.bf16.mxu1 %v1053_v40  ;;  %v551_v40 = vld [vmem:[%s11110_s0 + $0x1048] sm:$0xff]  ;;  %v1075_v44 = vpack.c.bf16 %v525_v42, %v500_v39  ;;  %v502_v9 = vld [vmem:[%s11110_s0 + $0xec0] sm:$0xff] }
 0x2e0   :  { %v6343_v38 = vpop.f32.mrb[245].mxu0  ;;  %v1077_v6 = vpack.c.bf16 %v527_v34, %v502_v9  ;;  %v628_v9 = vld [vmem:[%s11110_s0 + $0x12b0] sm:$0xff] }
 0x2e1   :  { %v6344_v49 = vadd.f32 %v6343_v38, %v6342_v15  ;;  %v6345_v11 = vpop.f32.mrb[246].mxu0  ;;  %v6454_v57 = vpop.f32.mrb[244].mxu1 }
 0x2e2   :  { %v6346_v58 = vpop.f32.mrb[247].mxu0  ;;  %v6455_v37 = vpop.f32.mrb[245].mxu1 }
 0x2e3   :  { %v3938_v8 = vadd.f32 %v6344_v49, %v10023_v14  ;;  %v6347_v4 = vadd.f32 %v6346_v58, %v6345_v11  ;;  %v6456_v3 = vadd.f32 %v6455_v37, %v6454_v57  ;;  %v6457_v2 = vpop.f32.mrb[246].mxu1 }
 0x2e4   :  { %4540 = vmatmul.mubr.bf16.gmra.mrb[96].mxu0 %v1050_v46  ;;  %v6458_v5 = vpop.f32.mrb[247].mxu1  ;;  %v553_v46 = vld [vmem:[%s11110_s0 + $0x1058] sm:$0xff] }
 0x2e5   :  { %v3941_v16 = vadd.f32 %v6347_v4, %v10031_v20  ;;  %4547 = vmatprep.mubr.bf16.mxu0 %v1076_v59  ;;  %v10504_v14 = vadd.f32 %v6456_v3, %v3938_v8  ;;  %v6459_v63 = vadd.f32 %v6458_v5, %v6457_v2  ;;  %v576_v20 = vld [vmem:[%s11110_s0 + $0x1110] sm:$0xff]  ;;  %v1103_v8 = vpack.c.bf16 %v578_v56, %v553_v46  ;;  %v575_v3 = vld [vmem:[%s11110_s0 + $0x1108] sm:$0xff] }
 0x2e6   :  { %4701 = vmatmul.mubr.bf16.gmra.mrb[96].mxu1 %v1052_v51  ;;  %v1101_v38 = vpack.c.bf16 %v576_v20, %v551_v40  ;;  %v550_v51 = vld [vmem:[%s11110_s0 + $0x1040] sm:$0xff]  ;;  %v577_v40 = vld [vmem:[%s11110_s0 + $0x1118] sm:$0xff] }
 0x2e7   :  { %v6348_v19 = vpop.f32.mrb[248].mxu0  ;;  %v10512_v30 = vadd.f32 %v6459_v63, %v3941_v16  ;;  %4708 = vmatprep.mubr.bf16.mxu1 %v1078_v21  ;;  %v601_v21 = vld [vmem:[%s11110_s0 + $0x11d8] sm:$0xff]  ;;  %v1100_v42 = vpack.c.bf16 %v575_v3, %v550_v51  ;;  %v552_v63 = vld [vmem:[%s11110_s0 + $0x1050] sm:$0xff] }
 0x2e8   :  { %v6349_v32 = vpop.f32.mrb[249].mxu0  ;;  %v1102_v56 = vpack.c.bf16 %v577_v40, %v552_v63  ;;  %v678_v63 = vld [vmem:[%s11110_s0 + $0x1440] sm:$0xff] }
 0x2e9   :  { %v6350_v27 = vadd.f32 %v6349_v32, %v6348_v19  ;;  %v6351_v15 = vpop.f32.mrb[250].mxu0  ;;  %v6460_v36 = vpop.f32.mrb[248].mxu1 }
 0x2ea   :  { %v6352_v49 = vpop.f32.mrb[251].mxu0  ;;  %v6461_v52 = vpop.f32.mrb[249].mxu1 }
 0x2eb   :  { %v3946_v11 = vadd.f32 %v6350_v27, %v10053_v60  ;;  %v6353_v59 = vadd.f32 %v6352_v49, %v6351_v15  ;;  %v6462_v57 = vadd.f32 %v6461_v52, %v6460_v36  ;;  %v6463_v58 = vpop.f32.mrb[250].mxu1 }
 0x2ec   :  { %4548 = vmatmul.mubr.bf16.gmra.mrb[100].mxu0 %v1075_v44  ;;  %v6464_v37 = vpop.f32.mrb[251].mxu1  ;;  %v603_v44 = vld [vmem:[%s11110_s0 + $0x11e8] sm:$0xff] }
 0x2ed   :  { %v3949_v4 = vadd.f32 %v6353_v59, %v10061_v12  ;;  %4555 = vmatprep.mubr.bf16.mxu0 %v1101_v38  ;;  %v10534_v60 = vadd.f32 %v6462_v57, %v3946_v11  ;;  %v6465_v2 = vadd.f32 %v6464_v37, %v6463_v58  ;;  %v626_v12 = vld [vmem:[%s11110_s0 + $0x12a0] sm:$0xff]  ;;  %v1128_v11 = vpack.c.bf16 %v628_v9, %v603_v44  ;;  %v625_v57 = vld [vmem:[%s11110_s0 + $0x1298] sm:$0xff] }
 0x2ee   :  { %4709 = vmatmul.mubr.bf16.gmra.mrb[100].mxu1 %v1077_v6  ;;  %v1126_v32 = vpack.c.bf16 %v626_v12, %v601_v21  ;;  %v600_v6 = vld [vmem:[%s11110_s0 + $0x11d0] sm:$0xff]  ;;  %v627_v21 = vld [vmem:[%s11110_s0 + $0x12a8] sm:$0xff] }
 0x2ef   :  { %v6354_v16 = vpop.f32.mrb[252].mxu0  ;;  %v10542_v5 = vadd.f32 %v6465_v2, %v3949_v4  ;;  %4716 = vmatprep.mubr.bf16.mxu1 %v1103_v8  ;;  %v651_v8 = vld [vmem:[%s11110_s0 + $0x1368] sm:$0xff]  ;;  %v1125_v3 = vpack.c.bf16 %v625_v57, %v600_v6  ;;  %v602_v2 = vld [vmem:[%s11110_s0 + $0x11e0] sm:$0xff] }
 0x2f0   :  { %v6355_v39 = vpop.f32.mrb[253].mxu0  ;;  %v1127_v9 = vpack.c.bf16 %v627_v21, %v602_v2  ;;  %v728_v2 = vld [vmem:[%s11110_s0 + $0x15d0] sm:$0xff] }
 0x2f1   :  { %v6356_v20 = vadd.f32 %v6355_v39, %v6354_v16  ;;  %v6357_v19 = vpop.f32.mrb[254].mxu0  ;;  %v6466_v34 = vpop.f32.mrb[252].mxu1 }
 0x2f2   :  { %v6358_v27 = vpop.f32.mrb[255].mxu0  ;;  %v6467_v46 = vpop.f32.mrb[253].mxu1 }
 0x2f3   :  { %v3954_v15 = vadd.f32 %v6356_v20, %v10083_v47  ;;  %v6359_v38 = vadd.f32 %v6358_v27, %v6357_v19  ;;  %v6468_v36 = vadd.f32 %v6467_v46, %v6466_v34  ;;  %v6469_v49 = vpop.f32.mrb[254].mxu1 }
 0x2f4   :  { %4556 = vmatmul.mubr.bf16.gmra.mrb[104].mxu0 %v1100_v42  ;;  %v6470_v52 = vpop.f32.mrb[255].mxu1  ;;  %v653_v42 = vld [vmem:[%s11110_s0 + $0x1378] sm:$0xff] }
 0x2f5   :  { %v3957_v59 = vadd.f32 %v6359_v38, %v10091_v45  ;;  %4563 = vmatprep.mubr.bf16.mxu0 %v1126_v32  ;;  %v10564_v47 = vadd.f32 %v6468_v36, %v3954_v15  ;;  %v6471_v58 = vadd.f32 %v6470_v52, %v6469_v49  ;;  %v676_v45 = vld [vmem:[%s11110_s0 + $0x1430] sm:$0xff]  ;;  %v1153_v15 = vpack.c.bf16 %v678_v63, %v653_v42  ;;  %v675_v36 = vld [vmem:[%s11110_s0 + $0x1428] sm:$0xff] }
 0x2f6   :  { %4717 = vmatmul.mubr.bf16.gmra.mrb[104].mxu1 %v1102_v56  ;;  %v1151_v39 = vpack.c.bf16 %v676_v45, %v651_v8  ;;  %v650_v56 = vld [vmem:[%s11110_s0 + $0x1360] sm:$0xff]  ;;  %v677_v8 = vld [vmem:[%s11110_s0 + $0x1438] sm:$0xff] }
 0x2f7   :  { %v6488_v4 = vpop.f32.mrb[0].mxu0  ;;  %v10572_v37 = vadd.f32 %v6471_v58, %v3957_v59  ;;  %4724 = vmatprep.mubr.bf16.mxu1 %v1128_v11  ;;  %v701_v11 = vld [vmem:[%s11110_s0 + $0x14f8] sm:$0xff]  ;;  %v1150_v57 = vpack.c.bf16 %v675_v36, %v650_v56  ;;  %v652_v58 = vld [vmem:[%s11110_s0 + $0x1370] sm:$0xff] }
 0x2f8   :  { %v6489_v51 = vpop.f32.mrb[1].mxu0  ;;  %v1152_v63 = vpack.c.bf16 %v677_v8, %v652_v58  ;;  %v753_v58 = vld [vmem:[%s11110_s0 + $0x1698] sm:$0xff]  ;;  %v778_v8 = vld [vmem:[%s11110_s0 + $0x1760] sm:$0xff] }
 0x2f9   :  { %v6490_v12 = vadd.f32 %v6489_v51, %v6488_v4  ;;  %v6491_v16 = vpop.f32.mrb[2].mxu0  ;;  %v6600_v40 = vpop.f32.mrb[0].mxu1 }
 0x2fa   :  { %v6492_v20 = vpop.f32.mrb[3].mxu0  ;;  %v6601_v44 = vpop.f32.mrb[1].mxu1 }
 0x2fb   :  { %v4156_v19 = vadd.f32 %v6490_v12, %v10113_v31  ;;  %v6493_v32 = vadd.f32 %v6492_v20, %v6491_v16  ;;  %v6602_v34 = vadd.f32 %v6601_v44, %v6600_v40  ;;  %v6603_v27 = vpop.f32.mrb[2].mxu1 }
 0x2fc   :  { %4564 = vmatmul.mubr.bf16.gmra.mrb[108].mxu0 %v1125_v3  ;;  %v6604_v46 = vpop.f32.mrb[3].mxu1  ;;  %v703_v3 = vld [vmem:[%s11110_s0 + $0x1508] sm:$0xff] }
 0x2fd   :  { %v4159_v38 = vadd.f32 %v6493_v32, %v10121_v48  ;;  %4571 = vmatprep.mubr.bf16.mxu0 %v1151_v39  ;;  %v10594_v31 = vadd.f32 %v6602_v34, %v4156_v19  ;;  %v6605_v49 = vadd.f32 %v6604_v46, %v6603_v27  ;;  %v726_v48 = vld [vmem:[%s11110_s0 + $0x15c0] sm:$0xff]  ;;  %v1178_v19 = vpack.c.bf16 %v728_v2, %v703_v3  ;;  %v725_v34 = vld [vmem:[%s11110_s0 + $0x15b8] sm:$0xff] }
 0x2fe   :  { %4725 = vmatmul.mubr.bf16.gmra.mrb[108].mxu1 %v1127_v9  ;;  %v1176_v51 = vpack.c.bf16 %v726_v48, %v701_v11  ;;  %v700_v9 = vld [vmem:[%s11110_s0 + $0x14f0] sm:$0xff]  ;;  %v702_v11 = vld [vmem:[%s11110_s0 + $0x1500] sm:$0xff]  ;;  %v727_v48 = vld [vmem:[%s11110_s0 + $0x15c8] sm:$0xff] }
 0x2ff   :  { %v6494_v59 = vpop.f32.mrb[4].mxu0  ;;  %v10602_v52 = vadd.f32 %v6605_v49, %v4159_v38  ;;  %4732 = vmatprep.mubr.bf16.mxu1 %v1153_v15  ;;  %v776_v38 = vld [vmem:[%s11110_s0 + $0x1750] sm:$0xff]  ;;  %v1175_v49 = vpack.c.bf16 %v725_v34, %v700_v9 }
 0x300   :  { %v6495_v6 = vpop.f32.mrb[5].mxu0 }
 0x301   :  { %v6496_v45 = vadd.f32 %v6495_v6, %v6494_v59  ;;  %v6497_v4 = vpop.f32.mrb[6].mxu0  ;;  %v6606_v21 = vpop.f32.mrb[4].mxu1 }
 0x302   :  { %v6498_v12 = vpop.f32.mrb[7].mxu0  ;;  %v6607_v42 = vpop.f32.mrb[5].mxu1 }
 0x303   :  { %v4164_v16 = vadd.f32 %v6496_v45, %v10143_v26  ;;  %v6499_v39 = vadd.f32 %v6498_v12, %v6497_v4  ;;  %v6608_v40 = vadd.f32 %v6607_v42, %v6606_v21  ;;  %v6609_v20 = vpop.f32.mrb[6].mxu1  ;;  %v7307_v26 = vld [vmem:[%s11113_s3] sm:$0xff]   ;;  %v1177_v21 = vpack.c.bf16 %v727_v48, %v702_v11  ;;  %v828_v11 = vld [vmem:[%s11110_s0 + $0x18f0] sm:$0xff] }
 0x304   :  { %4572 = vmatmul.mubr.bf16.gmra.mrb[112].mxu0 %v1150_v57  ;;  %v6610_v44 = vpop.f32.mrb[7].mxu1  ;;  %7029 = vmatprep.subr.bf16.mxu1 %v7307_v26 }
 0x305   :  { %v4167_v32 = vadd.f32 %v6499_v39, %v10151_v62  ;;  %4579 = vmatprep.mubr.bf16.mxu0 %v1176_v51  ;;  %v10627_v27 = vadd.f32 %v6608_v40, %v4164_v16  ;;  %v6611_v15 = vadd.f32 %v6610_v44, %v6609_v20  ;;  %v751_v62 = vld [vmem:[%s11110_s0 + $0x1688] sm:$0xff]  ;;  %7030 = vmatpush3.bf16.msra.mxu1 %v7307_v26  ;;  %v750_v40 = vld [vmem:[%s11110_s0 + $0x1680] sm:$0xff] }
 0x306   :  { %4733 = vmatmul.mubr.bf16.gmra.mrb[112].mxu1 %v1152_v63  ;;  %v1201_v57 = vpack.c.bf16 %v776_v38, %v751_v62  ;;  %v1203_v39 = vpack.c.bf16 %v778_v8, %v753_v58  ;;  %v775_v20 = vld [vmem:[%s11110_s0 + $0x1748] sm:$0xff]  ;;  %v777_v62 = vld [vmem:[%s11110_s0 + $0x1758] sm:$0xff] }
 0x307   :  { %v6500_v46 = vpop.f32.mrb[8].mxu0  ;;  %v10635_v56 = vadd.f32 %v6611_v15, %v4167_v32  ;;  %4740 = vmatprep.mubr.bf16.mxu1 %v1178_v19  ;;  %v801_v32 = vld [vmem:[%s11110_s0 + $0x1818] sm:$0xff]  ;;  %v1200_v26 = vpack.c.bf16 %v775_v20, %v750_v40  ;;  %v752_v15 = vld [vmem:[%s11110_s0 + $0x1690] sm:$0xff] }
 0x308   :  { %v6501_v36 = vpop.f32.mrb[9].mxu0  ;;  %v1202_v8 = vpack.c.bf16 %v777_v62, %v752_v15 }
 0x309   :  { %v6502_v59 = vadd.f32 %v6501_v36, %v6500_v46  ;;  %v6503_v6 = vpop.f32.mrb[10].mxu0  ;;  %v6612_v45 = vpop.f32.mrb[8].mxu1 }
 0x30a   :  { %v6504_v4 = vpop.f32.mrb[11].mxu0  ;;  %v6613_v2 = vpop.f32.mrb[9].mxu1 }
 0x30b   :  { %v4172_v51 = vadd.f32 %v6502_v59, %v10173_v17  ;;  %v6505_v3 = vadd.f32 %v6504_v4, %v6503_v6  ;;  %v6614_v12 = vadd.f32 %v6613_v2, %v6612_v45  ;;  %v6615_v16 = vpop.f32.mrb[10].mxu1 }
 0x30c   :  { %4580 = vmatmul.mubr.bf16.gmra.mrb[116].mxu0 %v1175_v49  ;;  %v6616_v63 = vpop.f32.mrb[11].mxu1  ;;  %v803_v49 = vld [vmem:[%s11110_s0 + $0x1828] sm:$0xff] }
 0x30d   :  { %v4175_v42 = vadd.f32 %v6505_v3, %v10181_v35  ;;  %4587 = vmatprep.mubr.bf16.mxu0 %v1201_v57  ;;  %v10657_v17 = vadd.f32 %v6614_v12, %v4172_v51  ;;  %v6617_v19 = vadd.f32 %v6616_v63, %v6615_v16  ;;  %v826_v35 = vld [vmem:[%s11110_s0 + $0x18e0] sm:$0xff]  ;;  %v1228_v51 = vpack.c.bf16 %v828_v11, %v803_v49  ;;  %v825_v12 = vld [vmem:[%s11110_s0 + $0x18d8] sm:$0xff] }
 0x30e   :  { %4741 = vmatmul.mubr.bf16.gmra.mrb[116].mxu1 %v1177_v21  ;;  %v1226_v36 = vpack.c.bf16 %v826_v35, %v801_v32  ;;  %v800_v21 = vld [vmem:[%s11110_s0 + $0x1810] sm:$0xff]  ;;  %v802_v32 = vld [vmem:[%s11110_s0 + $0x1820] sm:$0xff]  ;;  %v827_v35 = vld [vmem:[%s11110_s0 + $0x18e8] sm:$0xff] }
 0x30f   :  { %v6506_v44 = vpop.f32.mrb[12].mxu0  ;;  %v10665_v9 = vadd.f32 %v6617_v19, %v4175_v42  ;;  %4748 = vmatprep.mubr.bf16.mxu1 %v1203_v39  ;;  %v79_v42 = vld [vmem:[%s11110_s0 + $0x188] sm:$0xff]  ;;  %v1225_v19 = vpack.c.bf16 %v825_v12, %v800_v21  ;;  %v1227_v49 = vpack.c.bf16 %v827_v35, %v802_v32 }
 0x310   :  { %v6507_v34 = vpop.f32.mrb[13].mxu0 }
 0x311   :  { %v6508_v38 = vadd.f32 %v6507_v34, %v6506_v44  ;;  %v6509_v46 = vpop.f32.mrb[14].mxu0  ;;  %v6618_v48 = vpop.f32.mrb[12].mxu1 }
 0x312   :  { %v6510_v59 = vpop.f32.mrb[15].mxu0  ;;  %v6619_v58 = vpop.f32.mrb[13].mxu1 }
 0x313   :  { %v4180_v6 = vadd.f32 %v6508_v38, %v10203_v1  ;;  %v6511_v57 = vadd.f32 %v6510_v59, %v6509_v46  ;;  %v6620_v45 = vadd.f32 %v6619_v58, %v6618_v48  ;;  %v6621_v4 = vpop.f32.mrb[14].mxu1  ;;  %v7308_v1 = vld [vmem:[%s11113_s3 + $0x8] sm:$0xff]   ;;  %v129_v58 = vld [vmem:[%s11110_s0 + $0x318] sm:$0xff] }
 0x314   :  { %4588 = vmatmul.mubr.bf16.gmra.mrb[120].mxu0 %v1200_v26  ;;  %v6622_v2 = vpop.f32.mrb[15].mxu1  ;;  %7031 = vmatprep.subr.bf16.mxu1 %v7308_v1 }
 0x315   :  { %v4183_v3 = vadd.f32 %v6511_v57, %v10211_v23  ;;  %4595 = vmatprep.mubr.bf16.mxu0 %v1226_v36  ;;  %v10690_v16 = vadd.f32 %v6620_v45, %v4180_v6  ;;  %v6623_v39 = vadd.f32 %v6622_v2, %v6621_v4  ;;  %v54_v23 = vld [vmem:[%s11110_s0 + $0xc0] sm:$0xff]  ;;  %7032 = vmatpush3.bf16.msra.mxu1 %v7308_v1  ;;  %v104_v57 = vld [vmem:[%s11110_s0 + $0x250] sm:$0xff] }
 0x316   :  { %4749 = vmatmul.mubr.bf16.gmra.mrb[120].mxu1 %v1202_v8  ;;  %v854_v26 = vpack.c.bf16 %v79_v42, %v54_v23  ;;  %v154_v45 = vld [vmem:[%s11110_s0 + $0x3e0] sm:$0xff]  ;;  %v879_v2 = vpack.c.bf16 %v129_v58, %v104_v57 }
 0x317   :  { %v6512_v63 = vpop.f32.mrb[16].mxu0  ;;  %v10698_v40 = vadd.f32 %v6623_v39, %v4183_v3  ;;  %4756 = vmatprep.mubr.bf16.mxu1 %v1228_v51 }
 0x318   :  { %v6513_v20 = vpop.f32.mrb[17].mxu0 }
 0x319   :  { %v6514_v44 = vadd.f32 %v6513_v20, %v6512_v63  ;;  %v6515_v34 = vpop.f32.mrb[18].mxu0  ;;  %v6624_v15 = vpop.f32.mrb[16].mxu1 }
 0x31a   :  { %v6516_v62 = vpop.f32.mrb[19].mxu0  ;;  %v6625_v36 = vpop.f32.mrb[17].mxu1 }
 0x31b   :  { %v4188_v38 = vadd.f32 %v6514_v44, %v10233_v55  ;;  %v6517_v46 = vadd.f32 %v6516_v62, %v6515_v34  ;;  %v6626_v11 = vadd.f32 %v6625_v36, %v6624_v15  ;;  %v6627_v48 = vpop.f32.mrb[18].mxu1  ;;  %v204_v34 = vld [vmem:[%s11110_s0 + $0x570] sm:$0xff] }
 0x31c   :  { %4596 = vmatmul.mubr.bf16.gmra.mrb[124].mxu0 %v1225_v19  ;;  %v6628_v6 = vpop.f32.mrb[19].mxu1 }
 0x31d   :  { %v4191_v59 = vadd.f32 %v6517_v46, %v10241_v13  ;;  %6997 = vmatprep.mubr.msk.bf16.mxu0 %vm2777_vm2, %v854_v26  ;;  %v10715_v55 = vadd.f32 %v6626_v11, %v4188_v38  ;;  %v6629_v8 = vadd.f32 %v6628_v6, %v6627_v48  ;;  %v179_v13 = vld [vmem:[%s11110_s0 + $0x4a8] sm:$0xff]  ;;  %v229_v26 = vld [vmem:[%s11110_s0 + $0x638] sm:$0xff] }
 0x31e   :  { %4757 = vmatmul.mubr.bf16.gmra.mrb[124].mxu1 %v1227_v49  ;;  %v904_v1 = vpack.c.bf16 %v179_v13, %v154_v45  ;;  %v279_v38 = vld [vmem:[%s11110_s0 + $0x7c8] sm:$0xff]  ;;  %v929_v11 = vpack.c.bf16 %v229_v26, %v204_v34 }
 0x31f   :  { %v6518_v4 = vpop.f32.mrb[20].mxu0  ;;  %v10723_v51 = vadd.f32 %v6629_v8, %v4191_v59 }
 0x320   :  { %v6519_v3 = vpop.f32.mrb[21].mxu0 }
 0x321   :  { %v6520_v21 = vadd.f32 %v6519_v3, %v6518_v4  ;;  %v6521_v12 = vpop.f32.mrb[22].mxu0  ;;  %v6630_v39 = vpop.f32.mrb[20].mxu1 }
 0x322   :  { %v6522_v23 = vpop.f32.mrb[23].mxu0  ;;  %v6631_v20 = vpop.f32.mrb[21].mxu1 }
 0x323   :  { %v4196_v42 = vadd.f32 %v6520_v21, %v10264_v43  ;;  %v6523_v63 = vadd.f32 %v6522_v23, %v6521_v12  ;;  %v6632_v19 = vadd.f32 %v6631_v20, %v6630_v39  ;;  %v6633_v32 = vpop.f32.mrb[22].mxu1  ;;  %v7309_v43 = vld [vmem:[%s11113_s3 + $0x10] sm:$0xff]   ;;  %v354_v23 = vld [vmem:[%s11110_s0 + $0xa20] sm:$0xff] }
 0x324   :  { %6998 = vmatmul.mubr.msk.bf16.vlgmr.msra.gmra.mrb[128].mxu0 %vm2777_vm2, %v879_v2  ;;  %v6634_v44 = vpop.f32.mrb[23].mxu1  ;;  %7033 = vmatprep.subr.bf16.mxu1 %v7309_v43  ;;  %v304_v12 = vld [vmem:[%s11110_s0 + $0x890] sm:$0xff] }
 0x325   :  { %v4199_v35 = vadd.f32 %v6523_v63, %v10272_v0  ;;  %7001 = vmatprep.mubr.msk.bf16.mxu0 %vm2777_vm2, %v904_v1  ;;  %v10738_v15 = vadd.f32 %v6632_v19, %v4196_v42  ;;  %v6635_v62 = vadd.f32 %v6634_v44, %v6633_v32  ;;  %v254_v0 = vld [vmem:[%s11110_s0 + $0x700] sm:$0xff]  ;;  %7034 = vmatpush3.bf16.msra.mxu1 %v7309_v43  ;;  %v329_v1 = vld [vmem:[%s11110_s0 + $0x958] sm:$0xff] }
 0x326   :  { %v954_v6 = vpack.c.bf16 %v279_v38, %v254_v0  ;;  %v979_v19 = vpack.c.bf16 %v329_v1, %v304_v12 }
 0x327   :  { %v6524_v46 = vpop.f32.mrb[24].mxu0  ;;  %v10746_v36 = vadd.f32 %v6635_v62, %v4199_v35 }
 0x328   :  { %v6525_v49 = vpop.f32.mrb[25].mxu0 }
 0x329   :  { %v6526_v48 = vadd.f32 %v6525_v49, %v6524_v46  ;;  %v6527_v59 = vpop.f32.mrb[26].mxu0  ;;  %v6636_v57 = vpop.f32.mrb[24].mxu1 }
 0x32a   :  { %v6528_v58 = vpop.f32.mrb[27].mxu0  ;;  %v6637_v13 = vpop.f32.mrb[25].mxu1 }
 0x32b   :  { %v4204_v8 = vadd.f32 %v6526_v48, %v10294_v41  ;;  %v6529_v45 = vadd.f32 %v6528_v58, %v6527_v59  ;;  %v6638_v4 = vadd.f32 %v6637_v13, %v6636_v57  ;;  %v6639_v3 = vpop.f32.mrb[26].mxu1  ;;  %v404_v48 = vld [vmem:[%s11110_s0 + $0xbb0] sm:$0xff]  ;;  %v429_v59 = vld [vmem:[%s11110_s0 + $0xc78] sm:$0xff]  ;;  %v479_v58 = vld [vmem:[%s11110_s0 + $0xe08] sm:$0xff] }
 0x32c   :  { %7002 = vmatmul.mubr.msk.bf16.gmra.mrb[132].mxu0 %vm2777_vm2, %v929_v11  ;;  %v6640_v21 = vpop.f32.mrb[27].mxu1 }
 0x32d   :  { %v4207_v2 = vadd.f32 %v6529_v45, %v10302_v53  ;;  %7005 = vmatprep.mubr.msk.bf16.mxu0 %vm2777_vm2, %v954_v6  ;;  %v10758_v41 = vadd.f32 %v6638_v4, %v4204_v8  ;;  %v6641_v39 = vadd.f32 %v6640_v21, %v6639_v3  ;;  %v379_v53 = vld [vmem:[%s11110_s0 + $0xae8] sm:$0xff]  ;;  %v1029_v4 = vpack.c.bf16 %v429_v59, %v404_v48 }
 0x32e   :  { %v1004_v44 = vpack.c.bf16 %v379_v53, %v354_v23 }
 0x32f   :  { %v6530_v42 = vpop.f32.mrb[28].mxu0  ;;  %v10766_v63 = vadd.f32 %v6641_v39, %v4207_v2 }
 0x330   :  { %v6531_v20 = vpop.f32.mrb[29].mxu0 }
 0x331   :  { %v6532_v32 = vadd.f32 %v6531_v20, %v6530_v42  ;;  %v6533_v35 = vpop.f32.mrb[30].mxu0  ;;  %v6642_v34 = vpop.f32.mrb[28].mxu1 }
 0x332   :  { %v6534_v26 = vpop.f32.mrb[31].mxu0  ;;  %v6643_v0 = vpop.f32.mrb[29].mxu1 }
 0x333   :  { %v4212_v43 = vadd.f32 %v6532_v32, %v10324_v24  ;;  %v6535_v62 = vadd.f32 %v6534_v26, %v6533_v35  ;;  %v6644_v38 = vadd.f32 %v6643_v0, %v6642_v34  ;;  %v6645_v46 = vpop.f32.mrb[30].mxu1  ;;  %v7310_v24 = vld [vmem:[%s11113_s3 + $0x18] sm:$0xff]   ;;  %v504_v35 = vld [vmem:[%s11110_s0 + $0xed0] sm:$0xff]  ;;  %v554_v26 = vld [vmem:[%s11110_s0 + $0x1060] sm:$0xff] }
 0x334   :  { %7006 = vmatmul.mubr.msk.bf16.gmra.mrb[136].mxu0 %vm2777_vm2, %v979_v19  ;;  %v6646_v11 = vpop.f32.mrb[31].mxu1  ;;  %7035 = vmatprep.subr.bf16.mxu1 %v7310_v24 }
 0x335   :  { %v4215_v49 = vadd.f32 %v6535_v62, %v10332_v10  ;;  %7009 = vmatprep.mubr.msk.bf16.mxu0 %vm2777_vm2, %v1004_v44  ;;  %v10781_v6 = vadd.f32 %v6644_v38, %v4212_v43  ;;  %v6647_v57 = vadd.f32 %v6646_v11, %v6645_v46  ;;  %v454_v10 = vld [vmem:[%s11110_s0 + $0xd40] sm:$0xff]  ;;  %7036 = vmatpush3.bf16.msra.mxu1 %v7310_v24  ;;  %v529_v44 = vld [vmem:[%s11110_s0 + $0xf98] sm:$0xff] }
 0x336   :  { %v1054_v21 = vpack.c.bf16 %v479_v58, %v454_v10  ;;  %v1079_v38 = vpack.c.bf16 %v529_v44, %v504_v35 }
 0x337   :  { %v6536_v8 = vpop.f32.mrb[32].mxu0  ;;  %v10789_v45 = vadd.f32 %v6647_v57, %v4215_v49 }
 0x338   :  { %v6537_v13 = vpop.f32.mrb[33].mxu0 }
 0x339   :  { %v6538_v3 = vadd.f32 %v6537_v13, %v6536_v8  ;;  %v6539_v2 = vpop.f32.mrb[34].mxu0  ;;  %v6648_v12 = vpop.f32.mrb[32].mxu1 }
 0x33a   :  { %v6540_v1 = vpop.f32.mrb[35].mxu0  ;;  %v6649_v53 = vpop.f32.mrb[33].mxu1 }
 0x33b   :  { %v4220_v39 = vadd.f32 %v6538_v3, %v10354_v54  ;;  %v6541_v23 = vadd.f32 %v6540_v1, %v6539_v2  ;;  %v6650_v42 = vadd.f32 %v6649_v53, %v6648_v12  ;;  %v6651_v20 = vpop.f32.mrb[34].mxu1  ;;  %v604_v3 = vld [vmem:[%s11110_s0 + $0x11f0] sm:$0xff]  ;;  %v629_v2 = vld [vmem:[%s11110_s0 + $0x12b8] sm:$0xff]  ;;  %v679_v1 = vld [vmem:[%s11110_s0 + $0x1448] sm:$0xff] }
 0x33c   :  { %7010 = vmatmul.mubr.msk.bf16.gmra.mrb[140].mxu0 %vm2777_vm2, %v1029_v4  ;;  %v6652_v32 = vpop.f32.mrb[35].mxu1 }
 0x33d   :  { %v4223_v19 = vadd.f32 %v6541_v23, %v10362_v25  ;;  %7013 = vmatprep.mubr.msk.bf16.mxu0 %vm2777_vm2, %v1054_v21  ;;  %v10801_v54 = vadd.f32 %v6650_v42, %v4220_v39  ;;  %v6653_v34 = vadd.f32 %v6652_v32, %v6651_v20  ;;  %v579_v25 = vld [vmem:[%s11110_s0 + $0x1128] sm:$0xff]  ;;  %v1129_v42 = vpack.c.bf16 %v629_v2, %v604_v3 }
 0x33e   :  { %v1104_v11 = vpack.c.bf16 %v579_v25, %v554_v26 }
 0x33f   :  { %v6542_v43 = vpop.f32.mrb[36].mxu0  ;;  %v10809_v62 = vadd.f32 %v6653_v34, %v4223_v19 }
 0x340   :  { %v6543_v0 = vpop.f32.mrb[37].mxu0 }
 0x341   :  { %v6544_v46 = vadd.f32 %v6543_v0, %v6542_v43  ;;  %v6545_v49 = vpop.f32.mrb[38].mxu0  ;;  %v6654_v48 = vpop.f32.mrb[36].mxu1 }
 0x342   :  { %v6546_v59 = vpop.f32.mrb[39].mxu0  ;;  %v6655_v10 = vpop.f32.mrb[37].mxu1 }
 0x343   :  { %v4228_v24 = vadd.f32 %v6544_v46, %v10384_v61  ;;  %v6547_v57 = vadd.f32 %v6546_v59, %v6545_v49  ;;  %v6656_v58 = vadd.f32 %v6655_v10, %v6654_v48  ;;  %v6657_v8 = vpop.f32.mrb[38].mxu1  ;;  %v7311_v61 = vld [vmem:[%s11113_s3 + $0x20] sm:$0xff]   ;;  %v704_v49 = vld [vmem:[%s11110_s0 + $0x1510] sm:$0xff] }
 0x344   :  { %7014 = vmatmul.mubr.msk.bf16.gmra.mrb[144].mxu0 %vm2777_vm2, %v1079_v38  ;;  %v6658_v4 = vpop.f32.mrb[39].mxu1  ;;  %7037 = vmatprep.subr.bf16.mxu1 %v7311_v61  ;;  %v754_v59 = vld [vmem:[%s11110_s0 + $0x16a0] sm:$0xff] }
 0x345   :  { %v4231_v13 = vadd.f32 %v6547_v57, %v10392_v18  ;;  %7017 = vmatprep.mubr.msk.bf16.mxu0 %vm2777_vm2, %v1104_v11  ;;  %v10824_v21 = vadd.f32 %v6656_v58, %v4228_v24  ;;  %v6659_v12 = vadd.f32 %v6658_v4, %v6657_v8  ;;  %v654_v18 = vld [vmem:[%s11110_s0 + $0x1380] sm:$0xff]  ;;  %7038 = vmatpush3.bf16.msra.mxu1 %v7311_v61  ;;  %v729_v11 = vld [vmem:[%s11110_s0 + $0x15d8] sm:$0xff] }
 0x346   :  { %v1154_v32 = vpack.c.bf16 %v679_v1, %v654_v18  ;;  %v1179_v58 = vpack.c.bf16 %v729_v11, %v704_v49 }
 0x347   :  { %v6548_v39 = vpop.f32.mrb[40].mxu0  ;;  %v10832_v23 = vadd.f32 %v6659_v12, %v4231_v13 }
 0x348   :  { %v6549_v53 = vpop.f32.mrb[41].mxu0 }
 0x349   :  { %v6550_v20 = vadd.f32 %v6549_v53, %v6548_v39  ;;  %v6551_v19 = vpop.f32.mrb[42].mxu0  ;;  %v6660_v35 = vpop.f32.mrb[40].mxu1 }
 0x34a   :  { %v6552_v44 = vpop.f32.mrb[43].mxu0  ;;  %v6661_v25 = vpop.f32.mrb[41].mxu1 }
 0x34b   :  { %v4236_v34 = vadd.f32 %v6550_v20, %v10414_v7  ;;  %v6553_v26 = vadd.f32 %v6552_v44, %v6551_v19  ;;  %v6662_v43 = vadd.f32 %v6661_v25, %v6660_v35  ;;  %v6663_v0 = vpop.f32.mrb[42].mxu1  ;;  %v804_v20 = vld [vmem:[%s11110_s0 + $0x1830] sm:$0xff]  ;;  %v829_v19 = vld [vmem:[%s11110_s0 + $0x18f8] sm:$0xff] }
 0x34c   :  { %7018 = vmatmul.mubr.msk.bf16.gmra.mrb[148].mxu0 %vm2777_vm2, %v1129_v42  ;;  %v6664_v46 = vpop.f32.mrb[43].mxu1 }
 0x34d   :  { %v4239_v38 = vadd.f32 %v6553_v26, %v10422_v33  ;;  %7021 = vmatprep.mubr.msk.bf16.mxu0 %vm2777_vm2, %v1154_v32  ;;  %v10844_v7 = vadd.f32 %v6662_v43, %v4236_v34  ;;  %v6665_v48 = vadd.f32 %v6664_v46, %v6663_v0  ;;  %v779_v33 = vld [vmem:[%s11110_s0 + $0x1768] sm:$0xff]  ;;  %v1229_v26 = vpack.c.bf16 %v829_v19, %v804_v20  ;;  %v7313_v20 = vld [vmem:[%s11113_s3 + $0x30] sm:$0xff]  }
 0x34e   :  { %v1204_v4 = vpack.c.bf16 %v779_v33, %v754_v59 }
 0x34f   :  { %v6554_v24 = vpop.f32.mrb[44].mxu0  ;;  %v10852_v57 = vadd.f32 %v6665_v48, %v4239_v38 }
 0x350   :  { %v6555_v10 = vpop.f32.mrb[45].mxu0 }
 0x351   :  { %v6556_v8 = vadd.f32 %v6555_v10, %v6554_v24  ;;  %v6557_v13 = vpop.f32.mrb[46].mxu0  ;;  %v6666_v3 = vpop.f32.mrb[44].mxu1 }
 0x352   :  { %v6558_v2 = vpop.f32.mrb[47].mxu0  ;;  %v6667_v18 = vpop.f32.mrb[45].mxu1 }
 0x353   :  { %v4244_v61 = vadd.f32 %v6556_v8, %v10444_v50  ;;  %v6559_v12 = vadd.f32 %v6558_v2, %v6557_v13  ;;  %v6668_v1 = vadd.f32 %v6667_v18, %v6666_v3  ;;  %v6669_v39 = vpop.f32.mrb[46].mxu1  ;;  %v7312_v50 = vld [vmem:[%s11113_s3 + $0x28] sm:$0xff]  }
 0x354   :  { %7022 = vmatmul.mubr.msk.bf16.gmra.mrb[152].mxu0 %vm2777_vm2, %v1179_v58  ;;  %v6670_v42 = vpop.f32.mrb[47].mxu1  ;;  %7039 = vmatprep.subr.bf16.mxu1 %v7312_v50 }
 0x355   :  { %v4247_v53 = vadd.f32 %v6559_v12, %v10452_v22  ;;  %7025 = vmatprep.mubr.msk.bf16.mxu0 %vm2777_vm2, %v1204_v4  ;;  %v10867_v32 = vadd.f32 %v6668_v1, %v4244_v61  ;;  %v6671_v35 = vadd.f32 %v6670_v42, %v6669_v39  ;;  %7040 = vmatpush3.bf16.msra.mxu1 %v7312_v50 }
 0x356   :  { %7041 = vmatprep.subr.bf16.mxu1 %v7313_v20 }
 0x357   :  { %v6560_v44 = vpop.f32.mrb[48].mxu0  ;;  %v10869_v22 = vadd.f32 %v6671_v35, %v4247_v53 }
 0x358   :  { %v6561_v34 = vpop.f32.mrb[49].mxu0 }
 0x359   :  { %v6562_v25 = vadd.f32 %v6561_v34, %v6560_v44  ;;  %v6563_v43 = vpop.f32.mrb[50].mxu0  ;;  %v6672_v0 = vpop.f32.mrb[48].mxu1  ;;  %7042 = vmatpush3.bf16.msra.mxu1 %v7313_v20 }
 0x35a   :  { %v6564_v38 = vpop.f32.mrb[51].mxu0  ;;  %v6673_v11 = vpop.f32.mrb[49].mxu1 }
 0x35b   :  { %v4252_v46 = vadd.f32 %v6562_v25, %v10474_v29  ;;  %v6565_v49 = vadd.f32 %v6564_v38, %v6563_v43  ;;  %v6674_v48 = vadd.f32 %v6673_v11, %v6672_v0  ;;  %v6675_v59 = vpop.f32.mrb[50].mxu1 }
 0x35c   :  { %7026 = vmatmul.mubr.msk.bf16.gmra.mrb[156].mxu0 %vm2777_vm2, %v1229_v26  ;;  %v6676_v24 = vpop.f32.mrb[51].mxu1 }
 0x35d   :  { %v4255_v33 = vadd.f32 %v6565_v49, %v10482_v28  ;;  %v10874_v10 = vadd.f32 %v6674_v48, %v4252_v46  ;;  %v6677_v58 = vadd.f32 %v6676_v24, %v6675_v59 }
 0x35f   :  { %v6566_v8 = vpop.f32.mrb[52].mxu0  ;;  %v10876_v13 = vadd.f32 %v6677_v58, %v4255_v33 }
 0x360   :  { %v6567_v4 = vpop.f32.mrb[53].mxu0 }
 0x361   :  { %v6568_v3 = vadd.f32 %v6567_v4, %v6566_v8  ;;  %v6569_v2 = vpop.f32.mrb[54].mxu0  ;;  %v6678_v61 = vpop.f32.mrb[52].mxu1 }
 0x362   :  { %v6570_v29 = vpop.f32.mrb[55].mxu0  ;;  %v6679_v1 = vpop.f32.mrb[53].mxu1 }
 0x363   :  { %v4260_v12 = vadd.f32 %v6568_v3, %v10504_v14  ;;  %v6571_v18 = vadd.f32 %v6570_v29, %v6569_v2  ;;  %v6680_v39 = vadd.f32 %v6679_v1, %v6678_v61  ;;  %v6681_v53 = vpop.f32.mrb[54].mxu1 }
 0x364   :  { %v6682_v42 = vpop.f32.mrb[55].mxu1 }
 0x365   :  { %v4263_v28 = vadd.f32 %v6571_v18, %v10512_v30  ;;  %v10883_v19 = vadd.f32 %v6680_v39, %v4260_v12  ;;  %v6683_v50 = vadd.f32 %v6682_v42, %v6681_v53  ;;  %v7314_v53 = vld [vmem:[%s11113_s3 + $0x38] sm:$0xff]  }
 0x366   :  { %7043 = vmatprep.subr.bf16.mxu1 %v7314_v53 }
 0x367   :  { %v6572_v35 = vpop.f32.mrb[56].mxu0  ;;  %v10885_v44 = vadd.f32 %v6683_v50, %v4263_v28  ;;  %7044 = vmatpush3.bf16.msra.mxu1 %v7314_v53 }
 0x368   :  { %v6573_v34 = vpop.f32.mrb[57].mxu0 }
 0x369   :  { %v6574_v14 = vadd.f32 %v6573_v34, %v6572_v35  ;;  %v6575_v26 = vpop.f32.mrb[58].mxu0  ;;  %v6684_v25 = vpop.f32.mrb[56].mxu1 }
 0x36a   :  { %v6576_v43 = vpop.f32.mrb[59].mxu0  ;;  %v6685_v38 = vpop.f32.mrb[57].mxu1 }
 0x36b   :  { %v4268_v30 = vadd.f32 %v6574_v14, %v10534_v60  ;;  %v6577_v0 = vadd.f32 %v6576_v43, %v6575_v26  ;;  %v6686_v46 = vadd.f32 %v6685_v38, %v6684_v25  ;;  %v6687_v49 = vpop.f32.mrb[58].mxu1 }
 0x36c   :  { %v6688_v48 = vpop.f32.mrb[59].mxu1 }
 0x36d   :  { %v4271_v11 = vadd.f32 %v6577_v0, %v10542_v5  ;;  %v10889_v59 = vadd.f32 %v6686_v46, %v4268_v30  ;;  %v6689_v33 = vadd.f32 %v6688_v48, %v6687_v49 }
 0x36f   :  { %v6578_v24 = vpop.f32.mrb[60].mxu0  ;;  %v10891_v58 = vadd.f32 %v6689_v33, %v4271_v11 }
 0x370   :  { %v6579_v8 = vpop.f32.mrb[61].mxu0 }
 0x371   :  { %v6580_v4 = vadd.f32 %v6579_v8, %v6578_v24  ;;  %v6581_v3 = vpop.f32.mrb[62].mxu0  ;;  %v6690_v2 = vpop.f32.mrb[60].mxu1 }
 0x372   :  { %v6582_v61 = vpop.f32.mrb[63].mxu0  ;;  %v6691_v12 = vpop.f32.mrb[61].mxu1 }
 0x373   :  { %v4276_v60 = vadd.f32 %v6580_v4, %v10564_v47  ;;  %v6583_v29 = vadd.f32 %v6582_v61, %v6581_v3  ;;  %v6692_v18 = vadd.f32 %v6691_v12, %v6690_v2  ;;  %v6693_v1 = vpop.f32.mrb[62].mxu1 }
 0x374   :  { %v6694_v39 = vpop.f32.mrb[63].mxu1 }
 0x375   :  { %v4279_v5 = vadd.f32 %v6583_v29, %v10572_v37  ;;  %v10898_v28 = vadd.f32 %v6692_v18, %v4276_v60  ;;  %v6695_v42 = vadd.f32 %v6694_v39, %v6693_v1 }
 0x377   :  { %v6712_v20 = vpop.f32.mrb[64].mxu0  ;;  %v10900_v50 = vadd.f32 %v6695_v42, %v4279_v5 }
 0x378   :  { %v6713_v35 = vpop.f32.mrb[65].mxu0 }
 0x379   :  { %v6714_v47 = vadd.f32 %v6713_v35, %v6712_v20  ;;  %v6715_v34 = vpop.f32.mrb[66].mxu0  ;;  %v6824_v14 = vpop.f32.mrb[64].mxu1 }
 0x37a   :  { %v6716_v26 = vpop.f32.mrb[67].mxu0  ;;  %v6825_v43 = vpop.f32.mrb[65].mxu1 }
 0x37b   :  { %v4478_v37 = vadd.f32 %v6714_v47, %v10594_v31  ;;  %v6717_v25 = vadd.f32 %v6716_v26, %v6715_v34  ;;  %v6826_v30 = vadd.f32 %v6825_v43, %v6824_v14  ;;  %v6827_v0 = vpop.f32.mrb[66].mxu1 }
 0x37c   :  { %v6828_v46 = vpop.f32.mrb[67].mxu1 }
 0x37d   :  { %v4481_v38 = vadd.f32 %v6717_v25, %v10602_v52  ;;  %v6829_v49 = vadd.f32 %v6828_v46, %v6827_v0  ;;  %v10904_v11 = vadd.f32 %v6826_v30, %v4478_v37 }
 0x37f   :  { %v6718_v48 = vpop.f32.mrb[68].mxu0  ;;  %v10906_v24 = vadd.f32 %v6829_v49, %v4481_v38 }
 0x380   :  { %v6719_v33 = vpop.f32.mrb[69].mxu0 }
 0x381   :  { %v6720_v8 = vadd.f32 %v6719_v33, %v6718_v48  ;;  %v6721_v4 = vpop.f32.mrb[70].mxu0  ;;  %v6830_v3 = vpop.f32.mrb[68].mxu1 }
 0x382   :  { %v6722_v2 = vpop.f32.mrb[71].mxu0  ;;  %v6831_v60 = vpop.f32.mrb[69].mxu1 }
 0x383   :  { %v4486_v31 = vadd.f32 %v6720_v8, %v10627_v27  ;;  %v6723_v61 = vadd.f32 %v6722_v2, %v6721_v4  ;;  %v6832_v29 = vadd.f32 %v6831_v60, %v6830_v3  ;;  %v6833_v12 = vpop.f32.mrb[70].mxu1 }
 0x384   :  { %v6834_v18 = vpop.f32.mrb[71].mxu1 }
 0x385   :  { %v4489_v52 = vadd.f32 %v6723_v61, %v10635_v56  ;;  %v6835_v1 = vadd.f32 %v6834_v18, %v6833_v12  ;;  %v10910_v5 = vadd.f32 %v6832_v29, %v4486_v31 }
 0x387   :  { %v6724_v39 = vpop.f32.mrb[72].mxu0  ;;  %v10912_v42 = vadd.f32 %v6835_v1, %v4489_v52 }
 0x388   :  { %v6725_v53 = vpop.f32.mrb[73].mxu0 }
 0x389   :  { %v6726_v20 = vadd.f32 %v6725_v53, %v6724_v39  ;;  %v6727_v35 = vpop.f32.mrb[74].mxu0  ;;  %v6836_v47 = vpop.f32.mrb[72].mxu1 }
 0x38a   :  { %v6728_v34 = vpop.f32.mrb[75].mxu0  ;;  %v6837_v26 = vpop.f32.mrb[73].mxu1 }
 0x38b   :  { %v4494_v27 = vadd.f32 %v6726_v20, %v10657_v17  ;;  %v6729_v14 = vadd.f32 %v6728_v34, %v6727_v35  ;;  %v6838_v37 = vadd.f32 %v6837_v26, %v6836_v47  ;;  %v6839_v25 = vpop.f32.mrb[74].mxu1 }
 0x38c   :  { %v6840_v43 = vpop.f32.mrb[75].mxu1 }
 0x38d   :  { %v4497_v56 = vadd.f32 %v6729_v14, %v10665_v9  ;;  %v6841_v30 = vadd.f32 %v6840_v43, %v6839_v25  ;;  %v10916_v0 = vadd.f32 %v6838_v37, %v4494_v27 }
 0x38f   :  { %v6730_v38 = vpop.f32.mrb[76].mxu0  ;;  %v10918_v49 = vadd.f32 %v6841_v30, %v4497_v56 }
 0x390   :  { %v6731_v46 = vpop.f32.mrb[77].mxu0 }
 0x391   :  { %v6732_v48 = vadd.f32 %v6731_v46, %v6730_v38  ;;  %v6733_v33 = vpop.f32.mrb[78].mxu0  ;;  %v6842_v8 = vpop.f32.mrb[76].mxu1 }
 0x392   :  { %v6734_v4 = vpop.f32.mrb[79].mxu0  ;;  %v6843_v2 = vpop.f32.mrb[77].mxu1 }
 0x393   :  { %v4502_v17 = vadd.f32 %v6732_v48, %v10690_v16  ;;  %v6735_v3 = vadd.f32 %v6734_v4, %v6733_v33  ;;  %v6844_v31 = vadd.f32 %v6843_v2, %v6842_v8  ;;  %v6845_v61 = vpop.f32.mrb[78].mxu1 }
 0x394   :  { %v6846_v60 = vpop.f32.mrb[79].mxu1 }
 0x395   :  { %v4505_v9 = vadd.f32 %v6735_v3, %v10698_v40  ;;  %v6847_v29 = vadd.f32 %v6846_v60, %v6845_v61  ;;  %v10922_v12 = vadd.f32 %v6844_v31, %v4502_v17 }
 0x397   :  { %v6736_v52 = vpop.f32.mrb[80].mxu0  ;;  %v10924_v1 = vadd.f32 %v6847_v29, %v4505_v9 }
 0x398   :  { %v6737_v18 = vpop.f32.mrb[81].mxu0 }
 0x399   :  { %v6738_v39 = vadd.f32 %v6737_v18, %v6736_v52  ;;  %v6739_v53 = vpop.f32.mrb[82].mxu0  ;;  %v6848_v20 = vpop.f32.mrb[80].mxu1 }
 0x39a   :  { %v6740_v35 = vpop.f32.mrb[83].mxu0  ;;  %v6849_v34 = vpop.f32.mrb[81].mxu1 }
 0x39b   :  { %v4510_v16 = vadd.f32 %v6738_v39, %v10715_v55  ;;  %v6741_v47 = vadd.f32 %v6740_v35, %v6739_v53  ;;  %v6850_v27 = vadd.f32 %v6849_v34, %v6848_v20  ;;  %v6851_v14 = vpop.f32.mrb[82].mxu1 }
 0x39c   :  { %v6852_v26 = vpop.f32.mrb[83].mxu1 }
 0x39d   :  { %v4513_v40 = vadd.f32 %v6741_v47, %v10723_v51  ;;  %v6853_v37 = vadd.f32 %v6852_v26, %v6851_v14  ;;  %v10928_v25 = vadd.f32 %v6850_v27, %v4510_v16 }
 0x39f   :  { %v6742_v56 = vpop.f32.mrb[84].mxu0  ;;  %v10930_v30 = vadd.f32 %v6853_v37, %v4513_v40 }
 0x3a0   :  { %v6743_v43 = vpop.f32.mrb[85].mxu0 }
 0x3a1   :  { %v6744_v38 = vadd.f32 %v6743_v43, %v6742_v56  ;;  %v6745_v46 = vpop.f32.mrb[86].mxu0  ;;  %v6854_v48 = vpop.f32.mrb[84].mxu1 }
 0x3a2   :  { %v6746_v33 = vpop.f32.mrb[87].mxu0  ;;  %v6855_v4 = vpop.f32.mrb[85].mxu1 }
 0x3a3   :  { %v4518_v55 = vadd.f32 %v6744_v38, %v10738_v15  ;;  %v6747_v8 = vadd.f32 %v6746_v33, %v6745_v46  ;;  %v6856_v17 = vadd.f32 %v6855_v4, %v6854_v48  ;;  %v6857_v3 = vpop.f32.mrb[86].mxu1 }
 0x3a4   :  { %v6858_v2 = vpop.f32.mrb[87].mxu1 }
 0x3a5   :  { %v4521_v51 = vadd.f32 %v6747_v8, %v10746_v36  ;;  %v6859_v31 = vadd.f32 %v6858_v2, %v6857_v3  ;;  %v10934_v61 = vadd.f32 %v6856_v17, %v4518_v55 }
 0x3a7   :  { %v6748_v9 = vpop.f32.mrb[88].mxu0  ;;  %v10936_v29 = vadd.f32 %v6859_v31, %v4521_v51 }
 0x3a8   :  { %v6749_v60 = vpop.f32.mrb[89].mxu0 }
 0x3a9   :  { %v6750_v52 = vadd.f32 %v6749_v60, %v6748_v9  ;;  %v6751_v18 = vpop.f32.mrb[90].mxu0  ;;  %v6860_v39 = vpop.f32.mrb[88].mxu1 }
 0x3aa   :  { %v6752_v53 = vpop.f32.mrb[91].mxu0  ;;  %v6861_v35 = vpop.f32.mrb[89].mxu1 }
 0x3ab   :  { %v4526_v15 = vadd.f32 %v6750_v52, %v10758_v41  ;;  %v6753_v20 = vadd.f32 %v6752_v53, %v6751_v18  ;;  %v6862_v16 = vadd.f32 %v6861_v35, %v6860_v39  ;;  %v6863_v47 = vpop.f32.mrb[90].mxu1 }
 0x3ac   :  { %v6864_v34 = vpop.f32.mrb[91].mxu1 }
 0x3ad   :  { %v4529_v36 = vadd.f32 %v6753_v20, %v10766_v63  ;;  %v6865_v27 = vadd.f32 %v6864_v34, %v6863_v47  ;;  %v10940_v14 = vadd.f32 %v6862_v16, %v4526_v15 }
 0x3af   :  { %v6754_v40 = vpop.f32.mrb[92].mxu0  ;;  %v10942_v37 = vadd.f32 %v6865_v27, %v4529_v36 }
 0x3b0   :  { %v6755_v26 = vpop.f32.mrb[93].mxu0 }
 0x3b1   :  { %v6756_v56 = vadd.f32 %v6755_v26, %v6754_v40  ;;  %v6757_v43 = vpop.f32.mrb[94].mxu0  ;;  %v6866_v38 = vpop.f32.mrb[92].mxu1 }
 0x3b2   :  { %v6758_v46 = vpop.f32.mrb[95].mxu0  ;;  %v6867_v33 = vpop.f32.mrb[93].mxu1 }
 0x3b3   :  { %v4534_v41 = vadd.f32 %v6756_v56, %v10781_v6  ;;  %v6759_v48 = vadd.f32 %v6758_v46, %v6757_v43  ;;  %v6868_v55 = vadd.f32 %v6867_v33, %v6866_v38  ;;  %v6869_v8 = vpop.f32.mrb[94].mxu1 }
 0x3b4   :  { %v6870_v4 = vpop.f32.mrb[95].mxu1 }
 0x3b5   :  { %v4537_v63 = vadd.f32 %v6759_v48, %v10789_v45  ;;  %v6871_v17 = vadd.f32 %v6870_v4, %v6869_v8  ;;  %v10946_v3 = vadd.f32 %v6868_v55, %v4534_v41 }
 0x3b7   :  { %v6760_v51 = vpop.f32.mrb[96].mxu0  ;;  %v10948_v31 = vadd.f32 %v6871_v17, %v4537_v63 }
 0x3b8   :  { %v6761_v2 = vpop.f32.mrb[97].mxu0 }
 0x3b9   :  { %v6762_v9 = vadd.f32 %v6761_v2, %v6760_v51  ;;  %v6763_v60 = vpop.f32.mrb[98].mxu0  ;;  %v6872_v52 = vpop.f32.mrb[96].mxu1 }
 0x3ba   :  { %v6764_v18 = vpop.f32.mrb[99].mxu0  ;;  %v6873_v53 = vpop.f32.mrb[97].mxu1 }
 0x3bb   :  { %v4542_v6 = vadd.f32 %v6762_v9, %v10801_v54  ;;  %v6765_v39 = vadd.f32 %v6764_v18, %v6763_v60  ;;  %v6874_v15 = vadd.f32 %v6873_v53, %v6872_v52  ;;  %v6875_v20 = vpop.f32.mrb[98].mxu1 }
 0x3bc   :  { %v6876_v35 = vpop.f32.mrb[99].mxu1 }
 0x3bd   :  { %v4545_v45 = vadd.f32 %v6765_v39, %v10809_v62  ;;  %v6877_v16 = vadd.f32 %v6876_v35, %v6875_v20  ;;  %v10952_v47 = vadd.f32 %v6874_v15, %v4542_v6 }
 0x3bf   :  { %v6766_v36 = vpop.f32.mrb[100].mxu0  ;;  %v10954_v27 = vadd.f32 %v6877_v16, %v4545_v45 }
 0x3c0   :  { %v6767_v34 = vpop.f32.mrb[101].mxu0 }
 0x3c1   :  { %v6768_v40 = vadd.f32 %v6767_v34, %v6766_v36  ;;  %v6769_v26 = vpop.f32.mrb[102].mxu0  ;;  %v6878_v56 = vpop.f32.mrb[100].mxu1 }
 0x3c2   :  { %v6770_v43 = vpop.f32.mrb[103].mxu0  ;;  %v6879_v46 = vpop.f32.mrb[101].mxu1 }
 0x3c3   :  { %v4550_v54 = vadd.f32 %v6768_v40, %v10824_v21  ;;  %v6771_v38 = vadd.f32 %v6770_v43, %v6769_v26  ;;  %v6880_v41 = vadd.f32 %v6879_v46, %v6878_v56  ;;  %v6881_v48 = vpop.f32.mrb[102].mxu1 }
 0x3c4   :  { %v6882_v33 = vpop.f32.mrb[103].mxu1 }
 0x3c5   :  { %v4553_v62 = vadd.f32 %v6771_v38, %v10832_v23  ;;  %v6883_v55 = vadd.f32 %v6882_v33, %v6881_v48  ;;  %v10958_v8 = vadd.f32 %v6880_v41, %v4550_v54 }
 0x3c7   :  { %v6772_v63 = vpop.f32.mrb[104].mxu0  ;;  %v10960_v17 = vadd.f32 %v6883_v55, %v4553_v62 }
 0x3c8   :  { %v6773_v4 = vpop.f32.mrb[105].mxu0 }
 0x3c9   :  { %v6774_v51 = vadd.f32 %v6773_v4, %v6772_v63  ;;  %v6775_v2 = vpop.f32.mrb[106].mxu0  ;;  %v6884_v9 = vpop.f32.mrb[104].mxu1 }
 0x3ca   :  { %v6776_v60 = vpop.f32.mrb[107].mxu0  ;;  %v6885_v18 = vpop.f32.mrb[105].mxu1 }
 0x3cb   :  { %v4558_v21 = vadd.f32 %v6774_v51, %v10844_v7  ;;  %v6777_v52 = vadd.f32 %v6776_v60, %v6775_v2  ;;  %v6886_v6 = vadd.f32 %v6885_v18, %v6884_v9  ;;  %v6887_v39 = vpop.f32.mrb[106].mxu1 }
 0x3cc   :  { %v6888_v53 = vpop.f32.mrb[107].mxu1 }
 0x3cd   :  { %v4561_v23 = vadd.f32 %v6777_v52, %v10852_v57  ;;  %v6889_v15 = vadd.f32 %v6888_v53, %v6887_v39  ;;  %v10964_v20 = vadd.f32 %v6886_v6, %v4558_v21 }
 0x3cf   :  { %v6778_v45 = vpop.f32.mrb[108].mxu0  ;;  %v10966_v16 = vadd.f32 %v6889_v15, %v4561_v23 }
 0x3d0   :  { %v6779_v35 = vpop.f32.mrb[109].mxu0 }
 0x3d1   :  { %v6780_v36 = vadd.f32 %v6779_v35, %v6778_v45  ;;  %v6781_v34 = vpop.f32.mrb[110].mxu0  ;;  %v6890_v40 = vpop.f32.mrb[108].mxu1 }
 0x3d2   :  { %v6782_v26 = vpop.f32.mrb[111].mxu0  ;;  %v6891_v43 = vpop.f32.mrb[109].mxu1 }
 0x3d3   :  { %v4566_v7 = vadd.f32 %v6780_v36, %v10867_v32  ;;  %v6783_v56 = vadd.f32 %v6782_v26, %v6781_v34  ;;  %v6892_v54 = vadd.f32 %v6891_v43, %v6890_v40  ;;  %v6893_v38 = vpop.f32.mrb[110].mxu1 }
 0x3d4   :  { %v6894_v46 = vpop.f32.mrb[111].mxu1 }
 0x3d5   :  { %v4569_v57 = vadd.f32 %v6783_v56, %v10869_v22  ;;  %v6895_v41 = vadd.f32 %v6894_v46, %v6893_v38  ;;  %v10970_v48 = vadd.f32 %v6892_v54, %v4566_v7 }
 0x3d7   :  { %v6784_v62 = vpop.f32.mrb[112].mxu0  ;;  %v10972_v55 = vadd.f32 %v6895_v41, %v4569_v57 }
 0x3d8   :  { %v6785_v33 = vpop.f32.mrb[113].mxu0 }
 0x3d9   :  { %v6786_v63 = vadd.f32 %v6785_v33, %v6784_v62  ;;  %v6787_v4 = vpop.f32.mrb[114].mxu0  ;;  %v6896_v51 = vpop.f32.mrb[112].mxu1 }
 0x3da   :  { %v6788_v2 = vpop.f32.mrb[115].mxu0  ;;  %v6897_v60 = vpop.f32.mrb[113].mxu1 }
 0x3db   :  { %v4574_v32 = vadd.f32 %v6786_v63, %v10874_v10  ;;  %v6789_v9 = vadd.f32 %v6788_v2, %v6787_v4  ;;  %v6898_v21 = vadd.f32 %v6897_v60, %v6896_v51  ;;  %v6899_v52 = vpop.f32.mrb[114].mxu1 }
 0x3dc   :  { %v6900_v18 = vpop.f32.mrb[115].mxu1 }
 0x3dd   :  { %v4577_v22 = vadd.f32 %v6789_v9, %v10876_v13  ;;  %v6901_v6 = vadd.f32 %v6900_v18, %v6899_v52  ;;  %v10976_v39 = vadd.f32 %v6898_v21, %v4574_v32 }
 0x3df   :  { %v6790_v23 = vpop.f32.mrb[116].mxu0  ;;  %v10978_v15 = vadd.f32 %v6901_v6, %v4577_v22 }
 0x3e0   :  { %v6791_v53 = vpop.f32.mrb[117].mxu0 }
 0x3e1   :  { %v6792_v45 = vadd.f32 %v6791_v53, %v6790_v23  ;;  %v6793_v35 = vpop.f32.mrb[118].mxu0  ;;  %v6902_v36 = vpop.f32.mrb[116].mxu1 }
 0x3e2   :  { %v6794_v34 = vpop.f32.mrb[119].mxu0  ;;  %v6903_v26 = vpop.f32.mrb[117].mxu1 }
 0x3e3   :  { %v4582_v10 = vadd.f32 %v6792_v45, %v10883_v19  ;;  %v6795_v40 = vadd.f32 %v6794_v34, %v6793_v35  ;;  %v6904_v7 = vadd.f32 %v6903_v26, %v6902_v36  ;;  %v6905_v56 = vpop.f32.mrb[118].mxu1 }
 0x3e4   :  { %v6906_v43 = vpop.f32.mrb[119].mxu1 }
 0x3e5   :  { %v4585_v13 = vadd.f32 %v6795_v40, %v10885_v44  ;;  %v6907_v54 = vadd.f32 %v6906_v43, %v6905_v56  ;;  %v10982_v38 = vadd.f32 %v6904_v7, %v4582_v10 }
 0x3e7   :  { %v6796_v57 = vpop.f32.mrb[120].mxu0  ;;  %v10984_v41 = vadd.f32 %v6907_v54, %v4585_v13 }
 0x3e8   :  { %v6797_v46 = vpop.f32.mrb[121].mxu0 }
 0x3e9   :  { %v6798_v62 = vadd.f32 %v6797_v46, %v6796_v57  ;;  %v6799_v33 = vpop.f32.mrb[122].mxu0  ;;  %v6908_v63 = vpop.f32.mrb[120].mxu1 }
 0x3ea   :  { %v6800_v4 = vpop.f32.mrb[123].mxu0  ;;  %v6909_v2 = vpop.f32.mrb[121].mxu1 }
 0x3eb   :  { %v4590_v19 = vadd.f32 %v6798_v62, %v10889_v59  ;;  %v6801_v51 = vadd.f32 %v6800_v4, %v6799_v33  ;;  %v6910_v32 = vadd.f32 %v6909_v2, %v6908_v63  ;;  %v6911_v9 = vpop.f32.mrb[122].mxu1 }
 0x3ec   :  { %v6912_v60 = vpop.f32.mrb[123].mxu1 }
 0x3ed   :  { %v4593_v44 = vadd.f32 %v6801_v51, %v10891_v58  ;;  %v6913_v21 = vadd.f32 %v6912_v60, %v6911_v9  ;;  %v10988_v52 = vadd.f32 %v6910_v32, %v4590_v19 }
 0x3ef   :  { %v6802_v22 = vpop.f32.mrb[124].mxu0  ;;  %v10990_v6 = vadd.f32 %v6913_v21, %v4593_v44 }
 0x3f0   :  { %v6803_v18 = vpop.f32.mrb[125].mxu0 }
 0x3f1   :  { %v6804_v23 = vadd.f32 %v6803_v18, %v6802_v22  ;;  %v6805_v53 = vpop.f32.mrb[126].mxu0  ;;  %v6914_v45 = vpop.f32.mrb[124].mxu1 }
 0x3f2   :  { %v6806_v35 = vpop.f32.mrb[127].mxu0  ;;  %v6915_v34 = vpop.f32.mrb[125].mxu1 }
 0x3f3   :  { %v4598_v59 = vadd.f32 %v6804_v23, %v10898_v28  ;;  %v6807_v36 = vadd.f32 %v6806_v35, %v6805_v53  ;;  %v6916_v10 = vadd.f32 %v6915_v34, %v6914_v45  ;;  %v6917_v40 = vpop.f32.mrb[126].mxu1 }
 0x3f4   :  { %v6918_v26 = vpop.f32.mrb[127].mxu1 }
 0x3f5   :  { %v4601_v58 = vadd.f32 %v6807_v36, %v10900_v50  ;;  %v6919_v7 = vadd.f32 %v6918_v26, %v6917_v40  ;;  %v10994_v56 = vadd.f32 %v6916_v10, %v4598_v59 }
 0x3f7   :  { %v6999_v13 = vpop.f32.mrb[128].mxu0  ;;  %v10997_v57 = vadd.f32 %v6919_v7, %v4601_v58 }
 0x3f8   :  { %v4808_v43 = vadd.f32 %v6999_v13, %v10910_v5  ;;  %v4799_v54 = vpop.f32.mrb[129].mxu0 }
 0x3f9   :  { %v4800_v46 = vadd.f32 %v4799_v54, %v10904_v11  ;;  %v7000_v62 = vpop.f32.mrb[130].mxu0 }
 0x3fa   :  { %v4811_v28 = vadd.f32 %v7000_v62, %v10912_v42  ;;  %v4802_v33 = vpop.f32.mrb[131].mxu0  ;;  %v4928_v4 = vmax.f32 %v4808_v43, 0.0 }
 0x3fb   :  { %v4803_v63 = vadd.f32 %v4802_v33, %v10906_v24  ;;  %v4926_v19 = vmax.f32 %v4800_v46, 0.0 }
 0x3fc   :  { %v4929_v50 = vmax.f32 %v4811_v28, 0.0 }
 0x3fd   :  { %v4927_v51 = vmax.f32 %v4803_v63, 0.0 }
 0x3fe   :  { %v4959_v2 = vpack.c.bf16 %v4929_v50, %v4928_v4 }
 0x3ff   :  { %v4958_v32 = vpack.c.bf16 %v4927_v51, %v4926_v19  ;;  %v7003_v9 = vpop.f32.mrb[132].mxu0 }
 0x400   :  { %v4824_v5 = vadd.f32 %v7003_v9, %v10922_v12  ;;  %v4815_v44 = vpop.f32.mrb[133].mxu0 }
 0x401   :  { %v4816_v60 = vadd.f32 %v4815_v44, %v10916_v0  ;;  %v7004_v21 = vpop.f32.mrb[134].mxu0  ;;  %7045 = vmatprep.mubr.bf16.mxu1 %v4958_v32 }
 0x402   :  { %v4827_v11 = vadd.f32 %v7004_v21, %v10924_v1  ;;  %v4818_v42 = vpop.f32.mrb[135].mxu0  ;;  %7046 = vmatmul.mubr.bf16.vlgmr.msra.gmra.mrb[128].mxu1 %v4959_v2  ;;  %v4932_v22 = vmax.f32 %v4824_v5, 0.0 }
 0x403   :  { %v4819_v24 = vadd.f32 %v4818_v42, %v10918_v49  ;;  %v4930_v23 = vmax.f32 %v4816_v60, 0.0 }
 0x404   :  { %v4933_v18 = vmax.f32 %v4827_v11, 0.0 }
 0x405   :  { %v4931_v53 = vmax.f32 %v4819_v24, 0.0 }
 0x406   :  { %v4961_v45 = vpack.c.bf16 %v4933_v18, %v4932_v22 }
 0x407   :  { %v4960_v35 = vpack.c.bf16 %v4931_v53, %v4930_v23  ;;  %v7007_v59 = vpop.f32.mrb[136].mxu0 }
 0x408   :  { %v4840_v12 = vadd.f32 %v7007_v59, %v10934_v61  ;;  %v4831_v36 = vpop.f32.mrb[137].mxu0 }
 0x409   :  { %v4832_v0 = vadd.f32 %v4831_v36, %v10928_v25  ;;  %v7008_v34 = vpop.f32.mrb[138].mxu0  ;;  %7049 = vmatprep.mubr.bf16.mxu1 %v4960_v35 }
 0x40a   :  { %v4843_v1 = vadd.f32 %v7008_v34, %v10936_v29  ;;  %v4834_v10 = vpop.f32.mrb[139].mxu0  ;;  %7050 = vmatmul.mubr.bf16.gmra.mrb[132].mxu1 %v4961_v45  ;;  %v4936_v40 = vmax.f32 %v4840_v12, 0.0 }
 0x40b   :  { %v4835_v49 = vadd.f32 %v4834_v10, %v10930_v30  ;;  %v4934_v26 = vmax.f32 %v4832_v0, 0.0 }
 0x40c   :  { %v4937_v58 = vmax.f32 %v4843_v1, 0.0 }
 0x40d   :  { %v4935_v7 = vmax.f32 %v4835_v49, 0.0 }
 0x40e   :  { %v4963_v13 = vpack.c.bf16 %v4937_v58, %v4936_v40 }
 0x40f   :  { %v4962_v43 = vpack.c.bf16 %v4935_v7, %v4934_v26  ;;  %v7011_v54 = vpop.f32.mrb[140].mxu0 }
 0x410   :  { %v4856_v61 = vadd.f32 %v7011_v54, %v10946_v3  ;;  %v4847_v46 = vpop.f32.mrb[141].mxu0 }
 0x411   :  { %v4848_v25 = vadd.f32 %v4847_v46, %v10940_v14  ;;  %v7012_v62 = vpop.f32.mrb[142].mxu0  ;;  %7053 = vmatprep.mubr.bf16.mxu1 %v4962_v43 }
 0x412   :  { %v4859_v29 = vadd.f32 %v7012_v62, %v10948_v31  ;;  %v4850_v28 = vpop.f32.mrb[143].mxu0  ;;  %7054 = vmatmul.mubr.bf16.gmra.mrb[136].mxu1 %v4963_v13  ;;  %v4940_v33 = vmax.f32 %v4856_v61, 0.0 }
 0x413   :  { %v4851_v30 = vadd.f32 %v4850_v28, %v10942_v37  ;;  %v4938_v4 = vmax.f32 %v4848_v25, 0.0 }
 0x414   :  { %v4941_v63 = vmax.f32 %v4859_v29, 0.0 }
 0x415   :  { %v4939_v50 = vmax.f32 %v4851_v30, 0.0 }
 0x416   :  { %v4965_v19 = vpack.c.bf16 %v4941_v63, %v4940_v33 }
 0x417   :  { %v4964_v51 = vpack.c.bf16 %v4939_v50, %v4938_v4  ;;  %v7015_v2 = vpop.f32.mrb[144].mxu0 }
 0x418   :  { %v4872_v3 = vadd.f32 %v7015_v2, %v10958_v8  ;;  %v4863_v32 = vpop.f32.mrb[145].mxu0 }
 0x419   :  { %v4864_v14 = vadd.f32 %v4863_v32, %v10952_v47  ;;  %v7016_v9 = vpop.f32.mrb[146].mxu0  ;;  %7057 = vmatprep.mubr.bf16.mxu1 %v4964_v51 }
 0x41a   :  { %v4875_v31 = vadd.f32 %v7016_v9, %v10960_v17  ;;  %v4866_v5 = vpop.f32.mrb[147].mxu0  ;;  %7058 = vmatmul.mubr.bf16.gmra.mrb[140].mxu1 %v4965_v19  ;;  %v4944_v44 = vmax.f32 %v4872_v3, 0.0 }
 0x41b   :  { %v4867_v37 = vadd.f32 %v4866_v5, %v10954_v27  ;;  %v4942_v21 = vmax.f32 %v4864_v14, 0.0 }
 0x41c   :  { %v4945_v60 = vmax.f32 %v4875_v31, 0.0 }
 0x41d   :  { %v4943_v11 = vmax.f32 %v4867_v37, 0.0 }
 0x41e   :  { %v4967_v42 = vpack.c.bf16 %v4945_v60, %v4944_v44 }
 0x41f   :  { %v4966_v24 = vpack.c.bf16 %v4943_v11, %v4942_v21  ;;  %v7019_v22 = vpop.f32.mrb[148].mxu0 }
 0x420   :  { %v4888_v8 = vadd.f32 %v7019_v22, %v10970_v48  ;;  %v4879_v18 = vpop.f32.mrb[149].mxu0 }
 0x421   :  { %v4880_v47 = vadd.f32 %v4879_v18, %v10964_v20  ;;  %v7020_v23 = vpop.f32.mrb[150].mxu0  ;;  %7061 = vmatprep.mubr.bf16.mxu1 %v4966_v24 }
 0x422   :  { %v4891_v17 = vadd.f32 %v7020_v23, %v10972_v55  ;;  %v4882_v53 = vpop.f32.mrb[151].mxu0  ;;  %7062 = vmatmul.mubr.bf16.gmra.mrb[144].mxu1 %v4967_v42  ;;  %v4948_v45 = vmax.f32 %v4888_v8, 0.0 }
 0x423   :  { %v4883_v27 = vadd.f32 %v4882_v53, %v10966_v16  ;;  %v4946_v59 = vmax.f32 %v4880_v47, 0.0 }
 0x424   :  { %v4949_v35 = vmax.f32 %v4891_v17, 0.0 }
 0x425   :  { %v4947_v12 = vmax.f32 %v4883_v27, 0.0 }
 0x426   :  { %v4969_v36 = vpack.c.bf16 %v4949_v35, %v4948_v45 }
 0x427   :  { %v4968_v0 = vpack.c.bf16 %v4947_v12, %v4946_v59  ;;  %v7023_v34 = vpop.f32.mrb[152].mxu0 }
 0x428   :  { %v4904_v48 = vadd.f32 %v7023_v34, %v10982_v38  ;;  %v4895_v1 = vpop.f32.mrb[153].mxu0 }
 0x429   :  { %v4896_v20 = vadd.f32 %v4895_v1, %v10976_v39  ;;  %v7024_v10 = vpop.f32.mrb[154].mxu0  ;;  %7065 = vmatprep.mubr.bf16.mxu1 %v4968_v0 }
 0x42a   :  { %v4907_v55 = vadd.f32 %v7024_v10, %v10984_v41  ;;  %v4898_v49 = vpop.f32.mrb[155].mxu0  ;;  %7066 = vmatmul.mubr.bf16.gmra.mrb[148].mxu1 %v4969_v36  ;;  %v4952_v40 = vmax.f32 %v4904_v48, 0.0 }
 0x42b   :  { %v4899_v16 = vadd.f32 %v4898_v49, %v10978_v15  ;;  %v4950_v26 = vmax.f32 %v4896_v20, 0.0 }
 0x42c   :  { %v4953_v58 = vmax.f32 %v4907_v55, 0.0 }
 0x42d   :  { %v4951_v7 = vmax.f32 %v4899_v16, 0.0 }
 0x42e   :  { %v4971_v13 = vpack.c.bf16 %v4953_v58, %v4952_v40 }
 0x42f   :  { %v4970_v43 = vpack.c.bf16 %v4951_v7, %v4950_v26  ;;  %v7027_v54 = vpop.f32.mrb[156].mxu0 }
 0x430   :  { %v4920_v38 = vadd.f32 %v7027_v54, %v10994_v56  ;;  %v4911_v61 = vpop.f32.mrb[157].mxu0  ;;  %v5239_v56 = vld [vmem:[#allocation2] sm:$0x1] }
 0x431   :  { %v4912_v39 = vadd.f32 %v4911_v61, %v10988_v52  ;;  %v7028_v46 = vpop.f32.mrb[158].mxu0  ;;  %7069 = vmatprep.mubr.bf16.mxu1 %v4970_v43  ;;  %v11033_v52 = vld [vmem:[%s11115_s5] sm:$0x1] }
 0x432   :  { %v4923_v41 = vadd.f32 %v7028_v46, %v10997_v57  ;;  %v4914_v25 = vpop.f32.mrb[159].mxu0  ;;  %7070 = vmatmul.mubr.bf16.gmra.mrb[152].mxu1 %v4971_v13  ;;  %v4956_v62 = vmax.f32 %v4920_v38, 0.0  ;;  %6993 = vmatprep.mubr.f32.mxu0 %v11033_v52  ;;  %v7341_v57 = vmov 0  }
 0x433   :  { %v4915_v15 = vadd.f32 %v4914_v25, %v10990_v6  ;;  %v4954_v28 = vmax.f32 %v4912_v39, 0.0  ;;  %7113 = vset.pattern.permute.xlu0 %v7341_v57  ;;  %v11039_v6 = vld [vmem:[%s11114_s4] ss:$0 sm:$0xff]  ;;  %s7343_s4 = smov [#allocation3]  }
 0x434   :  { %v4957_v29 = vmax.f32 %v4923_v41, 0.0  ;;  %5242 = vperm.xlu0 %7113, %v5239_v56   ;;  %s5349_s5 = sshll.u32 %s7343_s4, 4  ;;  %s5350_s5 = int_to_ptr.vmem [resolvable:$true] %s5349_s5 }
 0x435   :  { %v4955_v30 = vmax.f32 %v4915_v15, 0.0  ;;  %s7316_s25 = scalar_lea.vmem %s5350_s5, 32  ;;  %p7321_p1 = scmp.lt.s32.totalorder %s5350_s5, %s5350_s5 }
 0x436   :  { %v4973_v33 = vpack.c.bf16 %v4957_v29, %v4956_v62  ;;  %p7317_p0 = scmp.ne.s32.totalorder %s5350_s5, %s7316_s25  ;;  %p7322_p2 = scmp.lt.s32.totalorder %s7316_s25, %s7316_s25 }
 0x437   :  { %v4972_v63 = vpack.c.bf16 %v4955_v30, %v4954_v28 }
 0x438   :  { %p7323_p3 = por %p7322_p2, %p7321_p1 }
 0x439   :  { %7073 = vmatprep.mubr.bf16.mxu1 %v4972_v63 }
 0x43a   :  { %7074 = vmatmul.mubr.bf16.gmra.mrb[156].mxu1 %v4973_v33  ;;  %p7324_p4 = pnand %p7323_p3, %p7317_p0 }
 0x4d5   :  { %v7047_v4 = vpop.f32.mrb[128].mxu1 }
 0x4d6   :  { %v5088_v50 = vadd.f32 %v7047_v4, %v11039_v6  ;;  %v5079_v19 = vpop.f32.mrb[129].mxu1 }
 0x4d7   :  { %v5080_v51 = vadd.f32 %v11039_v6, %v5079_v19  ;;  %v7048_v2 = vpop.f32.mrb[130].mxu1 }
 0x4d8   :  { %v5091_v3 = vadd.f32 %v7048_v2, %v11039_v6  ;;  %v5082_v32 = vpop.f32.mrb[131].mxu1  ;;  %v5208_v9 = vmax.f32 %v5088_v50, 0.0 }
 0x4d9   :  { %v5083_v14 = vadd.f32 %v11039_v6, %v5082_v32  ;;  %v5206_v5 = vmax.f32 %v5080_v51, 0.0 }
 0x4da   :  { %v5209_v31 = vmax.f32 %v5091_v3, 0.0 }
 0x4db   :  { %v5207_v37 = vmax.f32 %v5083_v14, 0.0 }
 0x4dc   :  { %v11045_v44 = vpack.c.bf16 %v5209_v31, %v5208_v9 }
 0x4dd   :  { %v11047_v60 = vpack.c.bf16 %v5207_v37, %v5206_v5  ;;  %v7051_v21 = vpop.f32.mrb[132].mxu1 }
 0x4de   :  { %v5104_v11 = vadd.f32 %v7051_v21, %v11039_v6  ;;  %v5095_v42 = vpop.f32.mrb[133].mxu1 }
 0x4df   :  { %v5096_v24 = vadd.f32 %v11039_v6, %v5095_v42  ;;  %v7052_v22 = vpop.f32.mrb[134].mxu1 }
 0x4e0   :  { %v5107_v8 = vadd.f32 %v7052_v22, %v11039_v6  ;;  %v5098_v18 = vpop.f32.mrb[135].mxu1  ;;  %v5212_v23 = vmax.f32 %v5104_v11, 0.0 }
 0x4e1   :  { %v5099_v47 = vadd.f32 %v11039_v6, %v5098_v18  ;;  %v5210_v53 = vmax.f32 %v5096_v24, 0.0 }
 0x4e2   :  { %v5213_v17 = vmax.f32 %v5107_v8, 0.0 }
 0x4e3   :  { %v5211_v27 = vmax.f32 %v5099_v47, 0.0 }
 0x4e4   :  { %v11053_v45 = vpack.c.bf16 %v5213_v17, %v5212_v23 }
 0x4e5   :  { %v11055_v35 = vpack.c.bf16 %v5211_v27, %v5210_v53  ;;  %v7055_v59 = vpop.f32.mrb[136].mxu1 }
 0x4e6   :  { %v5120_v12 = vadd.f32 %v7055_v59, %v11039_v6  ;;  %v5111_v36 = vpop.f32.mrb[137].mxu1 }
 0x4e7   :  { %v5112_v0 = vadd.f32 %v11039_v6, %v5111_v36  ;;  %v7056_v34 = vpop.f32.mrb[138].mxu1 }
 0x4e8   :  { %v5123_v48 = vadd.f32 %v7056_v34, %v11039_v6  ;;  %v5114_v1 = vpop.f32.mrb[139].mxu1  ;;  %v5216_v10 = vmax.f32 %v5120_v12, 0.0 }
 0x4e9   :  { %v5115_v20 = vadd.f32 %v11039_v6, %v5114_v1  ;;  %v5214_v49 = vmax.f32 %v5112_v0, 0.0 }
 0x4ea   :  { %v5217_v55 = vmax.f32 %v5123_v48, 0.0 }
 0x4eb   :  { %v5215_v16 = vmax.f32 %v5115_v20, 0.0 }
 0x4ec   :  { %v11061_v40 = vpack.c.bf16 %v5217_v55, %v5216_v10 }
 0x4ed   :  { %v11063_v58 = vpack.c.bf16 %v5215_v16, %v5214_v49  ;;  %v7059_v26 = vpop.f32.mrb[140].mxu1 }
 0x4ee   :  { %v5136_v7 = vadd.f32 %v7059_v26, %v11039_v6  ;;  %v5127_v13 = vpop.f32.mrb[141].mxu1 }
 0x4ef   :  { %v5128_v43 = vadd.f32 %v11039_v6, %v5127_v13  ;;  %v7060_v54 = vpop.f32.mrb[142].mxu1 }
 0x4f0   :  { %v5139_v38 = vadd.f32 %v7060_v54, %v11039_v6  ;;  %v5130_v61 = vpop.f32.mrb[143].mxu1  ;;  %v5220_v46 = vmax.f32 %v5136_v7, 0.0 }
 0x4f1   :  { %v5131_v39 = vadd.f32 %v11039_v6, %v5130_v61  ;;  %v5218_v25 = vmax.f32 %v5128_v43, 0.0 }
 0x4f2   :  { %v5221_v41 = vmax.f32 %v5139_v38, 0.0 }
 0x4f3   :  { %v5219_v15 = vmax.f32 %v5131_v39, 0.0 }
 0x4f4   :  { %v11069_v62 = vpack.c.bf16 %v5221_v41, %v5220_v46 }
 0x4f5   :  { %v11071_v29 = vpack.c.bf16 %v5219_v15, %v5218_v25  ;;  %v7063_v28 = vpop.f32.mrb[144].mxu1 }
 0x4f6   :  { %v5152_v30 = vadd.f32 %v7063_v28, %v11039_v6  ;;  %v5143_v33 = vpop.f32.mrb[145].mxu1 }
 0x4f7   :  { %v5144_v63 = vadd.f32 %v11039_v6, %v5143_v33  ;;  %v7064_v56 = vpop.f32.mrb[146].mxu1  ;;  %v7342_v33 = vmov 1966171168  }
 0x4f8   :  { %v5155_v57 = vadd.f32 %v7064_v56, %v11039_v6  ;;  %v5146_v4 = vpop.f32.mrb[147].mxu1  ;;  %v5224_v19 = vmax.f32 %v5152_v30, 0.0  ;;  %v5243_v30 = vpop.permute.xlu0 %5242 }
 0x4f9   :  { %v5147_v50 = vadd.f32 %v11039_v6, %v5146_v4  ;;  %v5222_v2 = vmax.f32 %v5144_v63, 0.0 }
 0x4fa   :  { %v5225_v51 = vmax.f32 %v5155_v57, 0.0 }
 0x4fb   :  { %v5223_v3 = vmax.f32 %v5147_v50, 0.0 }
 0x4fc   :  { %v7081_v32 = vpack.c.bf16 %v5225_v51, %v5224_v19 }
 0x4fd   :  { %v7077_v14 = vpack.c.bf16 %v5223_v3, %v5222_v2  ;;  %v7067_v9 = vpop.f32.mrb[148].mxu1 }
 0x4fe   :  { %v5168_v31 = vadd.f32 %v7067_v9, %v11039_v6  ;;  %v5159_v5 = vpop.f32.mrb[149].mxu1 }
 0x4ff   :  { %v5160_v37 = vadd.f32 %v11039_v6, %v5159_v5  ;;  %v7068_v21 = vpop.f32.mrb[150].mxu1  ;;  %7078 = vmatprep.subr.bf16.mxu0 %v7077_v14 }
 0x500   :  { %v5171_v11 = vadd.f32 %v7068_v21, %v11039_v6  ;;  %v5162_v42 = vpop.f32.mrb[151].mxu1  ;;  %7080 = vmatpush3.bf16.xpose.msra.mxu0 %v11047_v60  ;;  %v5228_v22 = vmax.f32 %v5168_v31, 0.0 }
 0x501   :  { %v5163_v24 = vadd.f32 %v11039_v6, %v5162_v42  ;;  %7082 = vmatprep.subr.bf16.mxu0 %v7081_v32  ;;  %v5226_v18 = vmax.f32 %v5160_v37, 0.0 }
 0x502   :  { %v5229_v8 = vmax.f32 %v5171_v11, 0.0 }
 0x503   :  { %v5227_v47 = vmax.f32 %v5163_v24, 0.0 }
 0x504   :  { %v7089_v23 = vpack.c.bf16 %v5229_v8, %v5228_v22 }
 0x505   :  { %v7085_v17 = vpack.c.bf16 %v5227_v47, %v5226_v18  ;;  %v7071_v53 = vpop.f32.mrb[152].mxu1 }
 0x506   :  { %v5184_v27 = vadd.f32 %v7071_v53, %v11039_v6  ;;  %v5175_v59 = vpop.f32.mrb[153].mxu1 }
 0x507   :  { %v5176_v12 = vadd.f32 %v11039_v6, %v5175_v59  ;;  %v7072_v36 = vpop.f32.mrb[154].mxu1 }
 0x508   :  { %v5187_v0 = vadd.f32 %v7072_v36, %v11039_v6  ;;  %v5178_v34 = vpop.f32.mrb[155].mxu1  ;;  %7084 = vmatpush3.bf16.xpose.msra.mxu0 %v11045_v44  ;;  %v5232_v48 = vmax.f32 %v5184_v27, 0.0 }
 0x509   :  { %v5179_v60 = vadd.f32 %v11039_v6, %v5178_v34  ;;  %7086 = vmatprep.subr.bf16.mxu0 %v7085_v17  ;;  %v5230_v20 = vmax.f32 %v5176_v12, 0.0 }
 0x50a   :  { %v5233_v1 = vmax.f32 %v5187_v0, 0.0 }
 0x50b   :  { %v5231_v10 = vmax.f32 %v5179_v60, 0.0 }
 0x50c   :  { %v7097_v55 = vpack.c.bf16 %v5233_v1, %v5232_v48 }
 0x50d   :  { %v7093_v49 = vpack.c.bf16 %v5231_v10, %v5230_v20  ;;  %v7075_v16 = vpop.f32.mrb[156].mxu1 }
 0x50e   :  { %v5200_v26 = vadd.f32 %v7075_v16, %v11039_v6  ;;  %v5191_v7 = vpop.f32.mrb[157].mxu1 }
 0x50f   :  { %v5192_v13 = vadd.f32 %v11039_v6, %v5191_v7  ;;  %v7076_v43 = vpop.f32.mrb[158].mxu1 }
 0x510   :  { %v5203_v54 = vadd.f32 %v7076_v43, %v11039_v6  ;;  %v5194_v38 = vpop.f32.mrb[159].mxu1  ;;  %7088 = vmatpush3.bf16.xpose.msra.mxu0 %v11055_v35  ;;  %v5236_v61 = vmax.f32 %v5200_v26, 0.0 }
 0x511   :  { %v5195_v44 = vadd.f32 %v11039_v6, %v5194_v38  ;;  %7090 = vmatprep.subr.bf16.mxu0 %v7089_v23  ;;  %v5234_v46 = vmax.f32 %v5192_v13, 0.0  ;;  %v5245_v6 = vlaneseq }
 0x512   :  { %v5237_v39 = vmax.f32 %v5203_v54, 0.0 }
 0x513   :  { %v5235_v41 = vmax.f32 %v5195_v44, 0.0  ;;  %v5246_v35 = vshrl.u32 %v5245_v6, 7  ;;  %vm5340_vm3 = vcmp.lt.s32.totalorder %v5245_v6, 256 }
 0x514   :  { %v7105_v25 = vpack.c.bf16 %v5237_v39, %v5236_v61 }
 0x515   :  { %v7101_v15 = vpack.c.bf16 %v5235_v41, %v5234_v46  ;;  %v5247_v28 = vsub.s32 0, %v5246_v35 }
 0x517   :  { %v5248_v63 = vrot.slane %v5243_v30, %v5247_v28 }
 0x518   :  { %7092 = vmatpush3.bf16.xpose.msra.mxu0 %v11053_v45  ;;  %v5324_v45 = vunpack.c.l.s4 %v7342_v33 }
 0x519   :  { %7094 = vmatprep.subr.bf16.mxu0 %v7093_v49 }
 0x51a   :  { %v5325_v56 = vunpack.c.0.s8 %v5324_v45 }
 0x51c   :  { %v5328_v50 = vsub.s32 %v5325_v56, %v5246_v35 }
 0x520   :  { %7096 = vmatpush3.bf16.xpose.msra.mxu0 %v11063_v58 }
 0x521   :  { %7098 = vmatprep.subr.bf16.mxu0 %v7097_v55 }
 0x528   :  { %7100 = vmatpush3.bf16.xpose.msra.mxu0 %v11061_v40 }
 0x529   :  { %7102 = vmatprep.subr.bf16.mxu0 %v7101_v15 }
 0x530   :  { %7104 = vmatpush3.bf16.xpose.msra.mxu0 %v11071_v29 }
 0x531   :  { %7106 = vmatprep.subr.bf16.mxu0 %v7105_v25 }
 0x538   :  { %7108 = vmatpush3.bf16.xpose.msra.mxu0 %v11069_v62 }
 0x53f   :  { %6994 = vmatmul.mubr.f32.vlgmr.msra.gmra.mrb[160].mxu0 %v11033_v52 }
 0x612   :  { %v5315_v58 = vpop.f32.mrb[160].mxu0 }
 0x613   :  { %v5316_v57 = vadd.f32 %v5315_v58, %v5248_v63  ;;  %v5317_v4 = vpop.f32.mrb[161].mxu0 }
 0x614   :  { %v5318_v40 = vadd.f32 %v5317_v4, %v5248_v63 }
 0x616   :  { %v5322_v19 = vcombine.low %v5316_v57, %v5318_v40 }
 0x618   :  { %v5329_v29 = vrot.slane %v5322_v19, %v5328_v50 }
 0x61a   :  { %v5336_v62 = vrot.slane %v5329_v29, %v5328_v50 }
 0x61c   :  { %5342 = vst.msk [vmem:[#allocation3] sm:$0x3] %vm5340_vm3, %v5336_v62 }
 0x61d   :  { %7327 = shalt.err (!%p7324_p4)
}
 0x61e   :  { %s7328_s28 = scalar_lea.hbm %s11117_s7, 32 }
 0x61f   :  { %p7329_p5 = scmp.ne.s32.totalorder %s11117_s7, %s7328_s28  ;;  %p7332_p6 = scmp.lt.u32.totalorder %s7328_s28, %s11117_s7 }
 0x621   :  { %p7334_p7 = pnand %p7332_p6, %p7329_p5 }
 0x623   :  { %7337 = shalt.err (!%p7334_p7)
}
 0x624   :  { %5352 = dma.vmem_to_hbm [thread:$0]  %s5350_s5, 32, %s11117_s7, [#allocation4]  }
 0x625   :  { %7338 = dma.done.wait [#allocation4], 32  }
 0x626   :  { %7339 = vsyncadd [#allocation4], 4294967264 }
 0x627   :  { %5356 = vsyncpa [#allocation4], 1 }

</bundles_post_ra>
